<compile_context>
chip_gen: v6e
topology: v6e:2x2x1
jax: 0.10.0
libtpu: 0.0.40
codegen_flags: <defaults>
</compile_context>

<pallas_src>
import functools

import jax
import jax.numpy as jnp
from jax import lax
from jax.experimental import pallas as pl
from jax.experimental.pallas import tpu as pltpu

LRELU_SLOPE = 0.1


def _leaky_relu(v, slope):
    return jnp.where(v >= 0, v, slope * v)


def _conv3_valid(a, w_packed, bias, d):
    """'valid' K=3 dilated conv as a single MXU matmul.

    a:        (C, Win)  f32 activation window (already boundary-masked)
    w_packed: (C, 3C)   bf16, tap-major packed torch weight
    bias:     (C, 1)    f32
    returns   (C, Win - 2*d) f32
    """
    _, win = a.shape
    wout = win - 2 * d
    # Stack the 3 time-shifted copies along the channel (sublane) axis: contraction
    # depth becomes 3C, so the MXU is fed once per conv instead of 3 times.
    stacked = jnp.concatenate(
        [a[:, 0:wout], a[:, d:d + wout], a[:, 2 * d:2 * d + wout]], axis=0)
    out = jnp.dot(w_packed, stacked.astype(jnp.bfloat16),
                  preferred_element_type=jnp.float32)
    return out + bias


def _resblock_kernel(x_ref, halo_ref, w_ref, b_ref, o_ref, *,
                     dilations, slope, t_tile, halo, seq_len):
    H = halo
    wfull = t_tile + 2 * H
    t0 = pl.program_id(1) * t_tile          # global start (in samples) of this tile

    # Assemble the halo'd window [left halo | tile | right halo] in VMEM.
    lh = halo_ref[:, :H].astype(jnp.float32)
    rh = halo_ref[:, H:].astype(jnp.float32)
    mid = x_ref[...].astype(jnp.float32)
    y = jnp.concatenate([lh, mid, rh], axis=1)            # (C, wfull) f32

    # Single validity mask for this window w.r.t. the true sequence [0, seq_len);
    # it re-imposes the zero 'same' padding at the real sequence boundaries
    # (interior tiles are fully valid, so the selects are no-ops there).
    g = t0 - H + lax.broadcasted_iota(jnp.int32, (1, wfull), 1)
    valid = (g >= 0) & (g < seq_len)                      # (1, wfull) bool

    off = 0                                               # cumulative left margin
    for li, d in enumerate(dilations):
        w1 = w_ref[2 * li]                                # (C, 3C) bf16
        b1 = b_ref[2 * li]                                # (C, 1)  f32
        w2 = w_ref[2 * li + 1]
        b2 = b_ref[2 * li + 1]

        wy = y.shape[1]
        a = jnp.where(valid[:, off:off + wy], _leaky_relu(y, slope), 0.0)
        c1 = _conv3_valid(a, w1, b1, d)                   # width wy - 2d
        w1o = wy - 2 * d
        a2 = jnp.where(valid[:, off + d:off + d + w1o],
                       _leaky_relu(c1, slope), 0.0)
        c2 = _conv3_valid(a2, w2, b2, 1)                  # width wy - 2d - 2

        s = d + 1                                         # halo consumed this layer
        y = c2 + y[:, s:wy - s]                           # residual, static realign
        off += s

    # After all layers the remaining width is exactly t_tile, covering [t0, t0+t_tile).
    o_ref[...] = y.astype(o_ref.dtype)


def resblock_forward(x, params, *, dilations=(1, 3, 5), slope=LRELU_SLOPE,
                     t_tile=None):
    """x: (B, C, T). params: 3 tuples (w1, b1, w2, b2); w*: (C, C, K) torch layout, b*: (C,)."""
    B, C, T = x.shape
    assert len(params) == len(dilations) == 3
    K = params[0][0].shape[-1]
    assert K == 3, "kernel specialized for kernel_size=3 (module default)"
    H = sum(d + 1 for d in dilations)                     # total halo per side (12)

    if t_tile is None:
        # Generation note: size the tile for VMEM — ~4-5 live (C, t_tile) f32 slabs
        # plus double-buffered in/out blocks.  ~2048 fits v7x (64 MiB), ~4096 v6e/v5e.
        t_tile = min(T, 2048)
    assert T % t_tile == 0, "T must be a multiple of t_tile"
    nT = T // t_tile

    # ---- pack weights/biases into 2 resident arrays -------------------------
    # (C_out, C_in, K) -> (C_out, K, C_in) -> (C_out, K*C_in): row o is
    # [w[o,:,0], w[o,:,1], w[o,:,2]], matching the tap-stacked operand order.
    w_list, b_list = [], []
    for (w1, b1, w2, b2) in params:
        for w, bb in ((w1, b1), (w2, b2)):
            w_list.append(jnp.transpose(w, (0, 2, 1)).reshape(C, K * C))
            b_list.append(bb.reshape(C, 1))
    w_all = jnp.stack(w_list).astype(jnp.bfloat16)        # (6, C, 3C) bf16 MXU operands
    b_all = jnp.stack(b_list).astype(jnp.float32)         # (6, C, 1)  f32

    # ---- per-tile halo samples (tiny side input; zeros at true boundaries) --
    x_pad = jnp.pad(x, ((0, 0), (0, 0), (H, H)))
    starts = jnp.arange(nT) * t_tile                      # padded coords of each tile
    left = starts[:, None] + jnp.arange(H)[None, :]                    # orig [t0-H, t0)
    right = starts[:, None] + t_tile + H + jnp.arange(H)[None, :]      # orig [t0+tt, t0+tt+H)
    idx = jnp.concatenate([left, right], axis=1)          # (nT, 2H)
    halos = jnp.transpose(x_pad[:, :, idx], (0, 2, 1, 3)) # (B, nT, C, 2H)

    kernel = functools.partial(
        _resblock_kernel, dilations=tuple(dilations), slope=slope,
        t_tile=t_tile, halo=H, seq_len=T)

    n_conv = 2 * len(dilations)
    return pl.pallas_call(
        kernel,
        out_shape=jax.ShapeDtypeStruct((B, C, T), x.dtype),
        grid_spec=pltpu.PrefetchScalarGridSpec(
            num_scalar_prefetch=0,
            grid=(B, nT),
            in_specs=[
                pl.BlockSpec((None, C, t_tile), lambda b, t: (b, 0, t)),
                pl.BlockSpec((None, None, C, 2 * H), lambda b, t: (b, t, 0, 0)),
                pl.BlockSpec((n_conv, C, K * C), lambda b, t: (0, 0, 0)),
                pl.BlockSpec((n_conv, C, 1), lambda b, t: (0, 0, 0)),
            ],
            out_specs=pl.BlockSpec((None, C, t_tile), lambda b, t: (b, 0, t)),
        ),
        compiler_params=pltpu.CompilerParams(
            dimension_semantics=("parallel", "parallel"),
            vmem_limit_bytes=48 * 1024 * 1024,   # > v5e 16 MiB scoped default, < v7x 64 MiB physical
        ),
    )(x, halos, w_all, b_all)


# ---------------- pure-JAX reference (matches torch forward) ----------------

def _conv1d_ref(x, w, b, dilation):
    K = w.shape[-1]
    pad = (K * dilation - dilation) // 2
    y = lax.conv_general_dilated(
        x, w, window_strides=(1,), padding=[(pad, pad)],
        rhs_dilation=(dilation,),
        dimension_numbers=("NCH", "OIH", "NCH"),
        precision=lax.Precision.HIGHEST)
    return y + b[None, :, None]


def _resblock_ref(x, params, dilations, slope=LRELU_SLOPE):
    y = x
    for (w1, b1, w2, b2), d in zip(params, dilations):
        xt = jnp.where(y >= 0, y, slope * y)
        xt = _conv1d_ref(xt, w1, b1, d)
        xt = jnp.where(xt >= 0, xt, slope * xt)
        xt = _conv1d_ref(xt, w2, b2, 1)
        y = xt + y
    return y


if __name__ == "__main__":
    B, C, T = 2, 64, 384          # small demo; T = 3 tiles of 128 -> exercises first/interior/last halos
    K = 3
    dilations = (1, 3, 5)
    t_tile = 128

    def q(a):                      # keep values bf16-exact so the bf16 MXU path stays tight
        return a.astype(jnp.bfloat16).astype(jnp.float32)

    key = jax.random.PRNGKey(0)
    keys = jax.random.split(key, 13)
    x = q(jax.random.normal(keys[0], (B, C, T), dtype=jnp.float32))

    params = []
    ki = 1
    for _ in range(3):
        w1 = q(0.01 * jax.random.normal(keys[ki], (C, C, K), jnp.float32)); ki += 1
        b1 = q(0.01 * jax.random.normal(keys[ki], (C,), jnp.float32)); ki += 1
        w2 = q(0.01 * jax.random.normal(keys[ki], (C, C, K), jnp.float32)); ki += 1
        b2 = q(0.01 * jax.random.normal(keys[ki], (C,), jnp.float32)); ki += 1
        params.append((w1, b1, w2, b2))

    out = resblock_forward(x, params, dilations=dilations, t_tile=t_tile)
    out = jax.block_until_ready(out)

    ref = _resblock_ref(x, params, dilations)
    assert out.shape == (B, C, T)
    err = float(jnp.max(jnp.abs(out - ref)))
    # bf16 matmul operands (f32 accumulation) vs. an all-f32 reference -> slightly
    # looser tolerance than a pure-f32 kernel.
    assert jnp.allclose(out, ref, atol=5e-3, rtol=5e-3), f"max abs err = {err}"

    print("KERNEL_OK")
</pallas_src>

<mosaic_0001>
module attributes {stable_mosaic.version = 11 : i64} {
  func.func @_resblock_kernel(%arg0: i32, %arg1: i32, %arg2: memref<1x64x128xf32, #tpu.memory_space<vmem>>, %arg3: memref<1x1x64x24xf32, #tpu.memory_space<vmem>>, %arg4: memref<6x64x192xbf16, #tpu.memory_space<vmem>>, %arg5: memref<6x64x1xf32, #tpu.memory_space<vmem>>, %arg6: memref<1x64x128xf32, #tpu.memory_space<vmem>>) attributes {dimension_semantics = [#tpu.dimension_semantics<parallel>, #tpu.dimension_semantics<parallel>], iteration_bounds = array<i64: 2, 3>, scalar_prefetch = 0 : i64, scratch_operands = 0 : i64, tpu.core_type = #tpu.core_type<tc>, window_params = [{transform_indices = @transform_0, window_bounds = array<i64: 1, 64, 128>}, {transform_indices = @transform_1, window_bounds = array<i64: 1, 1, 64, 24>}, {pipeline_mode = #tpu.pipeline_mode<synchronous>, transform_indices = @transform_2, window_bounds = array<i64: 6, 64, 192>}, {pipeline_mode = #tpu.pipeline_mode<synchronous>, transform_indices = @transform_3, window_bounds = array<i64: 6, 64, 1>}, {transform_indices = @transform_4, window_bounds = array<i64: 1, 64, 128>}]} {
    %c128_i32 = arith.constant 128 : i32
    %0 = arith.muli %arg1, %c128_i32 : i32
    %c0 = arith.constant 0 : index
    %c0_0 = arith.constant 0 : index
    %c0_1 = arith.constant 0 : index
    %c0_2 = arith.constant 0 : index
    %1 = vector.load %arg3[%c0, %c0_0, %c0_1, %c0_2] : memref<1x1x64x24xf32, #tpu.memory_space<vmem>>, vector<1x1x64x12xf32>
    %2 = vector.shape_cast %1 : vector<1x1x64x12xf32> to vector<64x12xf32>
    %c0_3 = arith.constant 0 : index
    %c0_4 = arith.constant 0 : index
    %c0_5 = arith.constant 0 : index
    %c12 = arith.constant 12 : index
    %3 = vector.load %arg3[%c0_3, %c0_4, %c0_5, %c12] : memref<1x1x64x24xf32, #tpu.memory_space<vmem>>, vector<1x1x64x12xf32>
    %4 = vector.shape_cast %3 : vector<1x1x64x12xf32> to vector<64x12xf32>
    %c0_6 = arith.constant 0 : index
    %c0_7 = arith.constant 0 : index
    %c0_8 = arith.constant 0 : index
    %5 = vector.load %arg2[%c0_6, %c0_7, %c0_8] : memref<1x64x128xf32, #tpu.memory_space<vmem>>, vector<1x64x128xf32>
    %6 = vector.shape_cast %5 : vector<1x64x128xf32> to vector<64x128xf32>
    %7 = tpu.concatenate %2, %6, %4 in 1 : vector<64x12xf32>, vector<64x128xf32>, vector<64x12xf32> -> vector<64x152xf32>
    %c12_i32 = arith.constant 12 : i32
    %8 = arith.subi %0, %c12_i32 : i32
    %9 = tpu.iota {dimensions = array<i32: 1>} : vector<1x152xi32>
    %10 = vector.broadcast %8 : i32 to vector<1x152xi32>
    %11 = arith.addi %10, %9 : vector<1x152xi32>
    %c0_i32 = arith.constant 0 : i32
    %12 = vector.broadcast %c0_i32 : i32 to vector<1x152xi32>
    %13 = arith.cmpi sge, %11, %12 : vector<1x152xi32>
    %c384_i32 = arith.constant 384 : i32
    %14 = vector.broadcast %c384_i32 : i32 to vector<1x152xi32>
    %15 = arith.cmpi slt, %11, %14 : vector<1x152xi32>
    %16 = arith.andi %13, %15 : vector<1x152xi1>
    %c0_9 = arith.constant 0 : index
    %c0_10 = arith.constant 0 : index
    %c0_11 = arith.constant 0 : index
    %17 = vector.load %arg4[%c0_9, %c0_10, %c0_11] : memref<6x64x192xbf16, #tpu.memory_space<vmem>>, vector<1x64x192xbf16>
    %18 = vector.shape_cast %17 : vector<1x64x192xbf16> to vector<64x192xbf16>
    %c0_12 = arith.constant 0 : index
    %c0_13 = arith.constant 0 : index
    %c0_14 = arith.constant 0 : index
    %19 = vector.load %arg5[%c0_12, %c0_13, %c0_14] : memref<6x64x1xf32, #tpu.memory_space<vmem>>, vector<1x64x1xf32>
    %20 = vector.shape_cast %19 : vector<1x64x1xf32> to vector<64x1xf32>
    %c1 = arith.constant 1 : index
    %c0_15 = arith.constant 0 : index
    %c0_16 = arith.constant 0 : index
    %21 = vector.load %arg4[%c1, %c0_15, %c0_16] : memref<6x64x192xbf16, #tpu.memory_space<vmem>>, vector<1x64x192xbf16>
    %22 = vector.shape_cast %21 : vector<1x64x192xbf16> to vector<64x192xbf16>
    %c1_17 = arith.constant 1 : index
    %c0_18 = arith.constant 0 : index
    %c0_19 = arith.constant 0 : index
    %23 = vector.load %arg5[%c1_17, %c0_18, %c0_19] : memref<6x64x1xf32, #tpu.memory_space<vmem>>, vector<1x64x1xf32>
    %24 = vector.shape_cast %23 : vector<1x64x1xf32> to vector<64x1xf32>
    %cst = arith.constant 0.000000e+00 : f32
    %25 = vector.broadcast %cst : f32 to vector<64x152xf32>
    %26 = arith.cmpf oge, %7, %25 : vector<64x152xf32>
    %cst_20 = arith.constant 1.000000e-01 : f32
    %27 = vector.broadcast %cst_20 : f32 to vector<64x152xf32>
    %28 = arith.mulf %27, %7 : vector<64x152xf32>
    %29 = arith.select %26, %7, %28 : vector<64x152xi1>, vector<64x152xf32>
    %cst_21 = arith.constant 0.000000e+00 : f32
    %30 = vector.shape_cast %16 : vector<1x152xi1> to vector<1x152xi1>
    %31 = vector.broadcast %30 : vector<1x152xi1> to vector<64x152xi1>
    %32 = vector.broadcast %cst_21 : f32 to vector<64x152xf32>
    %33 = arith.select %31, %29, %32 : vector<64x152xi1>, vector<64x152xf32>
    %34 = vector.extract_strided_slice %33 {offsets = [0, 0], sizes = [64, 150], strides = [1, 1]} : vector<64x152xf32> to vector<64x150xf32>
    %35 = vector.extract_strided_slice %33 {offsets = [0, 1], sizes = [64, 150], strides = [1, 1]} : vector<64x152xf32> to vector<64x150xf32>
    %36 = vector.extract_strided_slice %33 {offsets = [0, 2], sizes = [64, 150], strides = [1, 1]} : vector<64x152xf32> to vector<64x150xf32>
    %37 = tpu.concatenate %34, %35, %36 in 0 : vector<64x150xf32>, vector<64x150xf32>, vector<64x150xf32> -> vector<192x150xf32>
    %38 = arith.truncf %37 : vector<192x150xf32> to vector<192x150xbf16>
    %cst_22 = arith.constant dense<0.000000e+00> : vector<64x150xf32>
    %39 = tpu.matmul %18, %38, %cst_22 {dimension_numbers = #tpu.dot_dimension_numbers<[1], [0], [0], [1], [0, 0, 1, 1], [], []>} : vector<64x192xbf16>, vector<192x150xbf16>, vector<64x150xf32> -> vector<64x150xf32>
    %40 = vector.broadcast %20 : vector<64x1xf32> to vector<64x150xf32>
    %41 = arith.addf %39, %40 : vector<64x150xf32>
    %42 = vector.extract_strided_slice %16 {offsets = [0, 1], sizes = [1, 150], strides = [1, 1]} : vector<1x152xi1> to vector<1x150xi1>
    %cst_23 = arith.constant 0.000000e+00 : f32
    %43 = vector.broadcast %cst_23 : f32 to vector<64x150xf32>
    %44 = arith.cmpf oge, %41, %43 : vector<64x150xf32>
    %cst_24 = arith.constant 1.000000e-01 : f32
    %45 = vector.broadcast %cst_24 : f32 to vector<64x150xf32>
    %46 = arith.mulf %45, %41 : vector<64x150xf32>
    %47 = arith.select %44, %41, %46 : vector<64x150xi1>, vector<64x150xf32>
    %cst_25 = arith.constant 0.000000e+00 : f32
    %48 = vector.shape_cast %42 : vector<1x150xi1> to vector<1x150xi1>
    %49 = vector.broadcast %48 : vector<1x150xi1> to vector<64x150xi1>
    %50 = vector.broadcast %cst_25 : f32 to vector<64x150xf32>
    %51 = arith.select %49, %47, %50 : vector<64x150xi1>, vector<64x150xf32>
    %52 = vector.extract_strided_slice %51 {offsets = [0, 0], sizes = [64, 148], strides = [1, 1]} : vector<64x150xf32> to vector<64x148xf32>
    %53 = vector.extract_strided_slice %51 {offsets = [0, 1], sizes = [64, 148], strides = [1, 1]} : vector<64x150xf32> to vector<64x148xf32>
    %54 = vector.extract_strided_slice %51 {offsets = [0, 2], sizes = [64, 148], strides = [1, 1]} : vector<64x150xf32> to vector<64x148xf32>
    %55 = tpu.concatenate %52, %53, %54 in 0 : vector<64x148xf32>, vector<64x148xf32>, vector<64x148xf32> -> vector<192x148xf32>
    %56 = arith.truncf %55 : vector<192x148xf32> to vector<192x148xbf16>
    %cst_26 = arith.constant dense<0.000000e+00> : vector<64x148xf32>
    %57 = tpu.matmul %22, %56, %cst_26 {dimension_numbers = #tpu.dot_dimension_numbers<[1], [0], [0], [1], [0, 0, 1, 1], [], []>} : vector<64x192xbf16>, vector<192x148xbf16>, vector<64x148xf32> -> vector<64x148xf32>
    %58 = vector.broadcast %24 : vector<64x1xf32> to vector<64x148xf32>
    %59 = arith.addf %57, %58 : vector<64x148xf32>
    %60 = vector.extract_strided_slice %7 {offsets = [0, 2], sizes = [64, 148], strides = [1, 1]} : vector<64x152xf32> to vector<64x148xf32>
    %61 = arith.addf %59, %60 : vector<64x148xf32>
    %c2 = arith.constant 2 : index
    %c0_27 = arith.constant 0 : index
    %c0_28 = arith.constant 0 : index
    %62 = vector.load %arg4[%c2, %c0_27, %c0_28] : memref<6x64x192xbf16, #tpu.memory_space<vmem>>, vector<1x64x192xbf16>
    %63 = vector.shape_cast %62 : vector<1x64x192xbf16> to vector<64x192xbf16>
    %c2_29 = arith.constant 2 : index
    %c0_30 = arith.constant 0 : index
    %c0_31 = arith.constant 0 : index
    %64 = vector.load %arg5[%c2_29, %c0_30, %c0_31] : memref<6x64x1xf32, #tpu.memory_space<vmem>>, vector<1x64x1xf32>
    %65 = vector.shape_cast %64 : vector<1x64x1xf32> to vector<64x1xf32>
    %c3 = arith.constant 3 : index
    %c0_32 = arith.constant 0 : index
    %c0_33 = arith.constant 0 : index
    %66 = vector.load %arg4[%c3, %c0_32, %c0_33] : memref<6x64x192xbf16, #tpu.memory_space<vmem>>, vector<1x64x192xbf16>
    %67 = vector.shape_cast %66 : vector<1x64x192xbf16> to vector<64x192xbf16>
    %c3_34 = arith.constant 3 : index
    %c0_35 = arith.constant 0 : index
    %c0_36 = arith.constant 0 : index
    %68 = vector.load %arg5[%c3_34, %c0_35, %c0_36] : memref<6x64x1xf32, #tpu.memory_space<vmem>>, vector<1x64x1xf32>
    %69 = vector.shape_cast %68 : vector<1x64x1xf32> to vector<64x1xf32>
    %70 = vector.extract_strided_slice %16 {offsets = [0, 2], sizes = [1, 148], strides = [1, 1]} : vector<1x152xi1> to vector<1x148xi1>
    %cst_37 = arith.constant 0.000000e+00 : f32
    %71 = vector.broadcast %cst_37 : f32 to vector<64x148xf32>
    %72 = arith.cmpf oge, %61, %71 : vector<64x148xf32>
    %cst_38 = arith.constant 1.000000e-01 : f32
    %73 = vector.broadcast %cst_38 : f32 to vector<64x148xf32>
    %74 = arith.mulf %73, %61 : vector<64x148xf32>
    %75 = arith.select %72, %61, %74 : vector<64x148xi1>, vector<64x148xf32>
    %cst_39 = arith.constant 0.000000e+00 : f32
    %76 = vector.shape_cast %70 : vector<1x148xi1> to vector<1x148xi1>
    %77 = vector.broadcast %76 : vector<1x148xi1> to vector<64x148xi1>
    %78 = vector.broadcast %cst_39 : f32 to vector<64x148xf32>
    %79 = arith.select %77, %75, %78 : vector<64x148xi1>, vector<64x148xf32>
    %80 = vector.extract_strided_slice %79 {offsets = [0, 0], sizes = [64, 142], strides = [1, 1]} : vector<64x148xf32> to vector<64x142xf32>
    %81 = vector.extract_strided_slice %79 {offsets = [0, 3], sizes = [64, 142], strides = [1, 1]} : vector<64x148xf32> to vector<64x142xf32>
    %82 = vector.extract_strided_slice %79 {offsets = [0, 6], sizes = [64, 142], strides = [1, 1]} : vector<64x148xf32> to vector<64x142xf32>
    %83 = tpu.concatenate %80, %81, %82 in 0 : vector<64x142xf32>, vector<64x142xf32>, vector<64x142xf32> -> vector<192x142xf32>
    %84 = arith.truncf %83 : vector<192x142xf32> to vector<192x142xbf16>
    %cst_40 = arith.constant dense<0.000000e+00> : vector<64x142xf32>
    %85 = tpu.matmul %63, %84, %cst_40 {dimension_numbers = #tpu.dot_dimension_numbers<[1], [0], [0], [1], [0, 0, 1, 1], [], []>} : vector<64x192xbf16>, vector<192x142xbf16>, vector<64x142xf32> -> vector<64x142xf32>
    %86 = vector.broadcast %65 : vector<64x1xf32> to vector<64x142xf32>
    %87 = arith.addf %85, %86 : vector<64x142xf32>
    %88 = vector.extract_strided_slice %16 {offsets = [0, 5], sizes = [1, 142], strides = [1, 1]} : vector<1x152xi1> to vector<1x142xi1>
    %cst_41 = arith.constant 0.000000e+00 : f32
    %89 = vector.broadcast %cst_41 : f32 to vector<64x142xf32>
    %90 = arith.cmpf oge, %87, %89 : vector<64x142xf32>
    %cst_42 = arith.constant 1.000000e-01 : f32
    %91 = vector.broadcast %cst_42 : f32 to vector<64x142xf32>
    %92 = arith.mulf %91, %87 : vector<64x142xf32>
    %93 = arith.select %90, %87, %92 : vector<64x142xi1>, vector<64x142xf32>
    %cst_43 = arith.constant 0.000000e+00 : f32
    %94 = vector.shape_cast %88 : vector<1x142xi1> to vector<1x142xi1>
    %95 = vector.broadcast %94 : vector<1x142xi1> to vector<64x142xi1>
    %96 = vector.broadcast %cst_43 : f32 to vector<64x142xf32>
    %97 = arith.select %95, %93, %96 : vector<64x142xi1>, vector<64x142xf32>
    %98 = vector.extract_strided_slice %97 {offsets = [0, 0], sizes = [64, 140], strides = [1, 1]} : vector<64x142xf32> to vector<64x140xf32>
    %99 = vector.extract_strided_slice %97 {offsets = [0, 1], sizes = [64, 140], strides = [1, 1]} : vector<64x142xf32> to vector<64x140xf32>
    %100 = vector.extract_strided_slice %97 {offsets = [0, 2], sizes = [64, 140], strides = [1, 1]} : vector<64x142xf32> to vector<64x140xf32>
    %101 = tpu.concatenate %98, %99, %100 in 0 : vector<64x140xf32>, vector<64x140xf32>, vector<64x140xf32> -> vector<192x140xf32>
    %102 = arith.truncf %101 : vector<192x140xf32> to vector<192x140xbf16>
    %cst_44 = arith.constant dense<0.000000e+00> : vector<64x140xf32>
    %103 = tpu.matmul %67, %102, %cst_44 {dimension_numbers = #tpu.dot_dimension_numbers<[1], [0], [0], [1], [0, 0, 1, 1], [], []>} : vector<64x192xbf16>, vector<192x140xbf16>, vector<64x140xf32> -> vector<64x140xf32>
    %104 = vector.broadcast %69 : vector<64x1xf32> to vector<64x140xf32>
    %105 = arith.addf %103, %104 : vector<64x140xf32>
    %106 = vector.extract_strided_slice %61 {offsets = [0, 4], sizes = [64, 140], strides = [1, 1]} : vector<64x148xf32> to vector<64x140xf32>
    %107 = arith.addf %105, %106 : vector<64x140xf32>
    %c4 = arith.constant 4 : index
    %c0_45 = arith.constant 0 : index
    %c0_46 = arith.constant 0 : index
    %108 = vector.load %arg4[%c4, %c0_45, %c0_46] : memref<6x64x192xbf16, #tpu.memory_space<vmem>>, vector<1x64x192xbf16>
    %109 = vector.shape_cast %108 : vector<1x64x192xbf16> to vector<64x192xbf16>
    %c4_47 = arith.constant 4 : index
    %c0_48 = arith.constant 0 : index
    %c0_49 = arith.constant 0 : index
    %110 = vector.load %arg5[%c4_47, %c0_48, %c0_49] : memref<6x64x1xf32, #tpu.memory_space<vmem>>, vector<1x64x1xf32>
    %111 = vector.shape_cast %110 : vector<1x64x1xf32> to vector<64x1xf32>
    %c5 = arith.constant 5 : index
    %c0_50 = arith.constant 0 : index
    %c0_51 = arith.constant 0 : index
    %112 = vector.load %arg4[%c5, %c0_50, %c0_51] : memref<6x64x192xbf16, #tpu.memory_space<vmem>>, vector<1x64x192xbf16>
    %113 = vector.shape_cast %112 : vector<1x64x192xbf16> to vector<64x192xbf16>
    %c5_52 = arith.constant 5 : index
    %c0_53 = arith.constant 0 : index
    %c0_54 = arith.constant 0 : index
    %114 = vector.load %arg5[%c5_52, %c0_53, %c0_54] : memref<6x64x1xf32, #tpu.memory_space<vmem>>, vector<1x64x1xf32>
    %115 = vector.shape_cast %114 : vector<1x64x1xf32> to vector<64x1xf32>
    %116 = vector.extract_strided_slice %16 {offsets = [0, 6], sizes = [1, 140], strides = [1, 1]} : vector<1x152xi1> to vector<1x140xi1>
    %cst_55 = arith.constant 0.000000e+00 : f32
    %117 = vector.broadcast %cst_55 : f32 to vector<64x140xf32>
    %118 = arith.cmpf oge, %107, %117 : vector<64x140xf32>
    %cst_56 = arith.constant 1.000000e-01 : f32
    %119 = vector.broadcast %cst_56 : f32 to vector<64x140xf32>
    %120 = arith.mulf %119, %107 : vector<64x140xf32>
    %121 = arith.select %118, %107, %120 : vector<64x140xi1>, vector<64x140xf32>
    %cst_57 = arith.constant 0.000000e+00 : f32
    %122 = vector.shape_cast %116 : vector<1x140xi1> to vector<1x140xi1>
    %123 = vector.broadcast %122 : vector<1x140xi1> to vector<64x140xi1>
    %124 = vector.broadcast %cst_57 : f32 to vector<64x140xf32>
    %125 = arith.select %123, %121, %124 : vector<64x140xi1>, vector<64x140xf32>
    %126 = vector.extract_strided_slice %125 {offsets = [0, 0], sizes = [64, 130], strides = [1, 1]} : vector<64x140xf32> to vector<64x130xf32>
    %127 = vector.extract_strided_slice %125 {offsets = [0, 5], sizes = [64, 130], strides = [1, 1]} : vector<64x140xf32> to vector<64x130xf32>
    %128 = vector.extract_strided_slice %125 {offsets = [0, 10], sizes = [64, 130], strides = [1, 1]} : vector<64x140xf32> to vector<64x130xf32>
    %129 = tpu.concatenate %126, %127, %128 in 0 : vector<64x130xf32>, vector<64x130xf32>, vector<64x130xf32> -> vector<192x130xf32>
    %130 = arith.truncf %129 : vector<192x130xf32> to vector<192x130xbf16>
    %cst_58 = arith.constant dense<0.000000e+00> : vector<64x130xf32>
    %131 = tpu.matmul %109, %130, %cst_58 {dimension_numbers = #tpu.dot_dimension_numbers<[1], [0], [0], [1], [0, 0, 1, 1], [], []>} : vector<64x192xbf16>, vector<192x130xbf16>, vector<64x130xf32> -> vector<64x130xf32>
    %132 = vector.broadcast %111 : vector<64x1xf32> to vector<64x130xf32>
    %133 = arith.addf %131, %132 : vector<64x130xf32>
    %134 = vector.extract_strided_slice %16 {offsets = [0, 11], sizes = [1, 130], strides = [1, 1]} : vector<1x152xi1> to vector<1x130xi1>
    %cst_59 = arith.constant 0.000000e+00 : f32
    %135 = vector.broadcast %cst_59 : f32 to vector<64x130xf32>
    %136 = arith.cmpf oge, %133, %135 : vector<64x130xf32>
    %cst_60 = arith.constant 1.000000e-01 : f32
    %137 = vector.broadcast %cst_60 : f32 to vector<64x130xf32>
    %138 = arith.mulf %137, %133 : vector<64x130xf32>
    %139 = arith.select %136, %133, %138 : vector<64x130xi1>, vector<64x130xf32>
    %cst_61 = arith.constant 0.000000e+00 : f32
    %140 = vector.shape_cast %134 : vector<1x130xi1> to vector<1x130xi1>
    %141 = vector.broadcast %140 : vector<1x130xi1> to vector<64x130xi1>
    %142 = vector.broadcast %cst_61 : f32 to vector<64x130xf32>
    %143 = arith.select %141, %139, %142 : vector<64x130xi1>, vector<64x130xf32>
    %144 = vector.extract_strided_slice %143 {offsets = [0, 0], sizes = [64, 128], strides = [1, 1]} : vector<64x130xf32> to vector<64x128xf32>
    %145 = vector.extract_strided_slice %143 {offsets = [0, 1], sizes = [64, 128], strides = [1, 1]} : vector<64x130xf32> to vector<64x128xf32>
    %146 = vector.extract_strided_slice %143 {offsets = [0, 2], sizes = [64, 128], strides = [1, 1]} : vector<64x130xf32> to vector<64x128xf32>
    %147 = tpu.concatenate %144, %145, %146 in 0 : vector<64x128xf32>, vector<64x128xf32>, vector<64x128xf32> -> vector<192x128xf32>
    %148 = arith.truncf %147 : vector<192x128xf32> to vector<192x128xbf16>
    %cst_62 = arith.constant dense<0.000000e+00> : vector<64x128xf32>
    %149 = tpu.matmul %113, %148, %cst_62 {dimension_numbers = #tpu.dot_dimension_numbers<[1], [0], [0], [1], [0, 0, 1, 1], [], []>} : vector<64x192xbf16>, vector<192x128xbf16>, vector<64x128xf32> -> vector<64x128xf32>
    %150 = vector.broadcast %115 : vector<64x1xf32> to vector<64x128xf32>
    %151 = arith.addf %149, %150 : vector<64x128xf32>
    %152 = vector.extract_strided_slice %107 {offsets = [0, 6], sizes = [64, 128], strides = [1, 1]} : vector<64x140xf32> to vector<64x128xf32>
    %153 = arith.addf %151, %152 : vector<64x128xf32>
    %c0_63 = arith.constant 0 : index
    %c0_64 = arith.constant 0 : index
    %c0_65 = arith.constant 0 : index
    %154 = vector.load %arg6[%c0_63, %c0_64, %c0_65] : memref<1x64x128xf32, #tpu.memory_space<vmem>>, vector<1x64x128xf32>
    %155 = vector.shape_cast %154 : vector<1x64x128xf32> to vector<64x128xf32>
    %156 = vector.shape_cast %153 : vector<64x128xf32> to vector<1x64x128xf32>
    tpu.vector_store %arg6[%c0_63, %c0_64, %c0_65], %156 {strides = array<i32>} : memref<1x64x128xf32, #tpu.memory_space<vmem>>, vector<1x64x128xf32>,
    return
  }
  func.func @transform_0(%arg0: i32, %arg1: i32) -> (i32, i32, i32) {
    %c0_i32 = arith.constant 0 : i32
    %c0_i32_0 = arith.constant 0 : i32
    return %arg0, %c0_i32, %arg1 : i32, i32, i32
  }
  func.func @transform_1(%arg0: i32, %arg1: i32) -> (i32, i32, i32, i32) {
    %c0_i32 = arith.constant 0 : i32
    %c0_i32_0 = arith.constant 0 : i32
    %c0_i32_1 = arith.constant 0 : i32
    return %arg0, %arg1, %c0_i32, %c0_i32_0 : i32, i32, i32, i32
  }
  func.func @transform_2(%arg0: i32, %arg1: i32) -> (i32, i32, i32) {
    %c0_i32 = arith.constant 0 : i32
    %c0_i32_0 = arith.constant 0 : i32
    %c0_i32_1 = arith.constant 0 : i32
    %c0_i32_2 = arith.constant 0 : i32
    return %c0_i32, %c0_i32_0, %c0_i32_1 : i32, i32, i32
  }
  func.func @transform_3(%arg0: i32, %arg1: i32) -> (i32, i32, i32) {
    %c0_i32 = arith.constant 0 : i32
    %c0_i32_0 = arith.constant 0 : i32
    %c0_i32_1 = arith.constant 0 : i32
    %c0_i32_2 = arith.constant 0 : i32
    return %c0_i32, %c0_i32_0, %c0_i32_1 : i32, i32, i32
  }
  func.func @transform_4(%arg0: i32, %arg1: i32) -> (i32, i32, i32) {
    %c0_i32 = arith.constant 0 : i32
    %c0_i32_0 = arith.constant 0 : i32
    return %arg0, %c0_i32, %arg1 : i32, i32, i32
  }
}

</mosaic_0001>

<bundles_post_ra>
// kernel: tpu_custom_call.1
= control target key start
LH: loop header
LB: loop body
LE: loop exit
PB: predicated region body
PF: predicated region fallthrough
CT: control target
= control target key end

     0   :  { %9 = vsyncpa [#allocation4], 0  ;;  %s7418_s0 = inlined_call_operand.vmem [shape: f32[2,64,384], index: 0, kind: input, shape index: {}]   ;;  %s7419_s1 = inlined_call_operand.vmem [shape: f32[2,3,64,24], index: 1, kind: input, shape index: {}]   ;;  %s7420_s2 = inlined_call_operand.vmem [shape: bf16[6,64,192], index: 2, kind: input, shape index: {}]   ;;  %s7421_s3 = inlined_call_operand.vmem [shape: f32[6,64,1], index: 3, kind: input, shape index: {}]   ;;  %s7422_s4 = inlined_call_operand.hbm [shape: f32[2,64,384], index: 4, kind: output, shape index: {}]  }
   0x1   :  { %11 = vsyncpa [#allocation4 + $0x1], 0  ;;  %s5213_s15 = smov 0   ;;  %s5215_s16 = smov 0  }
   0x2   :  { %s5217_s17 = smov 0   ;;  %s5219_s18 = smov 0  }
   0x3   :  { %s5221_s19 = smov 0   ;;  %s5223_s20 = smov 0  }
   0x4   :  { %s5225_s21 = smov 0   ;;  %s5227_s22 = smov 0  }
   0x5 LB: > { %s4036_s23 = sadd.s32 4294967295, %s5167_s22   ;;  %s4037_s24 = sadd.s32 4294967294, %s5167_s22   ;;  %s5167_s22 = sphi %s5227_s22, %s17_s22   ;;  %s5163_s21 = sphi %s5225_s21, %s7451_s21   ;;  %s5159_s20 = sphi %s5223_s20, %s7450_s20   ;;  %s5155_s19 = sphi %s5221_s19, %s7449_s19   ;;  %s5151_s18 = sphi %s5219_s18, %s7448_s18   ;;  %s5147_s17 = sphi %s5217_s17, %s7447_s17   ;;  %s5143_s16 = sphi %s5215_s16, %s7446_s16   ;;  %s5139_s15 = sphi %s5213_s15, %s7445_s15  }
   0x6   : > { %s26_s25 = sadd.s32 1, %s5159_s20  ;;  %s29_s26 = sadd.s32 1, %s5163_s21 }
   0x7   : > { %p27_p0 = scmp.ge.s32.totalorder %s26_s25, 3  ;;  %p45_p1 = scmp.ne.s32.totalorder %s5147_s17, %s5143_s16 }
   0x8   : > { %p46_p2 = scmp.eq.s32.totalorder %s5167_s22, 0  ;;  %p147_p5 = scmp.eq.s32.totalorder %s4036_s23, 5 }
   0x9   : > { %s7453_s25 = smov (%p27_p0, %s26_s25), 0  ;;  %s7455_s26 = smov (!%p27_p0, %s29_s26), %s5163_s21 }
   0xa   : > { %s34_s27 = ssub.s32 %s5159_s20, %s7453_s25  ;;  %p5265_p3 = por %p46_p2, %p45_p1 }
   0xb   : > { %p31_p4 = scmp.ge.s32.totalorder %s7455_s26, 2  ;;  %p152_p6 = scmp.ne.s32.totalorder %s5143_s16, %s5139_s15 }
   0xc   : > { %p153_p7 = scmp.eq.s32.totalorder %s4037_s24, 5  ;;  %p5273_p8 = por %p147_p5, %p45_p1 }
   0xd   : > { %s7457_s26 = smov (%p31_p4, %s7455_s26), 0  ;;  %s38_s7 = sadd.s32 1, %s5147_s17 }
   0xe   : > { %p5277_p9 = por %p153_p7, %p152_p6  ;;  %s33_s5 = ssub.s32 %s5163_s21, %s7457_s26 }
   0xf   : > { %s35_s6 = sor.u32 %s34_s27, %s33_s5  ;;  %p4039_p11 = scmp.ge.s32.totalorder %s5167_s22, 6 }
  0x10   : > { %p36_p10 = scmp.eq.s32.totalorder %s35_s6, 0 }
  0x11   : > { %175 = sbr.rel (%p4039_p11) target bundleno = 33 (0x21), region = 24 }
  0x12   : > { %s5285_s8 = scalar_select %p36_p10, %s5147_s17, %s38_s7  }
  0x16   : > { %178 = sbr.rel (!%p5265_p3) target bundleno = 33 (0x21), region = 28  ;;  %s180_s9 = sand.u32 (%p5265_p3), 1, %s5147_s17  }
  0x17   : > { %s4229_s10 = smul.u32 (%p5265_p3), 24, %s5163_s21  ;;  %s4040_s11 = sshll.u32 (%p5265_p3), %s180_s9, 6 }
  0x18   : > { %s182_s27 = scalar_lea.vmem (%p5265_p3), [#allocation2], %s4040_s11 }
  0x19   : > { %s184_s12 = sadd.s32 (%p5265_p3), %s5159_s20, %s4229_s10 }
  0x1a   : > { %s4041_s13 = sshll.u32 (%p5265_p3), %s184_s12, 3 }
  0x1b   : > { %s186_s24 = scalar_lea.vmem %s7418_s0, %s4041_s13 }
  0x1c   : > { %v229_v0 = vld [vmem:[%s186_s24] sm:$0xff]  ;;  %v231_v1 = vld [vmem:[%s186_s24 + $0x18] sm:$0xff]  ;;  %v233_v2 = vld [vmem:[%s186_s24 + $0x30] sm:$0xff] }
  0x1d   : > { %230 = vst [vmem:[%s182_s27] sm:$0xff] %v229_v0  ;;  %232 = vst [vmem:[%s182_s27 + $0x8] sm:$0xff] %v231_v1  ;;  %v235_v3 = vld [vmem:[%s186_s24 + $0x48] sm:$0xff]  ;;  %v237_v4 = vld [vmem:[%s186_s24 + $0x60] sm:$0xff] }
  0x1e   : > { %234 = vst [vmem:[%s182_s27 + $0x10] sm:$0xff] %v233_v2  ;;  %v239_v5 = vld [vmem:[%s186_s24 + $0x78] sm:$0xff]  ;;  %236 = vst [vmem:[%s182_s27 + $0x18] sm:$0xff] %v235_v3  ;;  %v241_v6 = vld [vmem:[%s186_s24 + $0x90] sm:$0xff] }
  0x1f   : > { %238 = vst [vmem:[%s182_s27 + $0x20] sm:$0xff] %v237_v4  ;;  %240 = vst [vmem:[%s182_s27 + $0x28] sm:$0xff] %v239_v5  ;;  %v243_v7 = vld [vmem:[%s186_s24 + $0xa8] sm:$0xff] }
  0x20   : > { %242 = vst [vmem:[%s182_s27 + $0x30] sm:$0xff] %v241_v6  ;;  %244 = vst [vmem:[%s182_s27 + $0x38] sm:$0xff] %v243_v7 }
  0x21 PF: > { %p4042_p12 = scmp.ge.s32.totalorder %s5167_s22, 1  ;;  %p261_p13 = scmp.lt.s32.totalorder %s5167_s22, 7 }
  0x23   : > { %p262_p0 = pnand %p4042_p12, %p261_p13 }
  0x24   : > { %s7423_s28 = sand.u32 (!%p262_p0), 1, %s5143_s16   ;;  %s5169_s7 = smov (!%p262_p0), 12  }
  0x25   : > { %265 = sbr.rel (%p262_p0) target bundleno = 3762 (0xeb2), region = 70  ;;  %s5301_s5 = sshll.u32 (!%p262_p0), %s7423_s28, 6 }
  0x26   : > { %s270_s6 = scalar_lea.vmem (!%p262_p0), [#allocation2], %s5301_s5  ;;  %p302_p1 = scmp.lt.s32.totalorder (!%p262_p0), %s5155_s19, 1 }
  0x27   : > { %p304_p2 = scmp.lt.s32.totalorder (!%p262_p0), %s5151_s18, 2  ;;  %s4047_s13 = sshll.u32 (!%p262_p0), %s5151_s18, 7 }
  0x28   : > { %s4048_s23 = sadd.s32 (!%p262_p0), 4294967284, %s4047_s13  ;;  %s5170_s28 = smov (!%p262_p0), 127  }
  0x29   : > { %s5180_s27 = smov (!%p262_p0), 6   ;;  %s7443_s13 = smov (!%p262_p0), 126  }
  0x2a   : > { %v327_v8 = vld [vmem:[%s270_s6 + $0x30] sm:$0xff]  ;;  %v325_v9 = vld [vmem:[%s270_s6 + $0x20] sm:$0xff]  ;;  %v328_v10 = vld [vmem:[%s270_s6 + $0x38] sm:$0xff]  ;;  %s303_s9 = scalar_select %p302_p1, %s5155_s19, 1  ;;  %v379_v16 = vlaneseq  ;;  %v382_v19 = vstv %s4048_s23  ;;  %vm361_vm0 = vcmask 97280  }
  0x2b   : > { %349 = vrot.lane.b32.xlu0 %v327_v8, %s5169_s7  ;;  %345 = vrot.lane.b32.xlu1 %v325_v9, %s5169_s7  ;;  %v326_v11 = vld [vmem:[%s270_s6 + $0x28] sm:$0xff]  ;;  %v323_v12 = vld [vmem:[%s270_s6 + $0x10] sm:$0xff]  ;;  %s305_s10 = scalar_select %p304_p2, %s5151_s18, 2 }
  0x2c   : > { %v324_v13 = vld [vmem:[%s270_s6 + $0x18] sm:$0xff]  ;;  %v321_v14 = vld [vmem:[%s270_s6] sm:$0xff]  ;;  %v322_v15 = vld [vmem:[%s270_s6 + $0x8] sm:$0xff]  ;;  %s4230_s11 = smul.u32 24, %s303_s9  ;;  %v380_v17 = vand.u32 127, %v379_v16  ;;  %s5175_s23 = smov 125  }
  0x2d   : > { %s4045_s12 = sshll.u32 %s305_s10, 3  ;;  %s5177_s9 = smov 5  }
  0x2e   : > { %s308_s14 = sadd.s32 %s4230_s11, %s4045_s12  ;;  %v381_v18 = vadd.s32 128, %v380_v17  ;;  %v383_v20 = vadd.s32 %v382_v19, %v380_v17  ;;  %s5173_s11 = smov 1  }
  0x2f   : > { %351 = vrot.lane.b32.xlu0 %v328_v10, %s5169_s7  ;;  %347 = vrot.lane.b32.xlu1 %v326_v11, %s5169_s7  ;;  %s4046_s24 = sshll.u32 %s308_s14, 3  ;;  %s5174_s14 = smov 2  }
  0x30   : > { %s5312_s6 = scalar_lea.vmem %s7419_s1, %s4046_s24  ;;  %v384_v21 = vadd.s32 %v382_v19, %v381_v18  ;;  %vm385_vm1 = vcmp.ge.s32.totalorder %v383_v20, 0  ;;  %vm387_vm3 = vcmp.lt.s32.totalorder %v383_v20, 384  ;;  %s7426_s24 = smov 122  }
  0x31   : > { %v319_v22 = vld [vmem:[%s5312_s6 + $0x30] sm:$0xff]  ;;  %v317_v23 = vld [vmem:[%s5312_s6 + $0x20] sm:$0xff]  ;;  %v320_v30 = vld [vmem:[%s5312_s6 + $0x38] sm:$0xff]  ;;  %s5178_s10 = smov 123   ;;  %s5179_s12 = smov 124  }
  0x32   : > { %vm386_vm2 = vcmp.ge.s32.totalorder %v384_v21, 0  ;;  %vm388_vm4 = vcmp.lt.s32.totalorder %v384_v21, 384  ;;  %v318_v31 = vld [vmem:[%s5312_s6 + $0x28] sm:$0xff]  ;;  %vm5340_vm9 = vmand %vm385_vm1, %vm387_vm3  ;;  %v315_v45 = vld [vmem:[%s5312_s6 + $0x10] sm:$0xff] }
  0x33   : > { %341 = vrot.lane.b32.xlu0 %v323_v12, %s5169_s7  ;;  %343 = vrot.lane.b32.xlu1 %v324_v13, %s5169_s7  ;;  %vm5365_vm10 = vmand %vm386_vm2, %vm388_vm4  ;;  %v316_v47 = vld [vmem:[%s5312_s6 + $0x18] sm:$0xff]  ;;  %v313_v3 = vld [vmem:[%s5312_s6] sm:$0xff] }
  0x34   : > { %v314_v12 = vld [vmem:[%s5312_s6 + $0x8] sm:$0xff]  ;;  %s5181_s6 = smov 118  }
  0x37   : > { %337 = vrot.lane.b32.xlu0 %v321_v14, %s5169_s7  ;;  %339 = vrot.lane.b32.xlu1 %v322_v15, %s5169_s7  ;;  %s7428_s7 = smov 126  }
  0x9d   : > { %v350_v24 = vpop.permute.xlu0 %349  ;;  %v346_v25 = vpop.permute.xlu1 %345 }
  0x9e   : > { %v5317_v26 = vsel %vm361_vm0, %v319_v22, %v350_v24  ;;  %v5320_v27 = vsel %vm361_vm0, %v350_v24, %v319_v22  ;;  %v5323_v28 = vsel %vm361_vm0, %v317_v23, %v346_v25  ;;  %v5326_v29 = vsel %vm361_vm0, %v346_v25, %v317_v23 }
  0x9f   : > { %vm437_vm5 = vcmp.ge.f32.partialorder %v5317_v26, 0.0  ;;  %vm438_vm6 = vcmp.ge.f32.partialorder %v5320_v27, 0.0  ;;  %v453_v32 = vmul.f32 0.1, %v5317_v26  ;;  %v454_v33 = vmul.f32 0.1, %v5320_v27 }
  0xa0   : > { %vm433_vm7 = vcmp.ge.f32.partialorder %v5323_v28, 0.0  ;;  %vm434_vm8 = vcmp.ge.f32.partialorder %v5326_v29, 0.0  ;;  %v449_v34 = vmul.f32 0.1, %v5323_v28  ;;  %v450_v35 = vmul.f32 0.1, %v5326_v29 }
  0xa1   : > { %v352_v36 = vpop.permute.xlu0 %351  ;;  %v348_v37 = vpop.permute.xlu1 %347  ;;  %v5345_v39 = vsel %vm437_vm5, %v5317_v26, %v453_v32  ;;  %v5348_v40 = vsel %vm438_vm6, %v5320_v27, %v454_v33 }
  0xa2   : > { %v5351_v41 = vsel %vm361_vm0, %v320_v30, %v352_v36  ;;  %v5354_v42 = vsel %vm361_vm0, %v352_v36, %v320_v30  ;;  %v5357_v43 = vsel %vm361_vm0, %v318_v31, %v348_v37  ;;  %v5360_v44 = vsel %vm361_vm0, %v348_v37, %v318_v31 }
  0xa3   : > { %vm439_vm11 = vcmp.ge.f32.partialorder %v5351_v41, 0.0  ;;  %vm440_vm12 = vcmp.ge.f32.partialorder %v5354_v42, 0.0  ;;  %v455_v48 = vmul.f32 0.1, %v5351_v41  ;;  %v456_v49 = vmul.f32 0.1, %v5354_v42 }
  0xa4   : > { %vm435_vm13 = vcmp.ge.f32.partialorder %v5357_v43, 0.0  ;;  %vm436_vm14 = vcmp.ge.f32.partialorder %v5360_v44, 0.0  ;;  %v451_v50 = vmul.f32 0.1, %v5357_v43  ;;  %v452_v51 = vmul.f32 0.1, %v5360_v44 }
  0xa5   : > { %v342_v52 = vpop.permute.xlu0 %341  ;;  %v489_v53 = vsel %vm5340_vm9, %v5345_v39, 0.0  ;;  %v490_v54 = vsel %vm5365_vm10, %v5348_v40, 0.0  ;;  %v344_v55 = vpop.permute.xlu1 %343  ;;  %v5385_v56 = vsel %vm439_vm11, %v5351_v41, %v455_v48  ;;  %v5388_v57 = vsel %vm440_vm12, %v5354_v42, %v456_v49  ;;  %vm5611_vm11 = vmpackc.low %vm5365_vm10, %vm5365_vm10 }
  0xa6   : > { %v5391_v58 = vsel %vm361_vm0, %v315_v45, %v342_v52  ;;  %v5394_v59 = vsel %vm361_vm0, %v342_v52, %v315_v45  ;;  %v5396_v60 = vpack.i.bf16 %v490_v54, %v489_v53  ;;  %v5399_v61 = vsel %vm361_vm0, %v316_v47, %v344_v55  ;;  %vm5623_vm12 = vmpackc.low %vm5340_vm9, %vm5340_vm9 }
  0xa7   : > { %vm429_vm15 = vcmp.ge.f32.partialorder %v5391_v58, 0.0  ;;  %vm430_vm1 = vcmp.ge.f32.partialorder %v5394_v59, 0.0  ;;  %v445_v62 = vmul.f32 0.1, %v5391_v58  ;;  %v446_v63 = vmul.f32 0.1, %v5394_v59 }
  0xa8   : > { %4322 = vrot.lane.b32.xlu0 %v5396_v60, %s5170_s28  ;;  %v5408_v0 = vsel %vm361_vm0, %v344_v55, %v316_v47  ;;  %vm431_vm2 = vcmp.ge.f32.partialorder %v5399_v61, 0.0  ;;  %v447_v1 = vmul.f32 0.1, %v5399_v61  ;;  %v491_v2 = vsel %vm5340_vm9, %v5385_v56, 0.0 }
  0xa9   : > { %vm432_vm3 = vcmp.ge.f32.partialorder %v5408_v0, 0.0  ;;  %v448_v4 = vmul.f32 0.1, %v5408_v0  ;;  %v492_v5 = vsel %vm5365_vm10, %v5388_v57, 0.0  ;;  %v4074_v6 = vpack.c.bf16 %v5388_v57, %v5348_v40  ;;  %v338_v7 = vpop.permute.xlu0 %337  ;;  %v340_v13 = vpop.permute.xlu1 %339 }
  0xaa   : > { %v4077_v8 = vpack.c.bf16 %v5385_v56, %v5345_v39  ;;  %v4326_v9 = vpack.i.bf16 %v492_v5, %v491_v2  ;;  %v5428_v10 = vsel %vm433_vm7, %v5323_v28, %v449_v34  ;;  %v5433_v11 = vsel %vm434_vm8, %v5326_v29, %v450_v35 }
  0xab   : > { %v485_v14 = vsel %vm5340_vm9, %v5428_v10, 0.0  ;;  %v486_v15 = vsel %vm5365_vm10, %v5433_v11, 0.0  ;;  %v5443_v16 = vsel %vm361_vm0, %v313_v3, %v338_v7  ;;  %v5446_v17 = vsel %vm361_vm0, %v338_v7, %v313_v3 }
  0xac   : > { %4327 = vrot.lane.b32.xlu1 %v4326_v9, %s5170_s28  ;;  %v4331_v18 = vpack.i.bf16 %v486_v15, %v485_v14  ;;  %vm425_vm4 = vcmp.ge.f32.partialorder %v5443_v16, 0.0  ;;  %vm426_vm5 = vcmp.ge.f32.partialorder %v5446_v17, 0.0  ;;  %v441_v19 = vmul.f32 0.1, %v5443_v16 }
  0xad   : > { %v442_v20 = vmul.f32 0.1, %v5446_v17  ;;  %v5454_v21 = vsel %vm361_vm0, %v314_v12, %v340_v13  ;;  %v5457_v22 = vsel %vm361_vm0, %v340_v13, %v314_v12  ;;  %v5462_v23 = vsel %vm435_vm13, %v5357_v43, %v451_v50 }
  0xae   : > { %4332 = vrot.lane.b32.xlu0 %v4331_v18, %s5170_s28  ;;  %vm427_vm6 = vcmp.ge.f32.partialorder %v5454_v21, 0.0  ;;  %vm428_vm7 = vcmp.ge.f32.partialorder %v5457_v22, 0.0  ;;  %v443_v24 = vmul.f32 0.1, %v5454_v21  ;;  %v444_v25 = vmul.f32 0.1, %v5457_v22 }
  0xaf   : > { %v5472_v30 = vsel %vm436_vm14, %v5360_v44, %v452_v51  ;;  %v487_v31 = vsel %vm5340_vm9, %v5462_v23, 0.0  ;;  %v4083_v32 = vpack.c.bf16 %v5462_v23, %v5428_v10  ;;  %v5482_v33 = vsel %vm429_vm15, %v5391_v58, %v445_v62 }
  0xb0   : > { %v488_v34 = vsel %vm5365_vm10, %v5472_v30, 0.0  ;;  %v4080_v35 = vpack.c.bf16 %v5472_v30, %v5433_v11  ;;  %v5492_v36 = vsel %vm430_vm1, %v5394_v59, %v446_v63  ;;  %v481_v37 = vsel %vm5340_vm9, %v5482_v33, 0.0 }
  0xb1   : > { %v4336_v45 = vpack.i.bf16 %v488_v34, %v487_v31  ;;  %v482_v47 = vsel %vm5365_vm10, %v5492_v36, 0.0  ;;  %v5503_v48 = vsel %vm431_vm2, %v5399_v61, %v447_v1  ;;  %v5508_v49 = vsel %vm432_vm3, %v5408_v0, %v448_v4  ;;  %v402_v31 = vld [vmem:[%s7421_s3 + $0x18] sm:$0xff]  ;;  %v399_v34 = vld [vmem:[%s7421_s3] sm:$0xff] }
  0xb2   : > { %v4341_v50 = vpack.i.bf16 %v482_v47, %v481_v37  ;;  %v483_v51 = vsel %vm5340_vm9, %v5503_v48, 0.0  ;;  %v484_v52 = vsel %vm5365_vm10, %v5508_v49, 0.0  ;;  %v4086_v53 = vpack.c.bf16 %v5508_v49, %v5492_v36  ;;  %v400_v37 = vld [vmem:[%s7421_s3 + $0x8] sm:$0xff] }
  0xb3   : > { %4337 = vrot.lane.b32.xlu1 %v4336_v45, %s5170_s28  ;;  %v4089_v54 = vpack.c.bf16 %v5503_v48, %v5482_v33  ;;  %v5524_v55 = vsel %vm425_vm4, %v5443_v16, %v441_v19  ;;  %v5529_v62 = vsel %vm426_vm5, %v5446_v17, %v442_v20  ;;  %v5541_v2 = vsel %vm427_vm6, %v5454_v21, %v443_v24  ;;  %v5005_v19 = vld [vmem:[%s7420_s2 + $0x4] ss:$8 sps:$4 sm:$0xff]  }
  0xb4   : > { %4342 = vrot.lane.b32.xlu0 %v4341_v50, %s5170_s28  ;;  %v477_v63 = vsel %vm5340_vm9, %v5524_v55, 0.0  ;;  %v478_v1 = vsel %vm5365_vm10, %v5529_v62, 0.0  ;;  %v5546_v3 = vsel %vm428_vm7, %v5457_v22, %v444_v25  ;;  %v4346_v4 = vpack.i.bf16 %v484_v52, %v483_v51  ;;  %v403_v20 = vld [vmem:[%s7421_s3 + $0x20] sm:$0xff]  ;;  %v404_v24 = vld [vmem:[%s7421_s3 + $0x28] sm:$0xff]  ;;  %v401_v25 = vld [vmem:[%s7421_s3 + $0x10] sm:$0xff] }
  0xb5   : > { %v4351_v5 = vpack.i.bf16 %v478_v1, %v477_v63  ;;  %v4092_v7 = vpack.c.bf16 %v5546_v3, %v5529_v62  ;;  %v479_v12 = vsel %vm5340_vm9, %v5541_v2, 0.0  ;;  %v480_v13 = vsel %vm5365_vm10, %v5546_v3, 0.0 }
  0xb6   : > { %v4095_v14 = vpack.c.bf16 %v5541_v2, %v5524_v55  ;;  %v4356_v15 = vpack.i.bf16 %v480_v13, %v479_v12  ;;  %vm723_vm0 = vcmask 523264   ;;  %vm541_vm8 = vcmask 1039360  }
  0xb7   : > { %4347 = vrot.lane.b32.xlu1 %v4346_v4, %s5170_s28  ;;  %4097 = vmatprep.mubr.msk.bf16.mxu0 %vm723_vm0, %v5005_v19  ;;  %vm598_vm13 = vcmask 1031168  }
  0xb8   : > { %4352 = vrot.lane.b32.xlu0 %v4351_v5, %s5170_s28 }
  0xbb   : > { %4357 = vrot.lane.b32.xlu1 %v4356_v15, %s5170_s28 }
  0xbc   : > { %4362 = vrot.lane.b32.xlu0 %v5396_v60, %s7428_s7  ;;  %v406_v60 = vld [vmem:[%s7421_s3 + $0x38] sm:$0xff] }
  0xbf   : > { %4367 = vrot.lane.b32.xlu1 %v4326_v9, %s7428_s7  ;;  %v405_v9 = vld [vmem:[%s7421_s3 + $0x30] sm:$0xff] }
  0xc0   : > { %4372 = vrot.lane.b32.xlu0 %v4331_v18, %s7428_s7  ;;  %v7424_v18 = vmov 0  }
  0xc1   : > { %4402 = vset.pattern.permute.xlu1 %v7424_v18  ;;  %4401 = vset.pattern.permute.xlu0 %v7424_v18 }
  0xc3   : > { %4377 = vrot.lane.b32.xlu1 %v4336_v45, %s7428_s7 }
  0xc4   : > { %4382 = vrot.lane.b32.xlu0 %v4341_v50, %s7428_s7 }
  0xc7   : > { %4387 = vrot.lane.b32.xlu1 %v4346_v4, %s7428_s7 }
  0xc8   : > { %4392 = vrot.lane.b32.xlu0 %v4351_v5, %s7428_s7 }
  0xcb   : > { %4397 = vrot.lane.b32.xlu1 %v4356_v15, %s7428_s7 }
  0xcc   : > { %679 = vperm.xlu0 %4401, %v405_v9  }
  0xcf   : > { %684 = vperm.xlu1 %4402, %v406_v60  }
  0xd0   : > { %674 = vperm.xlu0 %4401, %v404_v24  }
  0xd3   : > { %669 = vperm.xlu1 %4402, %v403_v20  }
  0xd4   : > { %664 = vperm.xlu0 %4401, %v402_v31  }
  0xd7   : > { %659 = vperm.xlu1 %4402, %v401_v25  }
  0xd8   : > { %654 = vperm.xlu0 %4401, %v400_v37  }
  0xdb   : > { %649 = vperm.xlu1 %4402, %v399_v34  }
 0x11a   : > { %v4323_v45 = vpop.permute.xlu0 %4322 }
 0x11b   : > { %v4324_v47 = vunpack.i.l.bf16 %v4323_v45  ;;  %v4325_v50 = vunpack.i.h.bf16 %v4323_v45 }
 0x11d   : > { %v548_v5 = vsel %vm541_vm8, %v4324_v47, %v4325_v50 }
 0x11e   : > { %v4328_v51 = vpop.permute.xlu1 %4327 }
 0x11f   : > { %v4329_v52 = vunpack.i.l.bf16 %v4328_v51  ;;  %v4330_v63 = vunpack.i.h.bf16 %v4328_v51 }
 0x120   : > { %v4333_v1 = vpop.permute.xlu0 %4332 }
 0x121   : > { %v638_v4 = vpack.c.bf16 %v4330_v63, %v4325_v50  ;;  %v549_v12 = vsel %vm541_vm8, %v4329_v52, %v4330_v63  ;;  %v4335_v15 = vunpack.i.h.bf16 %v4333_v1  ;;  %v4334_v19 = vunpack.i.l.bf16 %v4333_v1 }
 0x122   : > { %v637_v13 = vpack.c.bf16 %v549_v12, %v548_v5 }
 0x123   : > { %736 = vmatprep.subr.bf16.mxu0 %v638_v4  ;;  %v546_v37 = vsel %vm541_vm8, %v4334_v19, %v4335_v15 }
 0x124   : > { %737 = vmatpush1.bf16.msra.mxu0 %v637_v13 }
 0x125   : > { %v4338_v60 = vpop.permute.xlu1 %4337 }
 0x126   : > { %v4340_v9 = vunpack.i.h.bf16 %v4338_v60  ;;  %v4339_v20 = vunpack.i.l.bf16 %v4338_v60  ;;  %v4343_v24 = vpop.permute.xlu0 %4342 }
 0x127   : > { %v4345_v25 = vunpack.i.h.bf16 %v4343_v24  ;;  %v4344_v31 = vunpack.i.l.bf16 %v4343_v24 }
 0x128   : > { %v636_v34 = vpack.c.bf16 %v4340_v9, %v4335_v15  ;;  %v547_v45 = vsel %vm541_vm8, %v4339_v20, %v4340_v9 }
 0x129   : > { %v4348_v51 = vpop.permute.xlu1 %4347  ;;  %v635_v47 = vpack.c.bf16 %v547_v45, %v546_v37  ;;  %v544_v1 = vsel %vm541_vm8, %v4344_v31, %v4345_v25  ;;  %v5011_v31 = vld [vmem:[%s7420_s2 + $0x20] ss:$8 sps:$4 sm:$0xff]  }
 0x12a   : > { %v4350_v50 = vunpack.i.h.bf16 %v4348_v51  ;;  %v4349_v52 = vunpack.i.l.bf16 %v4348_v51  ;;  %738 = vmatprep.subr.bf16.mxu0 %v636_v34  ;;  %v4353_v63 = vpop.permute.xlu0 %4352 }
 0x12b   : > { %739 = vmatpush1.bf16.msra.mxu0 %v635_v47  ;;  %v4355_v4 = vunpack.i.h.bf16 %v4353_v63  ;;  %v4354_v5 = vunpack.i.l.bf16 %v4353_v63 }
 0x12c   : > { %v634_v12 = vpack.c.bf16 %v4350_v50, %v4345_v25  ;;  %v545_v13 = vsel %vm541_vm8, %v4349_v52, %v4350_v50 }
 0x12d   : > { %v4358_v60 = vpop.permute.xlu1 %4357  ;;  %v633_v24 = vpack.c.bf16 %v545_v13, %v544_v1  ;;  %v542_v9 = vsel %vm541_vm8, %v4354_v5, %v4355_v4 }
 0x12e   : > { %v4360_v18 = vunpack.i.h.bf16 %v4358_v60  ;;  %v4359_v15 = vunpack.i.l.bf16 %v4358_v60  ;;  %740 = vmatprep.subr.bf16.mxu0 %v634_v12  ;;  %v4363_v37 = vpop.permute.xlu0 %4362 }
 0x12f   : > { %741 = vmatpush1.bf16.msra.mxu0 %v633_v24 }
 0x130   : > { %v632_v19 = vpack.c.bf16 %v4360_v18, %v4355_v4  ;;  %v543_v20 = vsel %vm541_vm8, %v4359_v15, %v4360_v18  ;;  %v5012_v18 = vld [vmem:[%s7420_s2 + $0x34] ss:$8 sps:$4 sm:$0xff]  }
 0x131   : > { %v631_v34 = vpack.c.bf16 %v543_v20, %v542_v9  ;;  %v4368_v25 = vpop.permute.xlu1 %4367  ;;  %v5006_v9 = vld [vmem:[%s7420_s2 + $0x14] ss:$8 sps:$4 sm:$0xff]   ;;  %v5008_v20 = vld [vmem:[%s7420_s2 + $0x10] ss:$8 sps:$4 sm:$0xff]  }
 0x132   : > { %742 = vmatprep.subr.bf16.mxu0 %v632_v19  ;;  %v4373_v39 = vpop.permute.xlu0 %4372  ;;  %v4370_v56 = vunpack.i.h.bf16 %v4368_v25  ;;  %v4369_v57 = vunpack.i.l.bf16 %v4368_v25  ;;  %v5003_v19 = vld [vmem:[%s7420_s2] ss:$8 sps:$4 sm:$0xff]   ;;  %v5014_v25 = vld [vmem:[%s7420_s2 + $0x30] ss:$8 sps:$4 sm:$0xff]  }
 0x133   : > { %743 = vmatpush1.bf16.msra.mxu0 %v631_v34  ;;  %v4375_v33 = vunpack.i.h.bf16 %v4373_v39  ;;  %v4374_v36 = vunpack.i.l.bf16 %v4373_v39  ;;  %v5009_v34 = vld [vmem:[%s7420_s2 + $0x24] ss:$8 sps:$4 sm:$0xff]  }
 0x134   : > { %4075 = vmatprep.subr.msk.bf16.mxu0 %vm5611_vm11, %v4074_v6  ;;  %v4365_v6 = vunpack.i.h.bf16 %v4363_v37 }
 0x135   : > { %v4378_v40 = vpop.permute.xlu1 %4377  ;;  %v603_v55 = vsel %vm598_vm13, %v4374_v36, %v4375_v33 }
 0x136   : > { %v4380_v11 = vunpack.i.h.bf16 %v4378_v40  ;;  %v4379_v23 = vunpack.i.l.bf16 %v4378_v40  ;;  %v646_v30 = vpack.c.bf16 %v4370_v56, %v4365_v6 }
 0x137   : > { %4078 = vmatpush1.bf16.msk.msra.mxu0 %vm5623_vm12, %v4077_v8  ;;  %v4364_v8 = vunpack.i.l.bf16 %v4363_v37 }
 0x138   : > { %4081 = vmatprep.subr.msk.bf16.mxu0 %vm5611_vm11, %v4080_v35  ;;  %v4383_v35 = vpop.permute.xlu0 %4382  ;;  %v644_v62 = vpack.c.bf16 %v4380_v11, %v4375_v33  ;;  %v604_v3 = vsel %vm598_vm13, %v4379_v23, %v4380_v11 }
 0x139   : > { %v4388_v10 = vpop.permute.xlu1 %4387  ;;  %v605_v48 = vsel %vm598_vm13, %v4364_v8, %v4365_v6  ;;  %v4385_v45 = vunpack.i.h.bf16 %v4383_v35  ;;  %v4384_v51 = vunpack.i.l.bf16 %v4383_v35 }
 0x13b   : > { %4084 = vmatpush1.bf16.msk.msra.mxu0 %vm5623_vm12, %v4083_v32  ;;  %v606_v32 = vsel %vm598_vm13, %v4369_v57, %v4370_v56  ;;  %v601_v5 = vsel %vm598_vm13, %v4384_v51, %v4385_v45 }
 0x13c   : > { %4087 = vmatprep.subr.msk.bf16.mxu0 %vm5611_vm11, %v4086_v53  ;;  %v645_v49 = vpack.c.bf16 %v606_v32, %v605_v48  ;;  %v4390_v53 = vunpack.i.h.bf16 %v4388_v10  ;;  %v4393_v2 = vpop.permute.xlu0 %4392 }
 0x13d   : > { %v4395_v1 = vunpack.i.h.bf16 %v4393_v2  ;;  %v4394_v4 = vunpack.i.l.bf16 %v4393_v2 }
 0x13e   : > { %v642_v52 = vpack.c.bf16 %v4390_v53, %v4385_v45 }
 0x13f   : > { %4090 = vmatpush1.bf16.msk.msra.mxu0 %vm5623_vm12, %v4089_v54  ;;  %v4389_v54 = vunpack.i.l.bf16 %v4388_v10  ;;  %v599_v24 = vsel %vm598_vm13, %v4394_v4, %v4395_v1 }
 0x140   : > { %4093 = vmatprep.subr.msk.bf16.mxu0 %vm5611_vm11, %v4092_v7  ;;  %v4398_v7 = vpop.permute.xlu1 %4397 }
 0x141   : > { %v4400_v47 = vunpack.i.h.bf16 %v4398_v7  ;;  %v4399_v50 = vunpack.i.l.bf16 %v4398_v7  ;;  %v602_v63 = vsel %vm598_vm13, %v4389_v54, %v4390_v53 }
 0x142   : > { %v641_v12 = vpack.c.bf16 %v602_v63, %v601_v5 }
 0x143   : > { %4096 = vmatpush1.bf16.msk.msra.mxu0 %vm5623_vm12, %v4095_v14  ;;  %v643_v14 = vpack.c.bf16 %v604_v3, %v603_v55  ;;  %v640_v13 = vpack.c.bf16 %v4400_v47, %v4395_v1  ;;  %v600_v60 = vsel %vm598_vm13, %v4399_v50, %v4400_v47 }
 0x144   : > { %760 = vmatprep.subr.bf16.mxu0 %v646_v30  ;;  %v639_v15 = vpack.c.bf16 %v600_v60, %v599_v24 }
 0x147   : > { %761 = vmatpush2.bf16.msra.mxu0 %v645_v49  ;;  %v680_v35 = vpop.permute.xlu0 %679 }
 0x148   : > { %762 = vmatprep.subr.bf16.mxu0 %v644_v62 }
 0x14a   : > { %v685_v56 = vpop.permute.xlu1 %684 }
 0x14b   : > { %763 = vmatpush2.bf16.msra.mxu0 %v643_v14  ;;  %v675_v53 = vpop.permute.xlu0 %674 }
 0x14c   : > { %764 = vmatprep.subr.bf16.mxu0 %v642_v52 }
 0x14e   : > { %v670_v10 = vpop.permute.xlu1 %669 }
 0x14f   : > { %765 = vmatpush2.bf16.msra.mxu0 %v641_v12 }
 0x150   : > { %766 = vmatprep.subr.bf16.mxu0 %v640_v13  ;;  %v665_v13 = vpop.permute.xlu0 %664 }
 0x152   : > { %v660_v32 = vpop.permute.xlu1 %659 }
 0x153   : > { %767 = vmatpush2.bf16.msra.mxu0 %v639_v15 }
 0x156   : > { %769 = vmatmul.mubr.bf16.vlgmr.msra.gmra.mxu0 %v5003_v19  ;;  %v650_v49 = vpop.permute.xlu1 %649 }
 0x157   : > { %4098 = vmatprep.mubr.msk.bf16.mxu0 %vm723_vm0, %v5006_v9 }
 0x15e   : > { %779 = vmatmul.mubr.bf16.gmra.mxu0 %v5008_v20 }
 0x15f   : > { %4099 = vmatprep.mubr.msk.bf16.mxu0 %vm723_vm0, %v5009_v34 }
 0x166   : > { %789 = vmatmul.mubr.bf16.gmra.mxu0 %v5011_v31 }
 0x167   : > { %4100 = vmatprep.mubr.msk.bf16.mxu0 %vm723_vm0, %v5012_v18 }
 0x16e   : > { %799 = vmatmul.mubr.bf16.gmra.mxu0 %v5014_v25 }
 0x216   : > { %v770_v37 = vpop.f32.mrf.mxu0 }
 0x217   : > { %v5700_v2 = vadd.f32 %v770_v37, %v650_v49 }
 0x218   : > { %v772_v40 = vpop.f32.mrf.mxu0 }
 0x219   : > { %v5698_v54 = vadd.f32 %v772_v40, %v650_v49 }
 0x21a   : > { %v5694_v39 = vpop.f32.mrf.mxu0 }
 0x21b   : > { %v826_v50 = vmul.f32 0.1, %v5698_v54  ;;  %vm810_vm12 = vcmp.ge.f32.partialorder %v5698_v54, 0.0 }
 0x21c   : > { %v5696_v57 = vpop.f32.mrf.mxu0 }
 0x21e   : > { %v780_v6 = vpop.f32.mrf.mxu0 }
 0x21f   : > { %v781_v52 = vadd.f32 %v780_v6, %v660_v32 }
 0x220   : > { %v782_v8 = vpop.f32.mrf.mxu0 }
 0x221   : > { %v783_v45 = vadd.f32 %v782_v8, %v660_v32  ;;  %v829_v8 = vmul.f32 0.1, %v781_v52  ;;  %vm813_vm7 = vcmp.ge.f32.partialorder %v781_v52, 0.0 }
 0x222   : > { %v784_v11 = vpop.f32.mrf.mxu0 }
 0x223   : > { %v830_v60 = vmul.f32 0.1, %v783_v45  ;;  %vm814_vm5 = vcmp.ge.f32.partialorder %v783_v45, 0.0 }
 0x224   : > { %v786_v23 = vpop.f32.mrf.mxu0 }
 0x225   : > { %v787_v18 = vadd.f32 %v786_v23, %v665_v13  ;;  %v655_v23 = vpop.permute.xlu0 %654 }
 0x226   : > { %v790_v30 = vpop.f32.mrf.mxu0 }
 0x227   : > { %v791_v51 = vadd.f32 %v790_v30, %v670_v10  ;;  %v832_v49 = vmul.f32 0.1, %v787_v18 }
 0x228   : > { %v792_v33 = vpop.f32.mrf.mxu0 }
 0x229   : > { %v793_v62 = vadd.f32 %v792_v33, %v670_v10  ;;  %v833_v24 = vmul.f32 0.1, %v791_v51  ;;  %vm817_vm2 = vcmp.ge.f32.partialorder %v791_v51, 0.0  ;;  %v785_v10 = vadd.f32 %v784_v11, %v665_v13 }
 0x22a   : > { %v794_v36 = vpop.f32.mrf.mxu0  ;;  %v846_v11 = vsel %vm814_vm5, %v783_v45, %v830_v60 }
 0x22b   : > { %v834_v63 = vmul.f32 0.1, %v793_v62  ;;  %vm818_vm1 = vcmp.ge.f32.partialorder %v793_v62, 0.0  ;;  %v795_v15 = vadd.f32 %v794_v36, %v675_v53 }
 0x22c   : > { %v796_v48 = vpop.f32.mrf.mxu0 }
 0x22d   : > { %v797_v4 = vadd.f32 %v796_v48, %v675_v53  ;;  %v850_v6 = vsel %vm818_vm1, %v793_v62, %v834_v63  ;;  %v835_v30 = vmul.f32 0.1, %v795_v15  ;;  %vm819_vm11 = vcmp.ge.f32.partialorder %v795_v15, 0.0 }
 0x22e   : > { %v800_v3 = vpop.f32.mrf.mxu0  ;;  %v777_v48 = vadd.f32 %v5696_v57, %v655_v23  ;;  %v825_v62 = vmul.f32 0.1, %v5700_v2  ;;  %vm815_vm1 = vcmp.ge.f32.partialorder %v785_v10, 0.0  ;;  %v842_v63 = vsel %vm810_vm12, %v5698_v54, %v826_v50 }
 0x22f   : > { %v801_v7 = vadd.f32 %v800_v3, %v680_v35  ;;  %v836_v37 = vmul.f32 0.1, %v797_v4  ;;  %vm820_vm6 = vcmp.ge.f32.partialorder %v797_v4, 0.0  ;;  %v775_v3 = vadd.f32 %v5694_v39, %v655_v23 }
 0x230   : > { %v802_v55 = vpop.f32.mrf.mxu0 }
 0x231   : > { %v837_v14 = vmul.f32 0.1, %v801_v7  ;;  %v803_v47 = vadd.f32 %v802_v55, %v680_v35  ;;  %vm821_vm14 = vcmp.ge.f32.partialorder %v801_v7, 0.0  ;;  %v849_v35 = vsel %vm817_vm2, %v791_v51, %v833_v24 }
 0x232   : > { %v804_v1 = vpop.f32.mrf.mxu0  ;;  %v4408_v36 = vpack.i.bf16 %v850_v6, %v849_v35  ;;  %v852_v53 = vsel %vm820_vm6, %v797_v4, %v836_v37  ;;  %v851_v51 = vsel %vm819_vm11, %v795_v15, %v835_v30  ;;  %v845_v55 = vsel %vm813_vm7, %v781_v52, %v829_v8 }
 0x233   : > { %vm822_vm15 = vcmp.ge.f32.partialorder %v803_v47, 0.0  ;;  %v838_v5 = vmul.f32 0.1, %v803_v47  ;;  %v805_v12 = vadd.f32 %v804_v1, %v685_v56  ;;  %v853_v34 = vsel %vm821_vm14, %v801_v7, %v837_v14 }
 0x234   : > { %v806_v19 = vpop.f32.mrf.mxu0  ;;  %vm816_vm14 = vcmp.ge.f32.partialorder %v787_v18, 0.0  ;;  %v831_v7 = vmul.f32 0.1, %v785_v10  ;;  %v4418_v57 = vpack.i.bf16 %v852_v53, %v851_v51  ;;  %v4423_v45 = vpack.i.bf16 %v846_v11, %v845_v55 }
 0x235   : > { %v839_v9 = vmul.f32 0.1, %v805_v12  ;;  %v807_v20 = vadd.f32 %v806_v19, %v685_v56  ;;  %v854_v31 = vsel %vm822_vm15, %v803_v47, %v838_v5  ;;  %vm823_vm3 = vcmp.ge.f32.partialorder %v805_v12, 0.0 }
 0x236   : > { %v4403_v25 = vpack.i.bf16 %v854_v31, %v853_v34  ;;  %vm809_vm15 = vcmp.ge.f32.partialorder %v5700_v2, 0.0  ;;  %v828_v14 = vmul.f32 0.1, %v777_v48  ;;  %v848_v47 = vsel %vm816_vm14, %v787_v18, %v832_v49 }
 0x237   : > { %vm824_vm4 = vcmp.ge.f32.partialorder %v807_v20, 0.0  ;;  %v840_v40 = vmul.f32 0.1, %v807_v20  ;;  %v855_v32 = vsel %vm823_vm3, %v805_v12, %v839_v9  ;;  %vm812_vm2 = vcmp.ge.f32.partialorder %v777_v48, 0.0 }
 0x238   : > { %4404 = vrot.lane.b32.xlu1 %v4403_v25, %s5173_s11  ;;  %v827_v1 = vmul.f32 0.1, %v775_v3  ;;  %v847_v39 = vsel %vm815_vm1, %v785_v10, %v831_v7  ;;  %v841_v4 = vsel %vm809_vm15, %v5700_v2, %v825_v62  ;;  %vm811_vm3 = vcmp.ge.f32.partialorder %v775_v3, 0.0 }
 0x239   : > { %v856_v56 = vsel %vm824_vm4, %v807_v20, %v840_v40  ;;  %v4428_v52 = vpack.i.bf16 %v848_v47, %v847_v39  ;;  %v4433_v5 = vpack.i.bf16 %v842_v63, %v841_v4  ;;  %v844_v12 = vsel %vm812_vm2, %v777_v48, %v828_v14 }
 0x23a   : > { %v4413_v33 = vpack.i.bf16 %v856_v56, %v855_v32  ;;  %v843_v13 = vsel %vm811_vm3, %v775_v3, %v827_v1  ;;  %vm905_vm4 = vcmask 7168  }
 0x23b   : > { %v4438_v60 = vpack.i.bf16 %v844_v12, %v843_v13 }
 0x23c   : > { %4414 = vrot.lane.b32.xlu0 %v4413_v33, %s5173_s11  ;;  %4409 = vrot.lane.b32.xlu1 %v4408_v36, %s5173_s11 }
 0x240   : > { %4419 = vrot.lane.b32.xlu0 %v4418_v57, %s5173_s11  ;;  %4424 = vrot.lane.b32.xlu1 %v4423_v45, %s5173_s11 }
 0x244   : > { %4429 = vrot.lane.b32.xlu0 %v4428_v52, %s5173_s11  ;;  %4434 = vrot.lane.b32.xlu1 %v4433_v5, %s5173_s11 }
 0x248   : > { %4439 = vrot.lane.b32.xlu0 %v4438_v60, %s5173_s11 }
 0x2aa   : > { %v4405_v54 = vpop.permute.xlu1 %4404 }
 0x2ab   : > { %v4407_v50 = vunpack.i.h.bf16 %v4405_v54  ;;  %v4406_v24 = vunpack.i.l.bf16 %v4405_v54 }
 0x2ad   : > { %v5723_v15 = vsel %vm5340_vm9, %v4406_v24, 0.0  ;;  %v912_v2 = vsel %vm905_vm4, %v4406_v24, %v4407_v50 }
 0x2ae   : > { %v4415_v19 = vpop.permute.xlu0 %4414  ;;  %v4410_v9 = vpop.permute.xlu1 %4409  ;;  %v5728_v20 = vsel %vm5365_vm10, %v912_v2, 0.0 }
 0x2af   : > { %v4417_v34 = vunpack.i.h.bf16 %v4415_v19  ;;  %v4416_v31 = vunpack.i.l.bf16 %v4415_v19  ;;  %v4412_v18 = vunpack.i.h.bf16 %v4410_v9  ;;  %v4411_v25 = vunpack.i.l.bf16 %v4410_v9 }
 0x2b0   : > { %v4443_v37 = vpack.i.bf16 %v5728_v20, %v5723_v15 }
 0x2b1   : > { %v5734_v40 = vsel %vm5340_vm9, %v4416_v31, 0.0  ;;  %v5738_v6 = vsel %vm5340_vm9, %v4411_v25, 0.0  ;;  %v913_v8 = vsel %vm905_vm4, %v4416_v31, %v4417_v34  ;;  %v910_v10 = vsel %vm905_vm4, %v4411_v25, %v4412_v18 }
 0x2b2   : > { %4444 = vrot.lane.b32.xlu1 %v4443_v37, %s5170_s28  ;;  %v4420_v30 = vpop.permute.xlu0 %4419  ;;  %v4425_v32 = vpop.permute.xlu1 %4424  ;;  %v5745_v56 = vsel %vm5365_vm10, %v913_v8, 0.0  ;;  %v5749_v35 = vsel %vm5365_vm10, %v910_v10, 0.0  ;;  %v1080_v23 = vpack.c.bf16 %v5734_v40, %v5723_v15 }
 0x2b3   : > { %v4422_v33 = vunpack.i.h.bf16 %v4420_v30  ;;  %v4421_v36 = vunpack.i.l.bf16 %v4420_v30  ;;  %v4427_v48 = vunpack.i.h.bf16 %v4425_v32  ;;  %v4426_v49 = vunpack.i.l.bf16 %v4425_v32 }
 0x2b4   : > { %v4453_v53 = vpack.i.bf16 %v5745_v56, %v5734_v40  ;;  %v4448_v11 = vpack.i.bf16 %v5749_v35, %v5738_v6  ;;  %v1081_v47 = vpack.c.bf16 %v5745_v56, %v5728_v20 }
 0x2b5   : > { %v5759_v62 = vsel %vm5340_vm9, %v4421_v36, 0.0  ;;  %v5763_v3 = vsel %vm5340_vm9, %v4426_v49, 0.0  ;;  %v911_v7 = vsel %vm905_vm4, %v4421_v36, %v4422_v33  ;;  %v908_v51 = vsel %vm905_vm4, %v4426_v49, %v4427_v48 }
 0x2b6   : > { %4454 = vrot.lane.b32.xlu0 %v4453_v53, %s5170_s28  ;;  %4449 = vrot.lane.b32.xlu1 %v4448_v11, %s5170_s28  ;;  %v4430_v55 = vpop.permute.xlu0 %4429  ;;  %v4435_v57 = vpop.permute.xlu1 %4434  ;;  %v5771_v45 = vsel %vm5365_vm10, %v911_v7, 0.0  ;;  %v5775_v14 = vsel %vm5365_vm10, %v908_v51, 0.0  ;;  %v1078_v63 = vpack.c.bf16 %v5759_v62, %v5738_v6 }
 0x2b7   : > { %v4432_v1 = vunpack.i.h.bf16 %v4430_v55  ;;  %v4431_v39 = vunpack.i.l.bf16 %v4430_v55  ;;  %v4437_v4 = vunpack.i.h.bf16 %v4435_v57  ;;  %v4436_v52 = vunpack.i.l.bf16 %v4435_v57 }
 0x2b8   : > { %v4458_v5 = vpack.i.bf16 %v5771_v45, %v5759_v62  ;;  %v4463_v12 = vpack.i.bf16 %v5775_v14, %v5763_v3  ;;  %v1079_v9 = vpack.c.bf16 %v5771_v45, %v5749_v35 }
 0x2b9   : > { %v5787_v13 = vsel %vm5340_vm9, %v4431_v39, 0.0  ;;  %v5791_v60 = vsel %vm5340_vm9, %v4436_v52, 0.0  ;;  %v909_v54 = vsel %vm905_vm4, %v4431_v39, %v4432_v1  ;;  %v906_v50 = vsel %vm905_vm4, %v4436_v52, %v4437_v4 }
 0x2ba   : > { %4459 = vrot.lane.b32.xlu0 %v4458_v5, %s5170_s28  ;;  %4464 = vrot.lane.b32.xlu1 %v4463_v12, %s5170_s28  ;;  %v4440_v24 = vpop.permute.xlu0 %4439  ;;  %v5799_v2 = vsel %vm5365_vm10, %v909_v54, 0.0  ;;  %v5803_v19 = vsel %vm5365_vm10, %v906_v50, 0.0  ;;  %v1076_v34 = vpack.c.bf16 %v5787_v13, %v5763_v3 }
 0x2bb   : > { %v4442_v31 = vunpack.i.h.bf16 %v4440_v24  ;;  %v4441_v18 = vunpack.i.l.bf16 %v4440_v24  ;;  %v4468_v25 = vpack.i.bf16 %v5799_v2, %v5787_v13  ;;  %v4473_v8 = vpack.i.bf16 %v5803_v19, %v5791_v60 }
 0x2bc   : > { %v1077_v10 = vpack.c.bf16 %v5799_v2, %v5775_v14 }
 0x2bd   : > { %v5817_v30 = vsel %vm5340_vm9, %v4441_v18, 0.0  ;;  %v907_v32 = vsel %vm905_vm4, %v4441_v18, %v4442_v31 }
 0x2be   : > { %4469 = vrot.lane.b32.xlu0 %v4468_v25, %s5170_s28  ;;  %4474 = vrot.lane.b32.xlu1 %v4473_v8, %s5170_s28  ;;  %v5824_v33 = vsel %vm5365_vm10, %v907_v32, 0.0  ;;  %v1074_v36 = vpack.c.bf16 %v5817_v30, %v5791_v60  ;;  %v5017_v60 = vld [vmem:[%s7420_s2 + $0x44] ss:$8 sps:$4 sm:$0xff]  }
 0x2bf   : > { %v4478_v48 = vpack.i.bf16 %v5824_v33, %v5817_v30  ;;  %v1075_v49 = vpack.c.bf16 %v5824_v33, %v5803_v19  ;;  %4109 = vmatprep.mubr.msk.bf16.mxu1 %vm723_vm0, %v5017_v60 }
 0x2c2   : > { %4479 = vrot.lane.b32.xlu0 %v4478_v48, %s5170_s28  ;;  %4484 = vrot.lane.b32.xlu1 %v4443_v37, %s7428_s7 }
 0x2c6   : > { %4494 = vrot.lane.b32.xlu0 %v4453_v53, %s7428_s7  ;;  %4489 = vrot.lane.b32.xlu1 %v4448_v11, %s7428_s7 }
 0x2ca   : > { %4499 = vrot.lane.b32.xlu0 %v4458_v5, %s7428_s7  ;;  %4504 = vrot.lane.b32.xlu1 %v4463_v12, %s7428_s7 }
 0x2ce   : > { %4509 = vrot.lane.b32.xlu0 %v4468_v25, %s7428_s7  ;;  %4514 = vrot.lane.b32.xlu1 %v4473_v8, %s7428_s7 }
 0x2d2   : > { %4519 = vrot.lane.b32.xlu0 %v4478_v48, %s7428_s7 }
 0x324   : > { %v4445_v7 = vpop.permute.xlu1 %4444 }
 0x325   : > { %v4447_v51 = vunpack.i.h.bf16 %v4445_v7  ;;  %v4446_v55 = vunpack.i.l.bf16 %v4445_v7 }
 0x327   : > { %v1000_v53 = vsel %vm541_vm8, %v4446_v55, %v4447_v51 }
 0x328   : > { %v4455_v57 = vpop.permute.xlu0 %4454  ;;  %v4450_v1 = vpop.permute.xlu1 %4449 }
 0x329   : > { %v4457_v37 = vunpack.i.h.bf16 %v4455_v57  ;;  %v4456_v39 = vunpack.i.l.bf16 %v4455_v57  ;;  %v4452_v11 = vunpack.i.h.bf16 %v4450_v1  ;;  %v4451_v4 = vunpack.i.l.bf16 %v4450_v1 }
 0x32b   : > { %v1089_v52 = vpack.c.bf16 %v4457_v37, %v4447_v51  ;;  %v1001_v5 = vsel %vm541_vm8, %v4456_v39, %v4457_v37  ;;  %v998_v32 = vsel %vm541_vm8, %v4451_v4, %v4452_v11 }
 0x32c   : > { %v4460_v12 = vpop.permute.xlu0 %4459  ;;  %v4465_v54 = vpop.permute.xlu1 %4464  ;;  %v1088_v50 = vpack.c.bf16 %v1001_v5, %v1000_v53 }
 0x32d   : > { %v4462_v24 = vunpack.i.h.bf16 %v4460_v12  ;;  %v4461_v31 = vunpack.i.l.bf16 %v4460_v12  ;;  %1228 = vrot.lane.b32.xlu0 %v1089_v52, %s5170_s28  ;;  %v4467_v18 = vunpack.i.h.bf16 %v4465_v54  ;;  %v4466_v25 = vunpack.i.l.bf16 %v4465_v54 }
 0x32e   : > { %1226 = vrot.lane.b32.xlu1 %v1088_v50, %s5170_s28 }
 0x32f   : > { %v1087_v8 = vpack.c.bf16 %v4462_v24, %v4452_v11  ;;  %v999_v48 = vsel %vm541_vm8, %v4461_v31, %v4462_v24  ;;  %v996_v37 = vsel %vm541_vm8, %v4466_v25, %v4467_v18 }
 0x330   : > { %v4470_v7 = vpop.permute.xlu0 %4469  ;;  %v4475_v51 = vpop.permute.xlu1 %4474  ;;  %v1086_v55 = vpack.c.bf16 %v999_v48, %v998_v32 }
 0x331   : > { %v4472_v57 = vunpack.i.h.bf16 %v4470_v7  ;;  %v4471_v1 = vunpack.i.l.bf16 %v4470_v7  ;;  %1224 = vrot.lane.b32.xlu0 %v1087_v8, %s5170_s28  ;;  %v4477_v39 = vunpack.i.h.bf16 %v4475_v51  ;;  %v4476_v53 = vunpack.i.l.bf16 %v4475_v51 }
 0x332   : > { %1222 = vrot.lane.b32.xlu1 %v1086_v55, %s5170_s28 }
 0x333   : > { %v1085_v52 = vpack.c.bf16 %v4472_v57, %v4467_v18  ;;  %v997_v5 = vsel %vm541_vm8, %v4471_v1, %v4472_v57  ;;  %v994_v24 = vsel %vm541_vm8, %v4476_v53, %v4477_v39 }
 0x334   : > { %v4480_v12 = vpop.permute.xlu0 %4479  ;;  %v1084_v11 = vpack.c.bf16 %v997_v5, %v996_v37  ;;  %v4485_v25 = vpop.permute.xlu1 %4484 }
 0x335   : > { %v4482_v4 = vunpack.i.h.bf16 %v4480_v12  ;;  %v4481_v54 = vunpack.i.l.bf16 %v4480_v12  ;;  %1220 = vrot.lane.b32.xlu0 %v1085_v52, %s5170_s28  ;;  %v4487_v15 = vunpack.i.h.bf16 %v4485_v25  ;;  %v4486_v40 = vunpack.i.l.bf16 %v4485_v25 }
 0x336   : > { %1218 = vrot.lane.b32.xlu1 %v1084_v11, %s5170_s28 }
 0x337   : > { %v1083_v50 = vpack.c.bf16 %v4482_v4, %v4477_v39  ;;  %v995_v31 = vsel %vm541_vm8, %v4481_v54, %v4482_v4  ;;  %v4064_v54 = vld [vmem:[%s7421_s3 + $0x78] sm:$0xff] }
 0x338   : > { %v1082_v8 = vpack.c.bf16 %v995_v31, %v994_v24  ;;  %v4495_v18 = vpop.permute.xlu0 %4494  ;;  %v4490_v48 = vpop.permute.xlu1 %4489  ;;  %v4062_v24 = vld [vmem:[%s7421_s3 + $0x68] sm:$0xff]  ;;  %v4061_v31 = vld [vmem:[%s7421_s3 + $0x60] sm:$0xff] }
 0x339   : > { %1216 = vrot.lane.b32.xlu0 %v1083_v50, %s5170_s28  ;;  %v4497_v20 = vunpack.i.h.bf16 %v4495_v18  ;;  %v4496_v56 = vunpack.i.l.bf16 %v4495_v18  ;;  %v4492_v3 = vunpack.i.h.bf16 %v4490_v48  ;;  %v4491_v14 = vunpack.i.l.bf16 %v4490_v48  ;;  %v4063_v50 = vld [vmem:[%s7421_s3 + $0x70] sm:$0xff] }
 0x33a   : > { %1214 = vrot.lane.b32.xlu1 %v1082_v8, %s5170_s28  ;;  %v4060_v8 = vld [vmem:[%s7421_s3 + $0x58] sm:$0xff]  ;;  %v4059_v18 = vld [vmem:[%s7421_s3 + $0x50] sm:$0xff] }
 0x33b   : > { %v1057_v6 = vsel %vm598_vm13, %v4496_v56, %v4497_v20 }
 0x33c   : > { %v4500_v32 = vpop.permute.xlu0 %4499  ;;  %v4505_v62 = vpop.permute.xlu1 %4504 }
 0x33d   : > { %1212 = vrot.lane.b32.xlu0 %v1081_v47, %s5170_s28  ;;  %v4501_v45 = vunpack.i.l.bf16 %v4500_v32  ;;  %v1097_v47 = vpack.c.bf16 %v4497_v20, %v4487_v15  ;;  %v4506_v30 = vunpack.i.l.bf16 %v4505_v62 }
 0x33e   : > { %1210 = vrot.lane.b32.xlu1 %v1080_v23, %s5170_s28  ;;  %v4502_v23 = vunpack.i.h.bf16 %v4500_v32 }
 0x340   : > { %v4510_v35 = vpop.permute.xlu0 %4509  ;;  %v1055_v19 = vsel %vm598_vm13, %v4501_v45, %v4502_v23  ;;  %v1095_v33 = vpack.c.bf16 %v4502_v23, %v4492_v3 }
 0x341   : > { %1208 = vrot.lane.b32.xlu0 %v1079_v9, %s5170_s28  ;;  %v4512_v2 = vunpack.i.h.bf16 %v4510_v35  ;;  %v4511_v9 = vunpack.i.l.bf16 %v4510_v35 }
 0x342   : > { %1206 = vrot.lane.b32.xlu1 %v1078_v63, %s5170_s28  ;;  %v1056_v63 = vsel %vm598_vm13, %v4486_v40, %v4487_v15 }
 0x343   : > { %v1096_v13 = vpack.c.bf16 %v1057_v6, %v1056_v63  ;;  %v1053_v57 = vsel %vm598_vm13, %v4511_v9, %v4512_v2 }
 0x345   : > { %1204 = vrot.lane.b32.xlu0 %v1077_v10, %s5170_s28  ;;  %v4507_v10 = vunpack.i.h.bf16 %v4505_v62 }
 0x346   : > { %1202 = vrot.lane.b32.xlu1 %v1076_v34, %s5170_s28  ;;  %v4520_v34 = vpop.permute.xlu0 %4519 }
 0x347   : > { %v4522_v51 = vunpack.i.h.bf16 %v4520_v34  ;;  %v4521_v55 = vunpack.i.l.bf16 %v4520_v34  ;;  %v1093_v39 = vpack.c.bf16 %v4512_v2, %v4507_v10  ;;  %v1052_v53 = vsel %vm598_vm13, %v4506_v30, %v4507_v10  ;;  %v5015_v10 = vld [vmem:[%s7420_s2 + $0x40] ss:$8 sps:$4 sm:$0xff]   ;;  %v5018_v30 = vld [vmem:[%s7420_s2 + $0x54] ss:$8 sps:$4 sm:$0xff]  }
 0x348   : > { %v1092_v52 = vpack.c.bf16 %v1053_v57, %v1052_v53 }
 0x349   : > { %1200 = vrot.lane.b32.xlu0 %v1075_v49, %s5170_s28  ;;  %v4515_v49 = vpop.permute.xlu1 %4514  ;;  %v1051_v5 = vsel %vm598_vm13, %v4521_v55, %v4522_v51 }
 0x34a   : > { %1198 = vrot.lane.b32.xlu1 %v1074_v36, %s5170_s28  ;;  %v1054_v36 = vsel %vm598_vm13, %v4491_v14, %v4492_v3  ;;  %v4517_v1 = vunpack.i.h.bf16 %v4515_v49  ;;  %v4516_v37 = vunpack.i.l.bf16 %v4515_v49  ;;  %v5023_v49 = vld [vmem:[%s7420_s2 + $0x60] ss:$8 sps:$4 sm:$0xff]  }
 0x34b   : > { %v1094_v7 = vpack.c.bf16 %v1055_v19, %v1054_v36  ;;  %v5021_v36 = vld [vmem:[%s7420_s2 + $0x64] ss:$8 sps:$4 sm:$0xff]  }
 0x34c   : > { %v1091_v12 = vpack.c.bf16 %v4522_v51, %v4517_v1  ;;  %v1050_v11 = vsel %vm598_vm13, %v4516_v37, %v4517_v1  ;;  %v5026_v51 = vld [vmem:[%s7420_s2 + $0x70] ss:$8 sps:$4 sm:$0xff]  }
 0x34d   : > { %1244 = vrot.lane.b32.xlu0 %v1097_v47, %s5170_s28  ;;  %v1090_v4 = vpack.c.bf16 %v1051_v5, %v1050_v11 }
 0x34e   : > { %1242 = vrot.lane.b32.xlu1 %v1096_v13, %s5170_s28 }
 0x351   : > { %1240 = vrot.lane.b32.xlu0 %v1095_v33, %s5170_s28  ;;  %v5020_v33 = vld [vmem:[%s7420_s2 + $0x50] ss:$8 sps:$4 sm:$0xff]  }
 0x352   : > { %1238 = vrot.lane.b32.xlu1 %v1094_v7, %s5170_s28  ;;  %v5024_v7 = vld [vmem:[%s7420_s2 + $0x74] ss:$8 sps:$4 sm:$0xff]  }
 0x355   : > { %1236 = vrot.lane.b32.xlu0 %v1093_v39, %s5170_s28 }
 0x356   : > { %1234 = vrot.lane.b32.xlu1 %v1092_v52, %s5170_s28 }
 0x359   : > { %1232 = vrot.lane.b32.xlu0 %v1091_v12, %s5170_s28 }
 0x35a   : > { %1230 = vrot.lane.b32.xlu1 %v1090_v4, %s5170_s28 }
 0x35d   : > { %1135 = vperm.xlu0 %4401, %v4064_v54  }
 0x35e   : > { %1130 = vperm.xlu1 %4402, %v4063_v50  }
 0x361   : > { %1125 = vperm.xlu0 %4401, %v4062_v24  }
 0x362   : > { %1120 = vperm.xlu1 %4402, %v4061_v31  }
 0x365   : > { %1410 = vrot.lane.b32.xlu0 %v5320_v27, %s7428_s7  ;;  %v4057_v27 = vld [vmem:[%s7421_s3 + $0x40] sm:$0xff] }
 0x366   : > { %1408 = vrot.lane.b32.xlu1 %v5317_v26, %s7428_s7  ;;  %v4058_v26 = vld [vmem:[%s7421_s3 + $0x48] sm:$0xff] }
 0x369   : > { %1414 = vrot.lane.b32.xlu0 %v5354_v42, %s7428_s7 }
 0x36a   : > { %1412 = vrot.lane.b32.xlu1 %v5351_v41, %s7428_s7 }
 0x36d   : > { %1115 = vperm.xlu0 %4401, %v4060_v8  }
 0x36e   : > { %1110 = vperm.xlu1 %4402, %v4059_v18  }
 0x371   : > { %1402 = vrot.lane.b32.xlu0 %v5326_v29, %s7428_s7 }
 0x372   : > { %1400 = vrot.lane.b32.xlu1 %v5323_v28, %s7428_s7 }
 0x375   : > { %1406 = vrot.lane.b32.xlu0 %v5360_v44, %s7428_s7 }
 0x376   : > { %1404 = vrot.lane.b32.xlu1 %v5357_v43, %s7428_s7 }
 0x379   : > { %1105 = vperm.xlu0 %4401, %v4058_v26  }
 0x37a   : > { %1100 = vperm.xlu1 %4402, %v4057_v27  }
 0x37d   : > { %1394 = vrot.lane.b32.xlu0 %v5394_v59, %s7428_s7 }
 0x37e   : > { %1392 = vrot.lane.b32.xlu1 %v5391_v58, %s7428_s7 }
 0x381   : > { %1398 = vrot.lane.b32.xlu0 %v5408_v0, %s7428_s7 }
 0x382   : > { %1396 = vrot.lane.b32.xlu1 %v5399_v61, %s7428_s7 }
 0x385   : > { %1386 = vrot.lane.b32.xlu0 %v5446_v17, %s7428_s7 }
 0x386   : > { %1384 = vrot.lane.b32.xlu1 %v5443_v16, %s7428_s7 }
 0x389   : > { %1390 = vrot.lane.b32.xlu0 %v5457_v22, %s7428_s7 }
 0x38a   : > { %1388 = vrot.lane.b32.xlu1 %v5454_v21, %s7428_s7 }
 0x39f   : > { %v1229_v28 = vpop.permute.xlu0 %1228 }
 0x3a0   : > { %1295 = vmatprep.subr.bf16.mxu1 %v1229_v28  ;;  %v1227_v29 = vpop.permute.xlu1 %1226 }
 0x3a1   : > { %v1254_v41 = vsel %vm541_vm8, %v1227_v29, %v1229_v28 }
 0x3a2   : > { %1296 = vmatpush1.bf16.msra.mxu1 %v1254_v41 }
 0x3a3   : > { %v1225_v42 = vpop.permute.xlu0 %1224 }
 0x3a4   : > { %1297 = vmatprep.subr.bf16.mxu1 %v1225_v42  ;;  %v1223_v43 = vpop.permute.xlu1 %1222 }
 0x3a5   : > { %v1253_v44 = vsel %vm541_vm8, %v1223_v43, %v1225_v42 }
 0x3a6   : > { %1298 = vmatpush1.bf16.msra.mxu1 %v1253_v44 }
 0x3a7   : > { %v1221_v58 = vpop.permute.xlu0 %1220 }
 0x3a8   : > { %1299 = vmatprep.subr.bf16.mxu1 %v1221_v58  ;;  %v1219_v59 = vpop.permute.xlu1 %1218 }
 0x3a9   : > { %v1252_v61 = vsel %vm541_vm8, %v1219_v59, %v1221_v58 }
 0x3aa   : > { %1300 = vmatpush1.bf16.msra.mxu1 %v1252_v61 }
 0x3ab   : > { %v1217_v0 = vpop.permute.xlu0 %1216 }
 0x3ac   : > { %1301 = vmatprep.subr.bf16.mxu1 %v1217_v0  ;;  %v1215_v16 = vpop.permute.xlu1 %1214 }
 0x3ad   : > { %v1251_v17 = vsel %vm541_vm8, %v1215_v16, %v1217_v0 }
 0x3ae   : > { %1302 = vmatpush1.bf16.msra.mxu1 %v1251_v17 }
 0x3af   : > { %v1213_v21 = vpop.permute.xlu0 %1212 }
 0x3b0   : > { %1303 = vmatprep.subr.bf16.mxu1 %v1213_v21  ;;  %v1211_v22 = vpop.permute.xlu1 %1210 }
 0x3b1   : > { %v1250_v25 = vsel %vm541_vm8, %v1211_v22, %v1213_v21 }
 0x3b2   : > { %1304 = vmatpush1.bf16.msra.mxu1 %v1250_v25 }
 0x3b3   : > { %v1209_v32 = vpop.permute.xlu0 %1208 }
 0x3b4   : > { %1305 = vmatprep.subr.bf16.mxu1 %v1209_v32  ;;  %v1207_v48 = vpop.permute.xlu1 %1206 }
 0x3b5   : > { %v1249_v20 = vsel %vm541_vm8, %v1207_v48, %v1209_v32 }
 0x3b6   : > { %1306 = vmatpush1.bf16.msra.mxu1 %v1249_v20 }
 0x3b7   : > { %v1205_v56 = vpop.permute.xlu0 %1204 }
 0x3b8   : > { %1307 = vmatprep.subr.bf16.mxu1 %v1205_v56  ;;  %v1203_v15 = vpop.permute.xlu1 %1202 }
 0x3b9   : > { %v1248_v40 = vsel %vm541_vm8, %v1203_v15, %v1205_v56 }
 0x3ba   : > { %1308 = vmatpush1.bf16.msra.mxu1 %v1248_v40 }
 0x3bb   : > { %v1201_v35 = vpop.permute.xlu0 %1200 }
 0x3bc   : > { %v1199_v23 = vpop.permute.xlu1 %1198  ;;  %1309 = vmatprep.subr.bf16.mxu1 %v1201_v35 }
 0x3bd   : > { %v1247_v45 = vsel %vm541_vm8, %v1199_v23, %v1201_v35 }
 0x3be   : > { %1310 = vmatpush1.bf16.msra.mxu1 %v1247_v45 }
 0x3bf   : > { %v1245_v6 = vpop.permute.xlu0 %1244 }
 0x3c0   : > { %v1243_v62 = vpop.permute.xlu1 %1242  ;;  %1319 = vmatprep.subr.bf16.mxu1 %v1245_v6 }
 0x3c1   : > { %v1258_v3 = vsel %vm541_vm8, %v1243_v62, %v1245_v6 }
 0x3c2   : > { %1320 = vmatpush2.bf16.msra.mxu1 %v1258_v3 }
 0x3c3   : > { %v1241_v14 = vpop.permute.xlu0 %1240 }
 0x3c4   : > { %v1239_v47 = vpop.permute.xlu1 %1238  ;;  %1321 = vmatprep.subr.bf16.mxu1 %v1241_v14 }
 0x3c5   : > { %v1257_v63 = vsel %vm541_vm8, %v1239_v47, %v1241_v14 }
 0x3c6   : > { %1322 = vmatpush2.bf16.msra.mxu1 %v1257_v63 }
 0x3c7   : > { %v1237_v13 = vpop.permute.xlu0 %1236 }
 0x3c8   : > { %v1235_v2 = vpop.permute.xlu1 %1234  ;;  %1323 = vmatprep.subr.bf16.mxu1 %v1237_v13 }
 0x3c9   : > { %v1256_v9 = vsel %vm541_vm8, %v1235_v2, %v1237_v13 }
 0x3ca   : > { %1324 = vmatpush2.bf16.msra.mxu1 %v1256_v9 }
 0x3cb   : > { %v1233_v19 = vpop.permute.xlu0 %1232 }
 0x3cc   : > { %v1231_v34 = vpop.permute.xlu1 %1230  ;;  %1325 = vmatprep.subr.bf16.mxu1 %v1233_v19 }
 0x3cd   : > { %v1255_v60 = vsel %vm541_vm8, %v1231_v34, %v1233_v19 }
 0x3ce   : > { %1326 = vmatpush2.bf16.msra.mxu1 %v1255_v60 }
 0x3d1   : > { %1328 = vmatmul.mubr.bf16.vlgmr.msra.gmra.mxu1 %v5015_v10 }
 0x3d2   : > { %4110 = vmatprep.mubr.msk.bf16.mxu1 %vm723_vm0, %v5018_v30 }
 0x3d8   : > { %v6001_v55 = vpop.permute.xlu0 %1135 }
 0x3d9   : > { %1338 = vmatmul.mubr.bf16.gmra.mxu1 %v5020_v33  ;;  %v1131_v57 = vpop.permute.xlu1 %1130 }
 0x3da   : > { %4111 = vmatprep.mubr.msk.bf16.mxu1 %vm723_vm0, %v5021_v36 }
 0x3dc   : > { %v1126_v1 = vpop.permute.xlu0 %1125 }
 0x3dd   : > { %v1121_v37 = vpop.permute.xlu1 %1120 }
 0x3e0   : > { %v1411_v39 = vpop.permute.xlu0 %1410 }
 0x3e1   : > { %1348 = vmatmul.mubr.bf16.gmra.mxu1 %v5023_v49  ;;  %v1409_v53 = vpop.permute.xlu1 %1408 }
 0x3e2   : > { %4112 = vmatprep.mubr.msk.bf16.mxu1 %vm723_vm0, %v5024_v7  ;;  %v1422_v56 = vsel %vm598_vm13, %v1409_v53, %v1411_v39 }
 0x3e4   : > { %v6003_v52 = vpop.permute.xlu0 %1414 }
 0x3e5   : > { %v1413_v5 = vpop.permute.xlu1 %1412 }
 0x3e6   : > { %v1423_v15 = vsel %vm598_vm13, %v1413_v5, %v6003_v52 }
 0x3e8   : > { %v1116_v12 = vpop.permute.xlu0 %1115 }
 0x3e9   : > { %1358 = vmatmul.mubr.bf16.gmra.mxu1 %v5026_v51  ;;  %v1111_v11 = vpop.permute.xlu1 %1110 }
 0x3ec   : > { %v1403_v4 = vpop.permute.xlu0 %1402 }
 0x3ed   : > { %v1401_v54 = vpop.permute.xlu1 %1400 }
 0x3ee   : > { %v1420_v40 = vsel %vm598_vm13, %v1401_v54, %v1403_v4 }
 0x3f0   : > { %v1407_v50 = vpop.permute.xlu0 %1406 }
 0x3f1   : > { %v1405_v24 = vpop.permute.xlu1 %1404 }
 0x3f2   : > { %v1421_v23 = vsel %vm598_vm13, %v1405_v24, %v1407_v50 }
 0x3f4   : > { %v1106_v18 = vpop.permute.xlu0 %1105 }
 0x3f5   : > { %v1101_v26 = vpop.permute.xlu1 %1100 }
 0x3f8   : > { %v1395_v41 = vpop.permute.xlu0 %1394 }
 0x3f9   : > { %v1393_v42 = vpop.permute.xlu1 %1392 }
 0x3fa   : > { %v1418_v14 = vsel %vm598_vm13, %v1393_v42, %v1395_v41 }
 0x3fc   : > { %v1399_v59 = vpop.permute.xlu0 %1398 }
 0x3fd   : > { %v1397_v61 = vpop.permute.xlu1 %1396 }
 0x3fe   : > { %v1419_v47 = vsel %vm598_vm13, %v1397_v61, %v1399_v59 }
 0x400   : > { %v1387_v22 = vpop.permute.xlu0 %1386 }
 0x401   : > { %v1385_v25 = vpop.permute.xlu1 %1384 }
 0x402   : > { %v1416_v63 = vsel %vm598_vm13, %v1385_v25, %v1387_v22 }
 0x491   : > { %v1329_v31 = vpop.f32.mrf.mxu1 }
 0x492   : > { %v1330_v32 = vadd.f32 %v1329_v31, %v1101_v26 }
 0x493   : > { %v1331_v8 = vpop.f32.mrf.mxu1 }
 0x494   : > { %v1332_v17 = vadd.f32 %v1331_v8, %v1101_v26  ;;  %v6015_v2 = vadd.f32 %v1416_v63, %v1330_v32 }
 0x495   : > { %v1333_v27 = vpop.f32.mrf.mxu1 }
 0x496   : > { %v6009_v35 = vadd.f32 %v1387_v22, %v1332_v17  ;;  %v6017_v9 = vadd.f32 %v1333_v27, %v1106_v18 }
 0x497   : > { %v1335_v28 = vpop.f32.mrf.mxu1 }
 0x498   : > { %v6022_v10 = vmul.f32 0.1, %v6009_v35  ;;  %v1336_v30 = vadd.f32 %v1335_v28, %v1106_v18  ;;  %vm1493_vm4 = vcmp.ge.f32.partialorder %v6009_v35, 0.0 }
 0x499   : > { %v1339_v29 = vpop.f32.mrf.mxu1 }
 0x49a   : > { %v1340_v45 = vadd.f32 %v1339_v29, %v1111_v11 }
 0x49b   : > { %v1341_v43 = vpop.f32.mrf.mxu1 }
 0x49c   : > { %v1342_v6 = vadd.f32 %v1341_v43, %v1111_v11  ;;  %v6026_v49 = vadd.f32 %v1418_v14, %v1340_v45 }
 0x49d   : > { %v1343_v44 = vpop.f32.mrf.mxu1 }
 0x49e   : > { %v6028_v7 = vadd.f32 %v1395_v41, %v1342_v6  ;;  %v1344_v5 = vadd.f32 %v1343_v44, %v1116_v12  ;;  %vm1496_vm2 = vcmp.ge.f32.partialorder %v6026_v49, 0.0 }
 0x49f   : > { %v1345_v58 = vpop.f32.mrf.mxu1 }
 0x4a0   : > { %v1346_v24 = vadd.f32 %v1345_v58, %v1116_v12  ;;  %v1512_v58 = vmul.f32 0.1, %v6026_v49  ;;  %vm1497_vm15 = vcmp.ge.f32.partialorder %v6028_v7, 0.0  ;;  %v6066_v61 = vadd.f32 %v1419_v47, %v1344_v5 }
 0x4a1   : > { %v1349_v0 = vpop.f32.mrf.mxu1 }
 0x4a2   : > { %v1350_v62 = vadd.f32 %v1349_v0, %v1121_v37  ;;  %v6056_v42 = vadd.f32 %v1399_v59, %v1346_v24  ;;  %v1391_v59 = vpop.permute.xlu0 %1390  ;;  %v1389_v0 = vpop.permute.xlu1 %1388  ;;  %v1514_v6 = vmul.f32 0.1, %v6066_v61 }
 0x4a3   : > { %v1351_v16 = vpop.f32.mrf.mxu1 }
 0x4a4   : > { %v1352_v48 = vadd.f32 %v1351_v16, %v1121_v37  ;;  %v6030_v51 = vadd.f32 %v1420_v40, %v1350_v62  ;;  %v1417_v40 = vsel %vm598_vm13, %v1389_v0, %v1391_v59 }
 0x4a5   : > { %v1353_v21 = vpop.f32.mrf.mxu1  ;;  %v6092_v45 = vadd.f32 %v1417_v40, %v6017_v9  ;;  %v1525_v9 = vsel %vm1493_vm4, %v6009_v35, %v6022_v10 }
 0x4a6   : > { %v6019_v19 = vadd.f32 %v1403_v4, %v1352_v48  ;;  %v1354_v37 = vadd.f32 %v1353_v21, %v1126_v1  ;;  %v1516_v27 = vmul.f32 0.1, %v6030_v51  ;;  %vm1500_vm11 = vcmp.ge.f32.partialorder %v6030_v51, 0.0 }
 0x4a7   : > { %v1355_v20 = vpop.f32.mrf.mxu1  ;;  %v6078_v48 = vadd.f32 %v1391_v59, %v1336_v30 }
 0x4a8   : > { %v1356_v34 = vadd.f32 %v1355_v20, %v1126_v1  ;;  %v1517_v31 = vmul.f32 0.1, %v6019_v19  ;;  %vm1501_vm7 = vcmp.ge.f32.partialorder %v6019_v19, 0.0  ;;  %v6048_v12 = vadd.f32 %v1421_v23, %v1354_v37 }
 0x4a9   : > { %v1359_v3 = vpop.f32.mrf.mxu1  ;;  %v1532_v22 = vsel %vm1500_vm11, %v6030_v51, %v1516_v27  ;;  %v1515_v20 = vmul.f32 0.1, %v6056_v42  ;;  %v1508_v23 = vmul.f32 0.1, %v6015_v2  ;;  %v1511_v63 = vmul.f32 0.1, %v6078_v48 }
 0x4aa   : > { %v1360_v13 = vadd.f32 %v1359_v3, %v1131_v57  ;;  %v6037_v8 = vadd.f32 %v1407_v50, %v1356_v34  ;;  %v1518_v16 = vmul.f32 0.1, %v6048_v12  ;;  %vm1502_vm3 = vcmp.ge.f32.partialorder %v6048_v12, 0.0 }
 0x4ab   : > { %v1361_v60 = vpop.f32.mrf.mxu1  ;;  %v1528_v3 = vsel %vm1496_vm2, %v6026_v49, %v1512_v58  ;;  %vm1495_vm11 = vcmp.ge.f32.partialorder %v6078_v48, 0.0  ;;  %v1510_v34 = vmul.f32 0.1, %v6092_v45 }
 0x4ac   : > { %v6024_v33 = vadd.f32 %v1422_v56, %v1360_v13  ;;  %v1362_v36 = vadd.f32 %v1361_v60, %v1131_v57  ;;  %v1519_v43 = vmul.f32 0.1, %v6037_v8  ;;  %vm1503_vm1 = vcmp.ge.f32.partialorder %v6037_v8, 0.0 }
 0x4ad   : > { %v1363_v53 = vpop.f32.mrf.mxu1  ;;  %v1534_v62 = vsel %vm1502_vm3, %v6048_v12, %v1518_v16 }
 0x4ae   : > { %v1520_v11 = vmul.f32 0.1, %v6024_v33  ;;  %v6033_v4 = vadd.f32 %v1411_v39, %v1362_v36  ;;  %v1364_v54 = vadd.f32 %v1363_v53, %v6001_v55  ;;  %vm1504_vm5 = vcmp.ge.f32.partialorder %v6024_v33, 0.0 }
 0x4af   : > { %v1365_v57 = vpop.f32.mrf.mxu1  ;;  %v1513_v39 = vmul.f32 0.1, %v6028_v7  ;;  %v1535_v56 = vsel %vm1503_vm1, %v6037_v8, %v1519_v43  ;;  %v1527_v53 = vsel %vm1495_vm11, %v6078_v48, %v1511_v63  ;;  %vm1734_vm1 = vcmask 998400  }
 0x4b0   : > { %vm1505_vm6 = vcmp.ge.f32.partialorder %v6033_v4, 0.0  ;;  %v1521_v1 = vmul.f32 0.1, %v6033_v4  ;;  %v6042_v18 = vadd.f32 %v1423_v15, %v1364_v54  ;;  %v1366_v26 = vadd.f32 %v1365_v57, %v6001_v55 }
 0x4b1   : > { %v1536_v29 = vsel %vm1504_vm5, %v6024_v33, %v1520_v11  ;;  %v1529_v15 = vsel %vm1497_vm15, %v6028_v7, %v1513_v39  ;;  %vm1499_vm5 = vcmp.ge.f32.partialorder %v6056_v42, 0.0  ;;  %v4538_v14 = vpack.i.bf16 %v1535_v56, %v1534_v62 }
 0x4b2   : > { %v1522_v50 = vmul.f32 0.1, %v6042_v18  ;;  %v6052_v28 = vadd.f32 %v6003_v52, %v1366_v26  ;;  %v1537_v41 = vsel %vm1505_vm6, %v6033_v4, %v1521_v1  ;;  %vm1506_vm12 = vcmp.ge.f32.partialorder %v6042_v18, 0.0 }
 0x4b3   : > { %v4523_v55 = vpack.i.bf16 %v1537_v41, %v1536_v29  ;;  %v1533_v52 = vsel %vm1501_vm7, %v6019_v19, %v1517_v31  ;;  %vm1492_vm6 = vcmp.ge.f32.partialorder %v6015_v2, 0.0  ;;  %vm1498_vm7 = vcmp.ge.f32.partialorder %v6066_v61, 0.0 }
 0x4b4   : > { %vm1507_vm14 = vcmp.ge.f32.partialorder %v6052_v28, 0.0  ;;  %v1523_v44 = vmul.f32 0.1, %v6052_v28  ;;  %v1538_v17 = vsel %vm1506_vm12, %v6042_v18, %v1522_v50  ;;  %v4528_v32 = vpack.i.bf16 %v1533_v52, %v1532_v22 }
 0x4b5   : > { %4524 = vrot.lane.b32.xlu1 %v4523_v55, %s5174_s14  ;;  %v4543_v47 = vpack.i.bf16 %v1529_v15, %v1528_v3  ;;  %v1531_v13 = vsel %vm1499_vm5, %v6056_v42, %v1515_v20  ;;  %v1530_v60 = vsel %vm1498_vm7, %v6066_v61, %v1514_v6  ;;  %v1524_v30 = vsel %vm1492_vm6, %v6015_v2, %v1508_v23 }
 0x4b6   : > { %v1539_v21 = vsel %vm1507_vm14, %v6052_v28, %v1523_v44  ;;  %vm1494_vm12 = vcmp.ge.f32.partialorder %v6092_v45, 0.0  ;;  %v4548_v36 = vpack.i.bf16 %v1531_v13, %v1530_v60  ;;  %v4553_v37 = vpack.i.bf16 %v1525_v9, %v1524_v30 }
 0x4b7   : > { %v4533_v25 = vpack.i.bf16 %v1539_v21, %v1538_v17  ;;  %v1526_v10 = vsel %vm1494_vm12, %v6092_v45, %v1510_v34  ;;  %vm1588_vm14 = vcmask 15360   ;;  %vm1677_vm15 = vcmask 1022976  }
 0x4b8   : > { %v4558_v5 = vpack.i.bf16 %v1527_v53, %v1526_v10 }
 0x4b9   : > { %4534 = vrot.lane.b32.xlu0 %v4533_v25, %s5174_s14  ;;  %4529 = vrot.lane.b32.xlu1 %v4528_v32, %s5174_s14 }
 0x4bd   : > { %4539 = vrot.lane.b32.xlu0 %v4538_v14, %s5174_s14  ;;  %4544 = vrot.lane.b32.xlu1 %v4543_v47, %s5174_s14 }
 0x4c1   : > { %4549 = vrot.lane.b32.xlu0 %v4548_v36, %s5174_s14  ;;  %4554 = vrot.lane.b32.xlu1 %v4553_v37, %s5174_s14 }
 0x4c5   : > { %4559 = vrot.lane.b32.xlu0 %v4558_v5, %s5174_s14 }
 0x527   : > { %v4525_v11 = vpop.permute.xlu1 %4524 }
 0x528   : > { %v4527_v54 = vunpack.i.h.bf16 %v4525_v11  ;;  %v4526_v24 = vunpack.i.l.bf16 %v4525_v11 }
 0x52a   : > { %v1595_v31 = vsel %vm1588_vm14, %v4526_v24, %v4527_v54  ;;  %v6120_v57 = vsel %vm5340_vm9, %v4526_v24, 0.0 }
 0x52b   : > { %v6124_v1 = vsel %vm5365_vm10, %v1595_v31, 0.0  ;;  %v4530_v26 = vpop.permute.xlu1 %4529  ;;  %v4535_v39 = vpop.permute.xlu0 %4534 }
 0x52c   : > { %v4532_v27 = vunpack.i.h.bf16 %v4530_v26  ;;  %v4531_v50 = vunpack.i.l.bf16 %v4530_v26  ;;  %v4537_v29 = vunpack.i.h.bf16 %v4535_v39  ;;  %v4536_v41 = vunpack.i.l.bf16 %v4535_v39 }
 0x52d   : > { %v4563_v55 = vpack.i.bf16 %v6124_v1, %v6120_v57 }
 0x52e   : > { %v1593_v43 = vsel %vm1588_vm14, %v4531_v50, %v4532_v27  ;;  %v6131_v44 = vsel %vm5340_vm9, %v4531_v50, 0.0  ;;  %v1596_v52 = vsel %vm1588_vm14, %v4536_v41, %v4537_v29  ;;  %v6136_v58 = vsel %vm5340_vm9, %v4536_v41, 0.0 }
 0x52f   : > { %v6140_v59 = vsel %vm5365_vm10, %v1593_v43, 0.0  ;;  %v6144_v0 = vsel %vm5365_vm10, %v1596_v52, 0.0  ;;  %4564 = vrot.lane.b32.xlu1 %v4563_v55, %s5175_s23  ;;  %v4545_v16 = vpop.permute.xlu1 %4544  ;;  %v4540_v17 = vpop.permute.xlu0 %4539  ;;  %v1765_v21 = vpack.c.bf16 %v6136_v58, %v6120_v57 }
 0x530   : > { %v4547_v22 = vunpack.i.h.bf16 %v4545_v16  ;;  %v4546_v25 = vunpack.i.l.bf16 %v4545_v16  ;;  %v4542_v32 = vunpack.i.h.bf16 %v4540_v17  ;;  %v4541_v20 = vunpack.i.l.bf16 %v4540_v17 }
 0x531   : > { %v4568_v56 = vpack.i.bf16 %v6140_v59, %v6131_v44  ;;  %v4573_v15 = vpack.i.bf16 %v6144_v0, %v6136_v58  ;;  %v1766_v13 = vpack.c.bf16 %v6144_v0, %v6124_v1 }
 0x532   : > { %v1591_v40 = vsel %vm1588_vm14, %v4546_v25, %v4547_v22  ;;  %v6156_v23 = vsel %vm5340_vm9, %v4546_v25, 0.0  ;;  %v1594_v6 = vsel %vm1588_vm14, %v4541_v20, %v4542_v32  ;;  %v6161_v62 = vsel %vm5340_vm9, %v4541_v20, 0.0 }
 0x533   : > { %v6165_v3 = vsel %vm5365_vm10, %v1591_v40, 0.0  ;;  %v6169_v14 = vsel %vm5365_vm10, %v1594_v6, 0.0  ;;  %4569 = vrot.lane.b32.xlu1 %v4568_v56, %s5175_s23  ;;  %4574 = vrot.lane.b32.xlu0 %v4573_v15, %s5175_s23  ;;  %v4555_v47 = vpop.permute.xlu1 %4554  ;;  %v4550_v63 = vpop.permute.xlu0 %4549  ;;  %v1763_v39 = vpack.c.bf16 %v6161_v62, %v6131_v44 }
 0x534   : > { %v4557_v9 = vunpack.i.h.bf16 %v4555_v47  ;;  %v4556_v34 = vunpack.i.l.bf16 %v4555_v47  ;;  %v4552_v60 = vunpack.i.h.bf16 %v4550_v63  ;;  %v4551_v30 = vunpack.i.l.bf16 %v4550_v63 }
 0x535   : > { %v4583_v36 = vpack.i.bf16 %v6165_v3, %v6156_v23  ;;  %v4578_v37 = vpack.i.bf16 %v6169_v14, %v6161_v62  ;;  %v1764_v26 = vpack.c.bf16 %v6169_v14, %v6140_v59 }
 0x536   : > { %v1589_v53 = vsel %vm1588_vm14, %v4556_v34, %v4557_v9  ;;  %v6182_v10 = vsel %vm5340_vm9, %v4556_v34, 0.0  ;;  %v1592_v5 = vsel %vm1588_vm14, %v4551_v30, %v4552_v60  ;;  %v6187_v11 = vsel %vm5340_vm9, %v4551_v30, 0.0 }
 0x537   : > { %v6191_v54 = vsel %vm5365_vm10, %v1589_v53, 0.0  ;;  %v6195_v24 = vsel %vm5365_vm10, %v1592_v5, 0.0  ;;  %4584 = vrot.lane.b32.xlu1 %v4583_v36, %s5175_s23  ;;  %4579 = vrot.lane.b32.xlu0 %v4578_v37, %s5175_s23  ;;  %v4560_v31 = vpop.permute.xlu0 %4559  ;;  %v1761_v52 = vpack.c.bf16 %v6187_v11, %v6156_v23 }
 0x538   : > { %v4562_v27 = vunpack.i.h.bf16 %v4560_v31  ;;  %v4561_v50 = vunpack.i.l.bf16 %v4560_v31  ;;  %v4593_v29 = vpack.i.bf16 %v6191_v54, %v6182_v10  ;;  %v4588_v41 = vpack.i.bf16 %v6195_v24, %v6187_v11 }
 0x539   : > { %v1762_v43 = vpack.c.bf16 %v6195_v24, %v6165_v3 }
 0x53a   : > { %v1590_v16 = vsel %vm1588_vm14, %v4561_v50, %v4562_v27  ;;  %v6214_v17 = vsel %vm5340_vm9, %v4561_v50, 0.0 }
 0x53b   : > { %v6218_v22 = vsel %vm5365_vm10, %v1590_v16, 0.0  ;;  %4594 = vrot.lane.b32.xlu1 %v4593_v29, %s5175_s23  ;;  %4589 = vrot.lane.b32.xlu0 %v4588_v41, %s5175_s23  ;;  %v1759_v25 = vpack.c.bf16 %v6214_v17, %v6182_v10  ;;  %v5029_v10 = vld [vmem:[%s7420_s2 + $0x84] ss:$8 sps:$4 sm:$0xff]  }
 0x53c   : > { %v4598_v32 = vpack.i.bf16 %v6218_v22, %v6214_v17  ;;  %v1760_v20 = vpack.c.bf16 %v6218_v22, %v6191_v54  ;;  %4153 = vmatprep.mubr.msk.bf16.mxu0 %vm723_vm0, %v5029_v10 }
 0x53f   : > { %4604 = vrot.lane.b32.xlu1 %v4563_v55, %s7426_s24  ;;  %4599 = vrot.lane.b32.xlu0 %v4598_v32, %s5175_s23  ;;  %s7444_s23 = sand.u32 1, %s5143_s16  }
 0x543   : > { %4609 = vrot.lane.b32.xlu1 %v4568_v56, %s7426_s24  ;;  %4614 = vrot.lane.b32.xlu0 %v4573_v15, %s7426_s24 }
 0x547   : > { %4624 = vrot.lane.b32.xlu1 %v4583_v36, %s7426_s24  ;;  %4619 = vrot.lane.b32.xlu0 %v4578_v37, %s7426_s24 }
 0x54b   : > { %4634 = vrot.lane.b32.xlu1 %v4593_v29, %s7426_s24  ;;  %4629 = vrot.lane.b32.xlu0 %v4588_v41, %s7426_s24 }
 0x54f   : > { %4639 = vrot.lane.b32.xlu0 %v4598_v32, %s7426_s24 }
 0x5a1   : > { %v4565_v40 = vpop.permute.xlu1 %4564 }
 0x5a2   : > { %v4567_v6 = vunpack.i.h.bf16 %v4565_v40  ;;  %v4566_v47 = vunpack.i.l.bf16 %v4565_v40 }
 0x5a4   : > { %v1684_v15 = vsel %vm1677_vm15, %v4566_v47, %v4567_v6 }
 0x5a5   : > { %v4570_v55 = vpop.permute.xlu1 %4569  ;;  %v4575_v63 = vpop.permute.xlu0 %4574 }
 0x5a6   : > { %v4577_v9 = vunpack.i.h.bf16 %v4575_v63  ;;  %v4576_v56 = vunpack.i.l.bf16 %v4575_v63  ;;  %v4572_v34 = vunpack.i.h.bf16 %v4570_v55  ;;  %v4571_v60 = vunpack.i.l.bf16 %v4570_v55 }
 0x5a8   : > { %v1774_v30 = vpack.c.bf16 %v4577_v9, %v4567_v6  ;;  %v1685_v36 = vsel %vm1677_vm15, %v4576_v56, %v4577_v9  ;;  %v1682_v41 = vsel %vm1677_vm15, %v4571_v60, %v4572_v34 }
 0x5a9   : > { %v4585_v37 = vpop.permute.xlu1 %4584  ;;  %v4580_v53 = vpop.permute.xlu0 %4579  ;;  %v1773_v5 = vpack.c.bf16 %v1685_v36, %v1684_v15 }
 0x5aa   : > { %v4582_v31 = vunpack.i.h.bf16 %v4580_v53  ;;  %v4581_v27 = vunpack.i.l.bf16 %v4580_v53  ;;  %1913 = vrot.lane.b32.xlu0 %v1774_v30, %s7428_s7  ;;  %v4587_v50 = vunpack.i.h.bf16 %v4585_v37  ;;  %v4586_v29 = vunpack.i.l.bf16 %v4585_v37 }
 0x5ab   : > { %1911 = vrot.lane.b32.xlu1 %v1773_v5, %s7428_s7 }
 0x5ac   : > { %v1772_v16 = vpack.c.bf16 %v4582_v31, %v4572_v34  ;;  %v1683_v32 = vsel %vm1677_vm15, %v4581_v27, %v4582_v31  ;;  %v1680_v9 = vsel %vm1677_vm15, %v4586_v29, %v4587_v50 }
 0x5ad   : > { %v4595_v40 = vpop.permute.xlu1 %4594  ;;  %v4590_v6 = vpop.permute.xlu0 %4589  ;;  %v1771_v47 = vpack.c.bf16 %v1683_v32, %v1682_v41 }
 0x5ae   : > { %v4592_v55 = vunpack.i.h.bf16 %v4590_v6  ;;  %v4591_v63 = vunpack.i.l.bf16 %v4590_v6  ;;  %1909 = vrot.lane.b32.xlu0 %v1772_v16, %s7428_s7  ;;  %v4597_v56 = vunpack.i.h.bf16 %v4595_v40  ;;  %v4596_v15 = vunpack.i.l.bf16 %v4595_v40 }
 0x5af   : > { %1907 = vrot.lane.b32.xlu1 %v1771_v47, %s7428_s7 }
 0x5b0   : > { %v1770_v30 = vpack.c.bf16 %v4592_v55, %v4587_v50  ;;  %v1681_v36 = vsel %vm1677_vm15, %v4591_v63, %v4592_v55  ;;  %v1678_v5 = vsel %vm1677_vm15, %v4596_v15, %v4597_v56 }
 0x5b1   : > { %v4600_v60 = vpop.permute.xlu0 %4599  ;;  %v1769_v34 = vpack.c.bf16 %v1681_v36, %v1680_v9  ;;  %v4605_v41 = vpop.permute.xlu1 %4604 }
 0x5b2   : > { %v4602_v37 = vunpack.i.h.bf16 %v4600_v60  ;;  %v4601_v53 = vunpack.i.l.bf16 %v4600_v60  ;;  %1905 = vrot.lane.b32.xlu0 %v1770_v30, %s7428_s7  ;;  %v4607_v57 = vunpack.i.h.bf16 %v4605_v41  ;;  %v4606_v58 = vunpack.i.l.bf16 %v4605_v41  ;;  %v4122_v41 = vld [vmem:[%s7421_s3 + $0x88] sm:$0xff] }
 0x5b3   : > { %1903 = vrot.lane.b32.xlu1 %v1769_v34, %s7428_s7 }
 0x5b4   : > { %v1768_v31 = vpack.c.bf16 %v4602_v37, %v4597_v56  ;;  %v1679_v27 = vsel %vm1677_vm15, %v4601_v53, %v4602_v37  ;;  %v1741_v23 = vsel %vm1734_vm1, %v4606_v58, %v4607_v57  ;;  %v4128_v53 = vld [vmem:[%s7421_s3 + $0xb8] sm:$0xff] }
 0x5b5   : > { %v1767_v29 = vpack.c.bf16 %v1679_v27, %v1678_v5  ;;  %v4615_v50 = vpop.permute.xlu0 %4614  ;;  %v4610_v32 = vpop.permute.xlu1 %4609  ;;  %v4127_v5 = vld [vmem:[%s7421_s3 + $0xb0] sm:$0xff]  ;;  %v4125_v27 = vld [vmem:[%s7421_s3 + $0xa0] sm:$0xff] }
 0x5b6   : > { %1901 = vrot.lane.b32.xlu0 %v1768_v31, %s7428_s7  ;;  %v4617_v1 = vunpack.i.h.bf16 %v4615_v50  ;;  %v4616_v0 = vunpack.i.l.bf16 %v4615_v50  ;;  %v4612_v14 = vunpack.i.h.bf16 %v4610_v32  ;;  %v4126_v31 = vld [vmem:[%s7421_s3 + $0xa8] sm:$0xff]  ;;  %v4123_v50 = vld [vmem:[%s7421_s3 + $0x90] sm:$0xff] }
 0x5b7   : > { %1899 = vrot.lane.b32.xlu1 %v1767_v29, %s7428_s7  ;;  %v4124_v29 = vld [vmem:[%s7421_s3 + $0x98] sm:$0xff] }
 0x5b8   : > { %v1742_v44 = vsel %vm1734_vm1, %v4616_v0, %v4617_v1  ;;  %v1782_v11 = vpack.c.bf16 %v4617_v1, %v4607_v57 }
 0x5b9   : > { %v4620_v16 = vpop.permute.xlu0 %4619  ;;  %v4625_v3 = vpop.permute.xlu1 %4624  ;;  %v1781_v24 = vpack.c.bf16 %v1742_v44, %v1741_v23 }
 0x5ba   : > { %1897 = vrot.lane.b32.xlu0 %v1766_v13, %s7428_s7  ;;  %v4621_v62 = vunpack.i.l.bf16 %v4620_v16  ;;  %v4611_v13 = vunpack.i.l.bf16 %v4610_v32  ;;  %v4627_v17 = vunpack.i.h.bf16 %v4625_v3  ;;  %v4626_v22 = vunpack.i.l.bf16 %v4625_v3 }
 0x5bb   : > { %1895 = vrot.lane.b32.xlu1 %v1765_v21, %s7428_s7  ;;  %v4622_v21 = vunpack.i.h.bf16 %v4620_v16  ;;  %v4121_v16 = vld [vmem:[%s7421_s3 + $0x80] sm:$0xff] }
 0x5bc   : > { %v1737_v63 = vsel %vm1734_vm1, %v4626_v22, %v4627_v17 }
 0x5bd   : > { %v4630_v59 = vpop.permute.xlu0 %4629 }
 0x5be   : > { %1893 = vrot.lane.b32.xlu0 %v1764_v26, %s7428_s7  ;;  %v1740_v26 = vsel %vm1734_vm1, %v4621_v62, %v4622_v21 }
 0x5bf   : > { %1891 = vrot.lane.b32.xlu1 %v1763_v39, %s7428_s7  ;;  %v4632_v39 = vunpack.i.h.bf16 %v4630_v59 }
 0x5c1   : > { %v4640_v54 = vpop.permute.xlu0 %4639  ;;  %v1778_v15 = vpack.c.bf16 %v4632_v39, %v4627_v17 }
 0x5c2   : > { %1889 = vrot.lane.b32.xlu0 %v1762_v43, %s7428_s7  ;;  %v4631_v43 = vunpack.i.l.bf16 %v4630_v59  ;;  %v4642_v47 = vunpack.i.h.bf16 %v4640_v54  ;;  %v4641_v55 = vunpack.i.l.bf16 %v4640_v54 }
 0x5c3   : > { %1887 = vrot.lane.b32.xlu1 %v1761_v52, %s7428_s7  ;;  %v1739_v52 = vsel %vm1734_vm1, %v4611_v13, %v4612_v14 }
 0x5c4   : > { %v1779_v40 = vpack.c.bf16 %v1740_v26, %v1739_v52  ;;  %v1738_v6 = vsel %vm1734_vm1, %v4631_v43, %v4632_v39  ;;  %v1736_v36 = vsel %vm1734_vm1, %v4641_v55, %v4642_v47 }
 0x5c5   : > { %v1777_v30 = vpack.c.bf16 %v1738_v6, %v1737_v63 }
 0x5c6   : > { %1885 = vrot.lane.b32.xlu0 %v1760_v20, %s7428_s7  ;;  %v4635_v20 = vpop.permute.xlu1 %4634 }
 0x5c7   : > { %1883 = vrot.lane.b32.xlu1 %v1759_v25, %s7428_s7  ;;  %v1780_v25 = vpack.c.bf16 %v4622_v21, %v4612_v14  ;;  %v4637_v9 = vunpack.i.h.bf16 %v4635_v20  ;;  %v4636_v56 = vunpack.i.l.bf16 %v4635_v20 }
 0x5c9   : > { %v1735_v60 = vsel %vm1734_vm1, %v4636_v56, %v4637_v9  ;;  %v1776_v34 = vpack.c.bf16 %v4642_v47, %v4637_v9 }
 0x5ca   : > { %1929 = vrot.lane.b32.xlu0 %v1782_v11, %s7428_s7  ;;  %v1775_v37 = vpack.c.bf16 %v1736_v36, %v1735_v60 }
 0x5cb   : > { %1927 = vrot.lane.b32.xlu1 %v1781_v24, %s7428_s7 }
 0x5ce   : > { %1925 = vrot.lane.b32.xlu0 %v1780_v25, %s7428_s7 }
 0x5cf   : > { %1923 = vrot.lane.b32.xlu1 %v1779_v40, %s7428_s7 }
 0x5d2   : > { %1921 = vrot.lane.b32.xlu0 %v1778_v15, %s7428_s7 }
 0x5d3   : > { %1919 = vrot.lane.b32.xlu1 %v1777_v30, %s7428_s7 }
 0x5d6   : > { %1917 = vrot.lane.b32.xlu0 %v1776_v34, %s7428_s7  ;;  %v5027_v34 = vld [vmem:[%s7420_s2 + $0x80] ss:$8 sps:$4 sm:$0xff]  }
 0x5d7   : > { %1915 = vrot.lane.b32.xlu1 %v1775_v37, %s7428_s7  ;;  %v5030_v37 = vld [vmem:[%s7420_s2 + $0x94] ss:$8 sps:$4 sm:$0xff]  }
 0x5da   : > { %1820 = vperm.xlu0 %4401, %v4128_v53   ;;  %v5032_v53 = vld [vmem:[%s7420_s2 + $0x90] ss:$8 sps:$4 sm:$0xff]  }
 0x5db   : > { %1815 = vperm.xlu1 %4402, %v4127_v5   ;;  %v5033_v5 = vld [vmem:[%s7420_s2 + $0xa4] ss:$8 sps:$4 sm:$0xff]  }
 0x5de   : > { %1810 = vperm.xlu0 %4401, %v4126_v31   ;;  %v5035_v31 = vld [vmem:[%s7420_s2 + $0xa0] ss:$8 sps:$4 sm:$0xff]  }
 0x5df   : > { %1805 = vperm.xlu1 %4402, %v4125_v27   ;;  %v5036_v27 = vld [vmem:[%s7420_s2 + $0xb4] ss:$8 sps:$4 sm:$0xff]  }
 0x5e2   : > { %1800 = vperm.xlu0 %4401, %v4124_v29   ;;  %v5038_v29 = vld [vmem:[%s7420_s2 + $0xb0] ss:$8 sps:$4 sm:$0xff]  }
 0x5e3   : > { %1795 = vperm.xlu1 %4402, %v4123_v50  }
 0x5e6   : > { %1790 = vperm.xlu0 %4401, %v4122_v41  }
 0x5e7   : > { %1785 = vperm.xlu1 %4402, %v4121_v16  }
 0x61c   : > { %v1914_v32 = vpop.permute.xlu0 %1913 }
 0x61d   : > { %1980 = vmatprep.subr.bf16.mxu0 %v1914_v32  ;;  %v1912_v1 = vpop.permute.xlu1 %1911 }
 0x61e   : > { %v1939_v0 = vsel %vm598_vm13, %v1912_v1, %v1914_v32 }
 0x61f   : > { %1981 = vmatpush1.bf16.msra.mxu0 %v1939_v0 }
 0x620   : > { %v1910_v57 = vpop.permute.xlu0 %1909 }
 0x621   : > { %1982 = vmatprep.subr.bf16.mxu0 %v1910_v57  ;;  %v1908_v58 = vpop.permute.xlu1 %1907 }
 0x622   : > { %v1938_v59 = vsel %vm598_vm13, %v1908_v58, %v1910_v57 }
 0x623   : > { %1983 = vmatpush1.bf16.msra.mxu0 %v1938_v59 }
 0x624   : > { %v1906_v44 = vpop.permute.xlu0 %1905 }
 0x625   : > { %1984 = vmatprep.subr.bf16.mxu0 %v1906_v44  ;;  %v1904_v21 = vpop.permute.xlu1 %1903 }
 0x626   : > { %v1937_v62 = vsel %vm598_vm13, %v1904_v21, %v1906_v44 }
 0x627   : > { %1985 = vmatpush1.bf16.msra.mxu0 %v1937_v62 }
 0x628   : > { %v1902_v3 = vpop.permute.xlu0 %1901 }
 0x629   : > { %1986 = vmatprep.subr.bf16.mxu0 %v1902_v3  ;;  %v1900_v23 = vpop.permute.xlu1 %1899 }
 0x62a   : > { %v1936_v14 = vsel %vm598_vm13, %v1900_v23, %v1902_v3 }
 0x62b   : > { %1987 = vmatpush1.bf16.msra.mxu0 %v1936_v14 }
 0x62c   : > { %v1898_v13 = vpop.permute.xlu0 %1897 }
 0x62d   : > { %v1896_v11 = vpop.permute.xlu1 %1895  ;;  %1988 = vmatprep.subr.bf16.mxu0 %v1898_v13 }
 0x62e   : > { %v1935_v24 = vsel %vm598_vm13, %v1896_v11, %v1898_v13 }
 0x62f   : > { %1989 = vmatpush1.bf16.msra.mxu0 %v1935_v24 }
 0x630   : > { %v1894_v26 = vpop.permute.xlu0 %1893 }
 0x631   : > { %v1892_v39 = vpop.permute.xlu1 %1891  ;;  %1990 = vmatprep.subr.bf16.mxu0 %v1894_v26 }
 0x632   : > { %v1934_v43 = vsel %vm598_vm13, %v1892_v39, %v1894_v26 }
 0x633   : > { %1991 = vmatpush1.bf16.msra.mxu0 %v1934_v43 }
 0x634   : > { %v1890_v54 = vpop.permute.xlu0 %1889 }
 0x635   : > { %v1888_v10 = vpop.permute.xlu1 %1887  ;;  %1992 = vmatprep.subr.bf16.mxu0 %v1890_v54 }
 0x636   : > { %v1933_v52 = vsel %vm598_vm13, %v1888_v10, %v1890_v54 }
 0x637   : > { %1993 = vmatpush1.bf16.msra.mxu0 %v1933_v52 }
 0x638   : > { %v1886_v17 = vpop.permute.xlu0 %1885 }
 0x639   : > { %v1884_v22 = vpop.permute.xlu1 %1883  ;;  %1994 = vmatprep.subr.bf16.mxu0 %v1886_v17 }
 0x63a   : > { %v1932_v25 = vsel %vm598_vm13, %v1884_v22, %v1886_v17 }
 0x63b   : > { %1995 = vmatpush1.bf16.msra.mxu0 %v1932_v25 }
 0x63c   : > { %v1930_v20 = vpop.permute.xlu0 %1929 }
 0x63d   : > { %v1928_v40 = vpop.permute.xlu1 %1927  ;;  %2004 = vmatprep.subr.bf16.mxu0 %v1930_v20 }
 0x63e   : > { %v1943_v6 = vsel %vm598_vm13, %v1928_v40, %v1930_v20 }
 0x63f   : > { %2005 = vmatpush2.bf16.msra.mxu0 %v1943_v6 }
 0x640   : > { %v1926_v47 = vpop.permute.xlu0 %1925 }
 0x641   : > { %v1924_v55 = vpop.permute.xlu1 %1923  ;;  %2006 = vmatprep.subr.bf16.mxu0 %v1926_v47 }
 0x642   : > { %v1942_v63 = vsel %vm598_vm13, %v1924_v55, %v1926_v47 }
 0x643   : > { %2007 = vmatpush2.bf16.msra.mxu0 %v1942_v63 }
 0x644   : > { %v1922_v9 = vpop.permute.xlu0 %1921 }
 0x645   : > { %v1920_v56 = vpop.permute.xlu1 %1919  ;;  %2008 = vmatprep.subr.bf16.mxu0 %v1922_v9 }
 0x646   : > { %v1941_v15 = vsel %vm598_vm13, %v1920_v56, %v1922_v9 }
 0x647   : > { %2009 = vmatpush2.bf16.msra.mxu0 %v1941_v15 }
 0x648   : > { %v1918_v30 = vpop.permute.xlu0 %1917 }
 0x649   : > { %v1916_v36 = vpop.permute.xlu1 %1915  ;;  %2010 = vmatprep.subr.bf16.mxu0 %v1918_v30 }
 0x64a   : > { %v1940_v60 = vsel %vm598_vm13, %v1916_v36, %v1918_v30 }
 0x64b   : > { %2011 = vmatpush2.bf16.msra.mxu0 %v1940_v60 }
 0x64e   : > { %2013 = vmatmul.mubr.bf16.vlgmr.msra.gmra.mxu0 %v5027_v34 }
 0x64f   : > { %4154 = vmatprep.mubr.msk.bf16.mxu0 %vm723_vm0, %v5030_v37 }
 0x655   : > { %v1821_v3 = vpop.permute.xlu0 %1820 }
 0x656   : > { %2023 = vmatmul.mubr.bf16.gmra.mxu0 %v5032_v53  ;;  %v1816_v32 = vpop.permute.xlu1 %1815 }
 0x657   : > { %4155 = vmatprep.mubr.msk.bf16.mxu0 %vm723_vm0, %v5033_v5 }
 0x659   : > { %v1811_v24 = vpop.permute.xlu0 %1810 }
 0x65a   : > { %v1806_v58 = vpop.permute.xlu1 %1805 }
 0x65d   : > { %v1801_v15 = vpop.permute.xlu0 %1800 }
 0x65e   : > { %2033 = vmatmul.mubr.bf16.gmra.mxu0 %v5035_v31  ;;  %v1796_v62 = vpop.permute.xlu1 %1795 }
 0x65f   : > { %4156 = vmatprep.mubr.msk.bf16.mxu0 %vm723_vm0, %v5036_v27 }
 0x662   : > { %v1786_v11 = vpop.permute.xlu1 %1785 }
 0x666   : > { %2043 = vmatmul.mubr.bf16.gmra.mxu0 %v5038_v29 }
 0x70e   : > { %v2014_v50 = vpop.f32.mrf.mxu0 }
 0x70f   : > { %v6371_v22 = vadd.f32 %v2014_v50, %v1786_v11 }
 0x710   : > { %v2016_v41 = vpop.f32.mrf.mxu0 }
 0x711   : > { %v6369_v26 = vadd.f32 %v2016_v41, %v1786_v11 }
 0x712   : > { %v6365_v16 = vpop.f32.mrf.mxu0 }
 0x713   : > { %v2070_v40 = vmul.f32 0.1, %v6369_v26 }
 0x714   : > { %v6367_v1 = vpop.f32.mrf.mxu0 }
 0x716   : > { %v2024_v0 = vpop.f32.mrf.mxu0 }
 0x717   : > { %v2025_v6 = vadd.f32 %v2024_v0, %v1796_v62 }
 0x718   : > { %v2026_v57 = vpop.f32.mrf.mxu0 }
 0x719   : > { %v2027_v10 = vadd.f32 %v2026_v57, %v1796_v62  ;;  %v2073_v0 = vmul.f32 0.1, %v2025_v6  ;;  %vm2057_vm14 = vcmp.ge.f32.partialorder %v2025_v6, 0.0 }
 0x71a   : > { %v2028_v59 = vpop.f32.mrf.mxu0 }
 0x71b   : > { %v2074_v30 = vmul.f32 0.1, %v2027_v10  ;;  %vm2058_vm11 = vcmp.ge.f32.partialorder %v2027_v10, 0.0  ;;  %v2029_v57 = vadd.f32 %v2028_v59, %v1801_v15  ;;  %v2069_v59 = vmul.f32 0.1, %v6371_v22 }
 0x71c   : > { %v2030_v44 = vpop.f32.mrf.mxu0 }
 0x71d   : > { %v2031_v27 = vadd.f32 %v2030_v44, %v1801_v15  ;;  %v2090_v11 = vsel %vm2058_vm11, %v2027_v10, %v2074_v30  ;;  %vm2149_vm11 = vcmask 39936  }
 0x71e   : > { %v2034_v21 = vpop.f32.mrf.mxu0 }
 0x71f   : > { %v2035_v52 = vadd.f32 %v2034_v21, %v1806_v58 }
 0x720   : > { %v2036_v23 = vpop.f32.mrf.mxu0 }
 0x721   : > { %v2037_v39 = vadd.f32 %v2036_v23, %v1806_v58  ;;  %v2077_v36 = vmul.f32 0.1, %v2035_v52  ;;  %vm2061_vm5 = vcmp.ge.f32.partialorder %v2035_v52, 0.0 }
 0x722   : > { %v2038_v14 = vpop.f32.mrf.mxu0 }
 0x723   : > { %v2078_v47 = vmul.f32 0.1, %v2037_v39  ;;  %vm2062_vm4 = vcmp.ge.f32.partialorder %v2037_v39, 0.0  ;;  %v2039_v60 = vadd.f32 %v2038_v14, %v1811_v24  ;;  %v2093_v58 = vsel %vm2061_vm5, %v2035_v52, %v2077_v36 }
 0x724   : > { %v2040_v13 = vpop.f32.mrf.mxu0  ;;  %v2075_v52 = vmul.f32 0.1, %v2029_v57  ;;  %vm2059_vm5 = vcmp.ge.f32.partialorder %v2029_v57, 0.0 }
 0x725   : > { %v2041_v63 = vadd.f32 %v2040_v13, %v1811_v24  ;;  %v2094_v50 = vsel %vm2062_vm4, %v2037_v39, %v2078_v47  ;;  %v2079_v21 = vmul.f32 0.1, %v2039_v60  ;;  %vm2063_vm15 = vcmp.ge.f32.partialorder %v2039_v60, 0.0 }
 0x726   : > { %v2044_v43 = vpop.f32.mrf.mxu0  ;;  %v4648_v44 = vpack.i.bf16 %v2094_v50, %v2093_v58  ;;  %v2076_v24 = vmul.f32 0.1, %v2031_v27  ;;  %vm2053_vm4 = vcmp.ge.f32.partialorder %v6371_v22, 0.0 }
 0x727   : > { %v2045_v54 = vadd.f32 %v2044_v43, %v1816_v32  ;;  %v2080_v41 = vmul.f32 0.1, %v2041_v63  ;;  %vm2064_vm12 = vcmp.ge.f32.partialorder %v2041_v63, 0.0 }
 0x728   : > { %v2046_v17 = vpop.f32.mrf.mxu0 }
 0x729   : > { %v2081_v25 = vmul.f32 0.1, %v2045_v54  ;;  %v2047_v20 = vadd.f32 %v2046_v17, %v1816_v32  ;;  %vm2065_vm2 = vcmp.ge.f32.partialorder %v2045_v54, 0.0  ;;  %v2096_v39 = vsel %vm2064_vm12, %v2041_v63, %v2080_v41 }
 0x72a   : > { %v2048_v55 = vpop.f32.mrf.mxu0  ;;  %v2095_v17 = vsel %vm2063_vm15, %v2039_v60, %v2079_v21  ;;  %vm2490_vm12 = vcmask 1006592  }
 0x72b   : > { %vm2066_vm3 = vcmp.ge.f32.partialorder %v2047_v20, 0.0  ;;  %v2082_v9 = vmul.f32 0.1, %v2047_v20  ;;  %v2049_v56 = vadd.f32 %v2048_v55, %v1821_v3  ;;  %v2097_v37 = vsel %vm2065_vm2, %v2045_v54, %v2081_v25 }
 0x72c   : > { %v2050_v34 = vpop.f32.mrf.mxu0  ;;  %vm2054_vm2 = vcmp.ge.f32.partialorder %v6369_v26, 0.0  ;;  %v2089_v54 = vsel %vm2057_vm14, %v2025_v6, %v2073_v0  ;;  %v4658_v10 = vpack.i.bf16 %v2096_v39, %v2095_v17  ;;  %v2085_v55 = vsel %vm2053_vm4, %v6371_v22, %v2069_v59 }
 0x72d   : > { %v2098_v53 = vsel %vm2066_vm3, %v2047_v20, %v2082_v9  ;;  %v2083_v5 = vmul.f32 0.1, %v2049_v56  ;;  %v2051_v31 = vadd.f32 %v2050_v34, %v1821_v3  ;;  %vm2067_vm6 = vcmp.ge.f32.partialorder %v2049_v56, 0.0  ;;  %v1791_v3 = vpop.permute.xlu0 %1790 }
 0x72e   : > { %v4643_v29 = vpack.i.bf16 %v2098_v53, %v2097_v37  ;;  %v2021_v13 = vadd.f32 %v6367_v1, %v1791_v3  ;;  %vm2060_vm3 = vcmp.ge.f32.partialorder %v2031_v27, 0.0  ;;  %v2019_v43 = vadd.f32 %v6365_v16, %v1791_v3 }
 0x72f   : > { %vm2068_vm7 = vcmp.ge.f32.partialorder %v2051_v31, 0.0  ;;  %v2084_v32 = vmul.f32 0.1, %v2051_v31  ;;  %v2099_v62 = vsel %vm2067_vm6, %v2049_v56, %v2083_v5  ;;  %v4663_v1 = vpack.i.bf16 %v2090_v11, %v2089_v54 }
 0x730   : > { %4644 = vrot.lane.b32.xlu1 %v4643_v29, %s5177_s9  ;;  %v2086_v25 = vsel %vm2054_vm2, %v6369_v26, %v2070_v40  ;;  %v2072_v20 = vmul.f32 0.1, %v2021_v13  ;;  %v2092_v47 = vsel %vm2060_vm3, %v2031_v27, %v2076_v24  ;;  %vm2056_vm6 = vcmp.ge.f32.partialorder %v2021_v13, 0.0 }
 0x731   : > { %v2100_v23 = vsel %vm2068_vm7, %v2051_v31, %v2084_v32  ;;  %v2071_v16 = vmul.f32 0.1, %v2019_v43  ;;  %v2091_v6 = vsel %vm2059_vm5, %v2029_v57, %v2075_v52  ;;  %v4673_v63 = vpack.i.bf16 %v2086_v25, %v2085_v55 }
 0x732   : > { %v4653_v14 = vpack.i.bf16 %v2100_v23, %v2099_v62  ;;  %vm2055_vm7 = vcmp.ge.f32.partialorder %v2019_v43, 0.0  ;;  %v4668_v9 = vpack.i.bf16 %v2092_v47, %v2091_v6  ;;  %v2088_v56 = vsel %vm2056_vm6, %v2021_v13, %v2072_v20 }
 0x733   : > { %v2087_v26 = vsel %vm2055_vm7, %v2019_v43, %v2071_v16  ;;  %vm2660_vm14 = vcmask 1014784  }
 0x734   : > { %4649 = vrot.lane.b32.xlu1 %v4648_v44, %s5177_s9  ;;  %4654 = vrot.lane.b32.xlu0 %v4653_v14, %s5177_s9  ;;  %v4678_v40 = vpack.i.bf16 %v2088_v56, %v2087_v26 }
 0x738   : > { %4664 = vrot.lane.b32.xlu1 %v4663_v1, %s5177_s9  ;;  %4659 = vrot.lane.b32.xlu0 %v4658_v10, %s5177_s9 }
 0x73c   : > { %4674 = vrot.lane.b32.xlu1 %v4673_v63, %s5177_s9  ;;  %4669 = vrot.lane.b32.xlu0 %v4668_v9, %s5177_s9 }
 0x740   : > { %4679 = vrot.lane.b32.xlu0 %v4678_v40, %s5177_s9 }
 0x7a2   : > { %v4645_v15 = vpop.permute.xlu1 %4644 }
 0x7a3   : > { %v4647_v30 = vunpack.i.h.bf16 %v4645_v15  ;;  %v4646_v36 = vunpack.i.l.bf16 %v4645_v15 }
 0x7a5   : > { %v2156_v22 = vsel %vm2149_vm11, %v4646_v36, %v4647_v30  ;;  %v6392_v60 = vsel %vm5340_vm9, %v4646_v36, 0.0 }
 0x7a6   : > { %v6396_v34 = vsel %vm5365_vm10, %v2156_v22, 0.0  ;;  %v4650_v37 = vpop.permute.xlu1 %4649  ;;  %v4655_v53 = vpop.permute.xlu0 %4654 }
 0x7a7   : > { %v4652_v5 = vunpack.i.h.bf16 %v4650_v37  ;;  %v4651_v31 = vunpack.i.l.bf16 %v4650_v37  ;;  %v4657_v27 = vunpack.i.h.bf16 %v4655_v53  ;;  %v4656_v29 = vunpack.i.l.bf16 %v4655_v53 }
 0x7a8   : > { %v4683_v50 = vpack.i.bf16 %v6396_v34, %v6392_v60 }
 0x7a9   : > { %v2154_v41 = vsel %vm2149_vm11, %v4651_v31, %v4652_v5  ;;  %v6403_v32 = vsel %vm5340_vm9, %v4651_v31, 0.0  ;;  %v2157_v0 = vsel %vm2149_vm11, %v4656_v29, %v4657_v27  ;;  %v6408_v57 = vsel %vm5340_vm9, %v4656_v29, 0.0 }
 0x7aa   : > { %v6412_v58 = vsel %vm5365_vm10, %v2154_v41, 0.0  ;;  %v6416_v21 = vsel %vm5365_vm10, %v2157_v0, 0.0  ;;  %4684 = vrot.lane.b32.xlu1 %v4683_v50, %s5170_s28  ;;  %v4665_v62 = vpop.permute.xlu1 %4664  ;;  %v4660_v23 = vpop.permute.xlu0 %4659  ;;  %v2324_v3 = vpack.c.bf16 %v6408_v57, %v6392_v60 }
 0x7ab   : > { %v4667_v44 = vunpack.i.h.bf16 %v4665_v62  ;;  %v4666_v14 = vunpack.i.l.bf16 %v4665_v62  ;;  %v4662_v13 = vunpack.i.h.bf16 %v4660_v23  ;;  %v4661_v11 = vunpack.i.l.bf16 %v4660_v23 }
 0x7ac   : > { %v4688_v24 = vpack.i.bf16 %v6412_v58, %v6403_v32  ;;  %v4693_v39 = vpack.i.bf16 %v6416_v21, %v6408_v57  ;;  %v2325_v20 = vpack.c.bf16 %v6416_v21, %v6396_v34 }
 0x7ad   : > { %v2152_v59 = vsel %vm2149_vm11, %v4666_v14, %v4667_v44  ;;  %v6428_v43 = vsel %vm5340_vm9, %v4666_v14, 0.0  ;;  %v2155_v54 = vsel %vm2149_vm11, %v4661_v11, %v4662_v13  ;;  %v6433_v52 = vsel %vm5340_vm9, %v4661_v11, 0.0 }
 0x7ae   : > { %v6437_v17 = vsel %vm5365_vm10, %v2152_v59, 0.0  ;;  %v6441_v1 = vsel %vm5365_vm10, %v2155_v54, 0.0  ;;  %4689 = vrot.lane.b32.xlu1 %v4688_v24, %s5170_s28  ;;  %4694 = vrot.lane.b32.xlu0 %v4693_v39, %s5170_s28  ;;  %v4675_v10 = vpop.permute.xlu1 %4674  ;;  %v4670_v25 = vpop.permute.xlu0 %4669  ;;  %v2322_v47 = vpack.c.bf16 %v6433_v52, %v6403_v32 }
 0x7af   : > { %v4677_v55 = vunpack.i.h.bf16 %v4675_v10  ;;  %v4676_v16 = vunpack.i.l.bf16 %v4675_v10  ;;  %v4672_v6 = vunpack.i.h.bf16 %v4670_v25  ;;  %v4671_v63 = vunpack.i.l.bf16 %v4670_v25 }
 0x7b0   : > { %v4703_v9 = vpack.i.bf16 %v6437_v17, %v6428_v43  ;;  %v4698_v56 = vpack.i.bf16 %v6441_v1, %v6433_v52  ;;  %v2323_v53 = vpack.c.bf16 %v6441_v1, %v6412_v58 }
 0x7b1   : > { %v2150_v26 = vsel %vm2149_vm11, %v4676_v16, %v4677_v55  ;;  %v6456_v40 = vsel %vm5340_vm9, %v4676_v16, 0.0  ;;  %v2153_v15 = vsel %vm2149_vm11, %v4671_v63, %v4672_v6  ;;  %v6461_v30 = vsel %vm5340_vm9, %v4671_v63, 0.0 }
 0x7b2   : > { %v6465_v36 = vsel %vm5365_vm10, %v2150_v26, 0.0  ;;  %v6469_v22 = vsel %vm5365_vm10, %v2153_v15, 0.0  ;;  %4704 = vrot.lane.b32.xlu1 %v4703_v9, %s5170_s28  ;;  %4699 = vrot.lane.b32.xlu0 %v4698_v56, %s5170_s28  ;;  %v4680_v37 = vpop.permute.xlu0 %4679  ;;  %v2320_v5 = vpack.c.bf16 %v6461_v30, %v6428_v43 }
 0x7b3   : > { %v4682_v31 = vunpack.i.h.bf16 %v4680_v37  ;;  %v4681_v27 = vunpack.i.l.bf16 %v4680_v37  ;;  %v4713_v29 = vpack.i.bf16 %v6465_v36, %v6456_v40  ;;  %v4708_v41 = vpack.i.bf16 %v6469_v22, %v6461_v30 }
 0x7b4   : > { %v2321_v0 = vpack.c.bf16 %v6469_v22, %v6437_v17 }
 0x7b5   : > { %v2151_v62 = vsel %vm2149_vm11, %v4681_v27, %v4682_v31  ;;  %v6486_v23 = vsel %vm5340_vm9, %v4681_v27, 0.0 }
 0x7b6   : > { %v6490_v44 = vsel %vm5365_vm10, %v2151_v62, 0.0  ;;  %4714 = vrot.lane.b32.xlu1 %v4713_v29, %s5170_s28  ;;  %4709 = vrot.lane.b32.xlu0 %v4708_v41, %s5170_s28  ;;  %v2318_v14 = vpack.c.bf16 %v6486_v23, %v6456_v40  ;;  %v5041_v40 = vld [vmem:[%s7420_s2 + $0xc4] ss:$8 sps:$4 sm:$0xff]  }
 0x7b7   : > { %v4718_v13 = vpack.i.bf16 %v6490_v44, %v6486_v23  ;;  %v2319_v11 = vpack.c.bf16 %v6490_v44, %v6465_v36  ;;  %4165 = vmatprep.mubr.msk.bf16.mxu1 %vm723_vm0, %v5041_v40 }
 0x7ba   : > { %4724 = vrot.lane.b32.xlu1 %v4683_v50, %s7428_s7  ;;  %4719 = vrot.lane.b32.xlu0 %v4718_v13, %s5170_s28 }
 0x7be   : > { %4729 = vrot.lane.b32.xlu1 %v4688_v24, %s7428_s7  ;;  %4734 = vrot.lane.b32.xlu0 %v4693_v39, %s7428_s7 }
 0x7c2   : > { %4744 = vrot.lane.b32.xlu1 %v4703_v9, %s7428_s7  ;;  %4739 = vrot.lane.b32.xlu0 %v4698_v56, %s7428_s7 }
 0x7c6   : > { %4754 = vrot.lane.b32.xlu1 %v4713_v29, %s7428_s7  ;;  %4749 = vrot.lane.b32.xlu0 %v4708_v41, %s7428_s7 }
 0x7ca   : > { %4759 = vrot.lane.b32.xlu0 %v4718_v13, %s7428_s7 }
 0x81c   : > { %v4685_v59 = vpop.permute.xlu1 %4684 }
 0x81d   : > { %v4687_v54 = vunpack.i.h.bf16 %v4685_v59  ;;  %v4686_v10 = vunpack.i.l.bf16 %v4685_v59 }
 0x81f   : > { %v2244_v24 = vsel %vm541_vm8, %v4686_v10, %v4687_v54 }
 0x820   : > { %v4690_v50 = vpop.permute.xlu1 %4689  ;;  %v4695_v25 = vpop.permute.xlu0 %4694 }
 0x821   : > { %v4697_v55 = vunpack.i.h.bf16 %v4695_v25  ;;  %v4696_v16 = vunpack.i.l.bf16 %v4695_v25  ;;  %v4692_v39 = vunpack.i.h.bf16 %v4690_v50  ;;  %v4691_v6 = vunpack.i.l.bf16 %v4690_v50 }
 0x823   : > { %v2333_v63 = vpack.c.bf16 %v4697_v55, %v4687_v54  ;;  %v2245_v9 = vsel %vm541_vm8, %v4696_v16, %v4697_v55  ;;  %v2242_v41 = vsel %vm541_vm8, %v4691_v6, %v4692_v39 }
 0x824   : > { %v4705_v56 = vpop.permute.xlu1 %4704  ;;  %v4700_v26 = vpop.permute.xlu0 %4699  ;;  %v2332_v15 = vpack.c.bf16 %v2245_v9, %v2244_v24 }
 0x825   : > { %v4702_v37 = vunpack.i.h.bf16 %v4700_v26  ;;  %v4701_v31 = vunpack.i.l.bf16 %v4700_v26  ;;  %2472 = vrot.lane.b32.xlu0 %v2333_v63, %s5178_s10  ;;  %v4707_v27 = vunpack.i.h.bf16 %v4705_v56  ;;  %v4706_v29 = vunpack.i.l.bf16 %v4705_v56 }
 0x826   : > { %2470 = vrot.lane.b32.xlu1 %v2332_v15, %s5178_s10 }
 0x827   : > { %v2331_v62 = vpack.c.bf16 %v4702_v37, %v4692_v39  ;;  %v2243_v13 = vsel %vm541_vm8, %v4701_v31, %v4702_v37  ;;  %v2240_v55 = vsel %vm541_vm8, %v4706_v29, %v4707_v27 }
 0x828   : > { %v4715_v59 = vpop.permute.xlu1 %4714  ;;  %v4710_v54 = vpop.permute.xlu0 %4709  ;;  %v2330_v10 = vpack.c.bf16 %v2243_v13, %v2242_v41 }
 0x829   : > { %v4712_v50 = vunpack.i.h.bf16 %v4710_v54  ;;  %v4711_v25 = vunpack.i.l.bf16 %v4710_v54  ;;  %2468 = vrot.lane.b32.xlu0 %v2331_v62, %s5178_s10  ;;  %v4717_v16 = vunpack.i.h.bf16 %v4715_v59  ;;  %v4716_v24 = vunpack.i.l.bf16 %v4715_v59 }
 0x82a   : > { %2466 = vrot.lane.b32.xlu1 %v2330_v10, %s5178_s10 }
 0x82b   : > { %v2329_v63 = vpack.c.bf16 %v4712_v50, %v4707_v27  ;;  %v2241_v9 = vsel %vm541_vm8, %v4711_v25, %v4712_v50  ;;  %v2238_v15 = vsel %vm541_vm8, %v4716_v24, %v4717_v16 }
 0x82c   : > { %v4720_v6 = vpop.permute.xlu0 %4719  ;;  %v2328_v39 = vpack.c.bf16 %v2241_v9, %v2240_v55  ;;  %v4725_v41 = vpop.permute.xlu1 %4724 }
 0x82d   : > { %v4722_v56 = vunpack.i.h.bf16 %v4720_v6  ;;  %v4721_v26 = vunpack.i.l.bf16 %v4720_v6  ;;  %2464 = vrot.lane.b32.xlu0 %v2329_v63, %s5178_s10  ;;  %v4727_v60 = vunpack.i.h.bf16 %v4725_v41  ;;  %v4726_v57 = vunpack.i.l.bf16 %v4725_v41 }
 0x82e   : > { %2462 = vrot.lane.b32.xlu1 %v2328_v39, %s5178_s10 }
 0x82f   : > { %v2327_v37 = vpack.c.bf16 %v4722_v56, %v4717_v16  ;;  %v2239_v31 = vsel %vm541_vm8, %v4721_v26, %v4722_v56  ;;  %v2300_v43 = vsel %vm598_vm13, %v4726_v57, %v4727_v60  ;;  %v4144_v26 = vld [vmem:[%s7421_s3 + $0xf8] sm:$0xff] }
 0x830   : > { %v2326_v29 = vpack.c.bf16 %v2239_v31, %v2238_v15  ;;  %v4735_v27 = vpop.permute.xlu0 %4734  ;;  %v4730_v13 = vpop.permute.xlu1 %4729  ;;  %v4143_v15 = vld [vmem:[%s7421_s3 + $0xf0] sm:$0xff]  ;;  %v4141_v31 = vld [vmem:[%s7421_s3 + $0xe0] sm:$0xff] }
 0x831   : > { %2460 = vrot.lane.b32.xlu0 %v2327_v37, %s5178_s10  ;;  %v4737_v34 = vunpack.i.h.bf16 %v4735_v27  ;;  %v4736_v21 = vunpack.i.l.bf16 %v4735_v27  ;;  %v4732_v17 = vunpack.i.h.bf16 %v4730_v13  ;;  %v4142_v37 = vld [vmem:[%s7421_s3 + $0xe8] sm:$0xff]  ;;  %v4139_v27 = vld [vmem:[%s7421_s3 + $0xd0] sm:$0xff] }
 0x832   : > { %2458 = vrot.lane.b32.xlu1 %v2326_v29, %s5178_s10  ;;  %v4140_v29 = vld [vmem:[%s7421_s3 + $0xd8] sm:$0xff] }
 0x834   : > { %v4740_v62 = vpop.permute.xlu0 %4739  ;;  %v4745_v1 = vpop.permute.xlu1 %4744 }
 0x835   : > { %2456 = vrot.lane.b32.xlu0 %v2325_v20, %s5178_s10  ;;  %v4742_v32 = vunpack.i.h.bf16 %v4740_v62  ;;  %v4741_v52 = vunpack.i.l.bf16 %v4740_v62  ;;  %v4731_v20 = vunpack.i.l.bf16 %v4730_v13  ;;  %v4747_v23 = vunpack.i.h.bf16 %v4745_v1 }
 0x836   : > { %2454 = vrot.lane.b32.xlu1 %v2324_v3, %s5178_s10  ;;  %v2301_v3 = vsel %vm598_vm13, %v4736_v21, %v4737_v34  ;;  %v4746_v44 = vunpack.i.l.bf16 %v4745_v1 }
 0x837   : > { %v2340_v30 = vpack.c.bf16 %v2301_v3, %v2300_v43  ;;  %v2299_v22 = vsel %vm598_vm13, %v4741_v52, %v4742_v32 }
 0x838   : > { %v4750_v58 = vpop.permute.xlu0 %4749  ;;  %v2296_v25 = vsel %vm598_vm13, %v4746_v44, %v4747_v23  ;;  %v7441_v44 = vmov 0  }
 0x839   : > { %2452 = vrot.lane.b32.xlu0 %v2323_v53, %s5178_s10  ;;  %v4752_v53 = vunpack.i.h.bf16 %v4750_v58 }
 0x83a   : > { %2450 = vrot.lane.b32.xlu1 %v2322_v47, %s5178_s10  ;;  %v2341_v47 = vpack.c.bf16 %v4737_v34, %v4727_v60 }
 0x83b   : > { %v2337_v24 = vpack.c.bf16 %v4752_v53, %v4747_v23  ;;  %v5042_v23 = vld [vmem:[%s7420_s2 + $0xd4] ss:$8 sps:$4 sm:$0xff]  }
 0x83c   : > { %v4760_v36 = vpop.permute.xlu0 %4759 }
 0x83d   : > { %2448 = vrot.lane.b32.xlu0 %v2321_v0, %s5178_s10  ;;  %v2298_v0 = vsel %vm598_vm13, %v4731_v20, %v4732_v17  ;;  %v4762_v10 = vunpack.i.h.bf16 %v4760_v36  ;;  %v4761_v50 = vunpack.i.l.bf16 %v4760_v36 }
 0x83e   : > { %2446 = vrot.lane.b32.xlu1 %v2320_v5, %s5178_s10  ;;  %v4751_v5 = vunpack.i.l.bf16 %v4750_v58  ;;  %v2338_v59 = vpack.c.bf16 %v2299_v22, %v2298_v0  ;;  %v5039_v0 = vld [vmem:[%s7420_s2 + $0xc0] ss:$8 sps:$4 sm:$0xff]  }
 0x83f   : > { %v2295_v9 = vsel %vm598_vm13, %v4761_v50, %v4762_v10 }
 0x840   : > { %v2297_v54 = vsel %vm598_vm13, %v4751_v5, %v4752_v53 }
 0x841   : > { %2444 = vrot.lane.b32.xlu0 %v2319_v11, %s5178_s10  ;;  %v4755_v11 = vpop.permute.xlu1 %4754  ;;  %v2336_v63 = vpack.c.bf16 %v2297_v54, %v2296_v25  ;;  %v5048_v54 = vld [vmem:[%s7420_s2 + $0xf4] ss:$8 sps:$4 sm:$0xff]  }
 0x842   : > { %2442 = vrot.lane.b32.xlu1 %v2318_v14, %s5178_s10  ;;  %v2339_v14 = vpack.c.bf16 %v4742_v32, %v4732_v17  ;;  %v4757_v55 = vunpack.i.h.bf16 %v4755_v11  ;;  %v4756_v16 = vunpack.i.l.bf16 %v4755_v11  ;;  %v5045_v11 = vld [vmem:[%s7420_s2 + $0xe4] ss:$8 sps:$4 sm:$0xff]  }
 0x844   : > { %v2294_v6 = vsel %vm598_vm13, %v4756_v16, %v4757_v55  ;;  %v2335_v39 = vpack.c.bf16 %v4762_v10, %v4757_v55  ;;  %v5050_v10 = vld [vmem:[%s7420_s2 + $0xf0] ss:$8 sps:$4 sm:$0xff]  }
 0x845   : > { %2488 = vrot.lane.b32.xlu0 %v2341_v47, %s5178_s10  ;;  %v2334_v56 = vpack.c.bf16 %v2295_v9, %v2294_v6 }
 0x846   : > { %2486 = vrot.lane.b32.xlu1 %v2340_v30, %s5178_s10 }
 0x849   : > { %2484 = vrot.lane.b32.xlu0 %v2339_v14, %s5178_s10  ;;  %v5044_v14 = vld [vmem:[%s7420_s2 + $0xd0] ss:$8 sps:$4 sm:$0xff]  }
 0x84a   : > { %2482 = vrot.lane.b32.xlu1 %v2338_v59, %s5178_s10  ;;  %v5047_v59 = vld [vmem:[%s7420_s2 + $0xe0] ss:$8 sps:$4 sm:$0xff]  }
 0x84d   : > { %2480 = vrot.lane.b32.xlu0 %v2337_v24, %s5178_s10 }
 0x84e   : > { %2478 = vrot.lane.b32.xlu1 %v2336_v63, %s5178_s10 }
 0x851   : > { %2476 = vrot.lane.b32.xlu0 %v2335_v39, %s5178_s10 }
 0x852   : > { %2474 = vrot.lane.b32.xlu1 %v2334_v56, %s5178_s10 }
 0x855   : > { %2379 = vperm.xlu0 %4401, %v4144_v26  }
 0x856   : > { %2374 = vperm.xlu1 %4402, %v4143_v15  }
 0x859   : > { %2369 = vperm.xlu0 %4401, %v4142_v37  }
 0x85a   : > { %2364 = vperm.xlu1 %4402, %v4141_v31  }
 0x85d   : > { %2654 = vrot.lane.b32.xlu0 %v6033_v4, %s5179_s12  ;;  %v4137_v4 = vld [vmem:[%s7421_s3 + $0xc0] sm:$0xff] }
 0x85e   : > { %2652 = vrot.lane.b32.xlu1 %v6024_v33, %s5179_s12  ;;  %v4138_v33 = vld [vmem:[%s7421_s3 + $0xc8] sm:$0xff] }
 0x861   : > { %2658 = vrot.lane.b32.xlu0 %v6052_v28, %s5179_s12 }
 0x862   : > { %2656 = vrot.lane.b32.xlu1 %v6042_v18, %s5179_s12 }
 0x865   : > { %2359 = vperm.xlu0 %4401, %v4140_v29  }
 0x866   : > { %2354 = vperm.xlu1 %4402, %v4139_v27  }
 0x869   : > { %2646 = vrot.lane.b32.xlu0 %v6019_v19, %s5179_s12 }
 0x86a   : > { %2644 = vrot.lane.b32.xlu1 %v6030_v51, %s5179_s12 }
 0x86d   : > { %2650 = vrot.lane.b32.xlu0 %v6037_v8, %s5179_s12 }
 0x86e   : > { %2648 = vrot.lane.b32.xlu1 %v6048_v12, %s5179_s12 }
 0x871   : > { %2349 = vperm.xlu0 %4401, %v4138_v33  }
 0x872   : > { %2344 = vperm.xlu1 %4402, %v4137_v4  }
 0x875   : > { %2638 = vrot.lane.b32.xlu0 %v6028_v7, %s5179_s12 }
 0x876   : > { %2636 = vrot.lane.b32.xlu1 %v6026_v49, %s5179_s12 }
 0x879   : > { %2642 = vrot.lane.b32.xlu0 %v6056_v42, %s5179_s12 }
 0x87a   : > { %2640 = vrot.lane.b32.xlu1 %v6066_v61, %s5179_s12 }
 0x87d   : > { %2630 = vrot.lane.b32.xlu0 %v6009_v35, %s5179_s12 }
 0x87e   : > { %2628 = vrot.lane.b32.xlu1 %v6015_v2, %s5179_s12 }
 0x881   : > { %2634 = vrot.lane.b32.xlu0 %v6078_v48, %s5179_s12 }
 0x882   : > { %2632 = vrot.lane.b32.xlu1 %v6092_v45, %s5179_s12  ;;  %s5182_s12 = smov 11  }
 0x897   : > { %v2473_v19 = vpop.permute.xlu0 %2472 }
 0x898   : > { %2539 = vmatprep.subr.bf16.mxu1 %v2473_v19  ;;  %v2471_v51 = vpop.permute.xlu1 %2470 }
 0x899   : > { %v2498_v7 = vsel %vm2490_vm12, %v2471_v51, %v2473_v19 }
 0x89a   : > { %2540 = vmatpush1.bf16.msra.mxu1 %v2498_v7 }
 0x89b   : > { %v2469_v49 = vpop.permute.xlu0 %2468 }
 0x89c   : > { %2541 = vmatprep.subr.bf16.mxu1 %v2469_v49  ;;  %v2467_v8 = vpop.permute.xlu1 %2466 }
 0x89d   : > { %v2497_v18 = vsel %vm2490_vm12, %v2467_v8, %v2469_v49 }
 0x89e   : > { %2542 = vmatpush1.bf16.msra.mxu1 %v2497_v18 }
 0x89f   : > { %v2465_v35 = vpop.permute.xlu0 %2464 }
 0x8a0   : > { %2543 = vmatprep.subr.bf16.mxu1 %v2465_v35  ;;  %v2463_v2 = vpop.permute.xlu1 %2462 }
 0x8a1   : > { %v2496_v12 = vsel %vm2490_vm12, %v2463_v2, %v2465_v35 }
 0x8a2   : > { %2544 = vmatpush1.bf16.msra.mxu1 %v2496_v12 }
 0x8a3   : > { %v2461_v28 = vpop.permute.xlu0 %2460 }
 0x8a4   : > { %2545 = vmatprep.subr.bf16.mxu1 %v2461_v28  ;;  %v2459_v42 = vpop.permute.xlu1 %2458 }
 0x8a5   : > { %v2495_v61 = vsel %vm2490_vm12, %v2459_v42, %v2461_v28 }
 0x8a6   : > { %2546 = vmatpush1.bf16.msra.mxu1 %v2495_v61 }
 0x8a7   : > { %v2457_v48 = vpop.permute.xlu0 %2456 }
 0x8a8   : > { %v2455_v45 = vpop.permute.xlu1 %2454  ;;  %2547 = vmatprep.subr.bf16.mxu1 %v2457_v48 }
 0x8a9   : > { %v2494_v41 = vsel %vm2490_vm12, %v2455_v45, %v2457_v48 }
 0x8aa   : > { %2548 = vmatpush1.bf16.msra.mxu1 %v2494_v41 }
 0x8ab   : > { %v2453_v62 = vpop.permute.xlu0 %2452 }
 0x8ac   : > { %v2451_v13 = vpop.permute.xlu1 %2450  ;;  %2549 = vmatprep.subr.bf16.mxu1 %v2453_v62 }
 0x8ad   : > { %v2493_v34 = vsel %vm2490_vm12, %v2451_v13, %v2453_v62 }
 0x8ae   : > { %2550 = vmatpush1.bf16.msra.mxu1 %v2493_v34 }
 0x8af   : > { %v2449_v21 = vpop.permute.xlu0 %2448 }
 0x8b0   : > { %v2447_v60 = vpop.permute.xlu1 %2446  ;;  %2551 = vmatprep.subr.bf16.mxu1 %v2449_v21 }
 0x8b1   : > { %v2492_v57 = vsel %vm2490_vm12, %v2447_v60, %v2449_v21 }
 0x8b2   : > { %2552 = vmatpush1.bf16.msra.mxu1 %v2492_v57 }
 0x8b3   : > { %v2445_v58 = vpop.permute.xlu0 %2444 }
 0x8b4   : > { %v2443_v3 = vpop.permute.xlu1 %2442  ;;  %2553 = vmatprep.subr.bf16.mxu1 %v2445_v58 }
 0x8b5   : > { %v2491_v32 = vsel %vm2490_vm12, %v2443_v3, %v2445_v58 }
 0x8b6   : > { %2554 = vmatpush1.bf16.msra.mxu1 %v2491_v32 }
 0x8b7   : > { %v2489_v52 = vpop.permute.xlu0 %2488 }
 0x8b8   : > { %v2487_v1 = vpop.permute.xlu1 %2486  ;;  %2563 = vmatprep.subr.bf16.mxu1 %v2489_v52 }
 0x8b9   : > { %v2502_v43 = vsel %vm2490_vm12, %v2487_v1, %v2489_v52 }
 0x8ba   : > { %2564 = vmatpush2.bf16.msra.mxu1 %v2502_v43 }
 0x8bb   : > { %v2485_v17 = vpop.permute.xlu0 %2484 }
 0x8bc   : > { %v2483_v20 = vpop.permute.xlu1 %2482  ;;  %2565 = vmatprep.subr.bf16.mxu1 %v2485_v17 }
 0x8bd   : > { %v2501_v47 = vsel %vm2490_vm12, %v2483_v20, %v2485_v17 }
 0x8be   : > { %2566 = vmatpush2.bf16.msra.mxu1 %v2501_v47 }
 0x8bf   : > { %v2481_v30 = vpop.permute.xlu0 %2480 }
 0x8c0   : > { %v2479_v22 = vpop.permute.xlu1 %2478  ;;  %2567 = vmatprep.subr.bf16.mxu1 %v2481_v30 }
 0x8c1   : > { %v2500_v53 = vsel %vm2490_vm12, %v2479_v22, %v2481_v30 }
 0x8c2   : > { %2568 = vmatpush2.bf16.msra.mxu1 %v2500_v53 }
 0x8c3   : > { %v2477_v5 = vpop.permute.xlu0 %2476 }
 0x8c4   : > { %v2475_v36 = vpop.permute.xlu1 %2474  ;;  %2569 = vmatprep.subr.bf16.mxu1 %v2477_v5 }
 0x8c5   : > { %v2499_v40 = vsel %vm2490_vm12, %v2475_v36, %v2477_v5 }
 0x8c6   : > { %2570 = vmatpush2.bf16.msra.mxu1 %v2499_v40 }
 0x8c7   : > { %3772 = vmatprep.subr.bf16.mxu1 %v7441_v44 }
 0x8c9   : > { %2572 = vmatmul.mubr.bf16.vlgmr.msra.gmra.mxu1 %v5039_v0 }
 0x8ca   : > { %4166 = vmatprep.mubr.msk.bf16.mxu1 %vm723_vm0, %v5042_v23 }
 0x8d0   : > { %v6654_v50 = vpop.permute.xlu0 %2379 }
 0x8d1   : > { %2582 = vmatmul.mubr.bf16.gmra.mxu1 %v5044_v14  ;;  %v2375_v25 = vpop.permute.xlu1 %2374 }
 0x8d2   : > { %4167 = vmatprep.mubr.msk.bf16.mxu1 %vm723_vm0, %v5045_v11 }
 0x8d4   : > { %v2370_v55 = vpop.permute.xlu0 %2369 }
 0x8d5   : > { %v2365_v16 = vpop.permute.xlu1 %2364 }
 0x8d8   : > { %v6656_v24 = vpop.permute.xlu0 %2654 }
 0x8d9   : > { %2592 = vmatmul.mubr.bf16.gmra.mxu1 %v5047_v59  ;;  %v2653_v63 = vpop.permute.xlu1 %2652 }
 0x8da   : > { %4168 = vmatprep.mubr.msk.bf16.mxu1 %vm723_vm0, %v5048_v54  ;;  %v2667_v60 = vsel %vm2660_vm14, %v2653_v63, %v6656_v24 }
 0x8dc   : > { %v6658_v9 = vpop.permute.xlu0 %2658 }
 0x8dd   : > { %v2657_v6 = vpop.permute.xlu1 %2656 }
 0x8de   : > { %v2668_v57 = vsel %vm2660_vm14, %v2657_v6, %v6658_v9 }
 0x8e0   : > { %v2360_v39 = vpop.permute.xlu0 %2359 }
 0x8e1   : > { %2602 = vmatmul.mubr.bf16.gmra.mxu1 %v5050_v10  ;;  %v2355_v56 = vpop.permute.xlu1 %2354 }
 0x8e4   : > { %v2647_v26 = vpop.permute.xlu0 %2646 }
 0x8e5   : > { %v2645_v15 = vpop.permute.xlu1 %2644 }
 0x8e6   : > { %v2665_v58 = vsel %vm2660_vm14, %v2645_v15, %v2647_v26 }
 0x8e8   : > { %v2651_v37 = vpop.permute.xlu0 %2650 }
 0x8e9   : > { %v2649_v31 = vpop.permute.xlu1 %2648 }
 0x8ea   : > { %v2666_v32 = vsel %vm2660_vm14, %v2649_v31, %v2651_v37 }
 0x8ec   : > { %v2350_v33 = vpop.permute.xlu0 %2349 }
 0x8ed   : > { %v2345_v4 = vpop.permute.xlu1 %2344 }
 0x8f0   : > { %v2639_v49 = vpop.permute.xlu0 %2638 }
 0x8f1   : > { %v2637_v8 = vpop.permute.xlu1 %2636 }
 0x8f2   : > { %v2663_v20 = vsel %vm2660_vm14, %v2637_v8, %v2639_v49 }
 0x8f4   : > { %v2643_v12 = vpop.permute.xlu0 %2642 }
 0x8f5   : > { %v2641_v28 = vpop.permute.xlu1 %2640 }
 0x8f6   : > { %v2664_v47 = vsel %vm2660_vm14, %v2641_v28, %v2643_v12 }
 0x8f8   : > { %v2631_v41 = vpop.permute.xlu0 %2630 }
 0x8f9   : > { %v2629_v62 = vpop.permute.xlu1 %2628 }
 0x8fa   : > { %v2661_v30 = vsel %vm2660_vm14, %v2629_v62, %v2631_v41 }
 0x989   : > { %v2573_v29 = vpop.f32.mrf.mxu1 }
 0x98a   : > { %v2574_v13 = vadd.f32 %v2573_v29, %v2345_v4 }
 0x98b   : > { %v2575_v27 = vpop.f32.mrf.mxu1 }
 0x98c   : > { %v2576_v48 = vadd.f32 %v2575_v27, %v2345_v4  ;;  %v6671_v53 = vadd.f32 %v2661_v30, %v2574_v13 }
 0x98d   : > { %v2577_v19 = vpop.f32.mrf.mxu1 }
 0x98e   : > { %v6665_v3 = vadd.f32 %v2631_v41, %v2576_v48  ;;  %v6673_v5 = vadd.f32 %v2577_v19, %v2350_v33 }
 0x98f   : > { %v2579_v51 = vpop.f32.mrf.mxu1 }
 0x990   : > { %v6678_v23 = vmul.f32 0.1, %v6665_v3  ;;  %v2580_v14 = vadd.f32 %v2579_v51, %v2350_v33 }
 0x991   : > { %v2583_v7 = vpop.f32.mrf.mxu1 }
 0x992   : > { %v2584_v52 = vadd.f32 %v2583_v7, %v2355_v56 }
 0x993   : > { %v2585_v18 = vpop.f32.mrf.mxu1 }
 0x994   : > { %v2586_v1 = vadd.f32 %v2585_v18, %v2355_v56  ;;  %v6682_v54 = vadd.f32 %v2663_v20, %v2584_v52  ;;  %v2753_v52 = vmul.f32 0.1, %v6671_v53 }
 0x995   : > { %v2587_v35 = vpop.f32.mrf.mxu1 }
 0x996   : > { %v6684_v10 = vadd.f32 %v2639_v49, %v2586_v1  ;;  %v2588_v56 = vadd.f32 %v2587_v35, %v2360_v39  ;;  %v2757_v28 = vmul.f32 0.1, %v6682_v54 }
 0x997   : > { %v2589_v2 = vpop.f32.mrf.mxu1 }
 0x998   : > { %v2590_v29 = vadd.f32 %v2589_v2, %v2360_v39  ;;  %vm2742_vm7 = vcmp.ge.f32.partialorder %v6684_v10, 0.0 }
 0x999   : > { %v2593_v42 = vpop.f32.mrf.mxu1 }
 0x99a   : > { %v2594_v43 = vadd.f32 %v2593_v42, %v2365_v16  ;;  %v6713_v18 = vadd.f32 %v2643_v12, %v2590_v29  ;;  %v6723_v42 = vadd.f32 %v2664_v47, %v2588_v56  ;;  %v2635_v12 = vpop.permute.xlu0 %2634 }
 0x99b   : > { %v2595_v61 = vpop.f32.mrf.mxu1 }
 0x99c   : > { %v2596_v34 = vadd.f32 %v2595_v61, %v2365_v16  ;;  %v6686_v16 = vadd.f32 %v2665_v58, %v2594_v43  ;;  %v2633_v61 = vpop.permute.xlu1 %2632  ;;  %v2759_v43 = vmul.f32 0.1, %v6723_v42 }
 0x99d   : > { %v2597_v45 = vpop.f32.mrf.mxu1 }
 0x99e   : > { %v6675_v36 = vadd.f32 %v2647_v26, %v2596_v34  ;;  %v2598_v63 = vadd.f32 %v2597_v45, %v2370_v55  ;;  %v2761_v51 = vmul.f32 0.1, %v6686_v16  ;;  %vm2745_vm4 = vcmp.ge.f32.partialorder %v6686_v16, 0.0 }
 0x99f   : > { %v2599_v21 = vpop.f32.mrf.mxu1 }
 0x9a0   : > { %v2600_v40 = vadd.f32 %v2599_v21, %v2370_v55  ;;  %v2762_v27 = vmul.f32 0.1, %v6675_v36  ;;  %vm2746_vm3 = vcmp.ge.f32.partialorder %v6675_v36, 0.0  ;;  %v6705_v39 = vadd.f32 %v2666_v32, %v2598_v63 }
 0x9a1   : > { %v2603_v17 = vpop.f32.mrf.mxu1  ;;  %v2777_v62 = vsel %vm2745_vm4, %v6686_v16, %v2761_v51  ;;  %v6735_v21 = vadd.f32 %v2635_v12, %v2580_v14  ;;  %v2662_v32 = vsel %vm2660_vm14, %v2633_v61, %v2635_v12  ;;  %vm2744_vm4 = vcmp.ge.f32.partialorder %v6713_v18, 0.0 }
 0x9a2   : > { %v2604_v22 = vadd.f32 %v2603_v17, %v2375_v25  ;;  %v2763_v48 = vmul.f32 0.1, %v6705_v39  ;;  %v6749_v1 = vadd.f32 %v2662_v32, %v6673_v5  ;;  %vm2737_vm14 = vcmp.ge.f32.partialorder %v6671_v53, 0.0 }
 0x9a3   : > { %v2605_v0 = vpop.f32.mrf.mxu1 }
 0x9a4   : > { %v6680_v11 = vadd.f32 %v2667_v60, %v2604_v22  ;;  %v2606_v59 = vadd.f32 %v2605_v0, %v2375_v25  ;;  %v6694_v25 = vadd.f32 %v2651_v37, %v2600_v40  ;;  %v2760_v60 = vmul.f32 0.1, %v6713_v18 }
 0x9a5   : > { %v2607_v6 = vpop.f32.mrf.mxu1  ;;  %v2756_v22 = vmul.f32 0.1, %v6735_v21  ;;  %v2755_v0 = vmul.f32 0.1, %v6749_v1 }
 0x9a6   : > { %v2765_v26 = vmul.f32 0.1, %v6680_v11  ;;  %v6690_v15 = vadd.f32 %v6656_v24, %v2606_v59  ;;  %v2608_v31 = vadd.f32 %v2607_v6, %v6654_v50  ;;  %vm2749_vm15 = vcmp.ge.f32.partialorder %v6680_v11, 0.0 }
 0x9a7   : > { %v2609_v33 = vpop.f32.mrf.mxu1  ;;  %v2758_v24 = vmul.f32 0.1, %v6684_v10  ;;  %v2764_v35 = vmul.f32 0.1, %v6694_v25  ;;  %vm2748_vm11 = vcmp.ge.f32.partialorder %v6694_v25, 0.0  ;;  %v2776_v40 = vsel %vm2744_vm4, %v6713_v18, %v2760_v60 }
 0x9a8   : > { %vm2750_vm2 = vcmp.ge.f32.partialorder %v6690_v15, 0.0  ;;  %v2766_v55 = vmul.f32 0.1, %v6690_v15  ;;  %v6699_v4 = vadd.f32 %v2668_v57, %v2608_v31  ;;  %v2610_v19 = vadd.f32 %v2609_v33, %v6654_v50 }
 0x9a9   : > { %v2781_v49 = vsel %vm2749_vm15, %v6680_v11, %v2765_v26  ;;  %vm2741_vm15 = vcmp.ge.f32.partialorder %v6682_v54, 0.0  ;;  %v2780_v57 = vsel %vm2748_vm11, %v6694_v25, %v2764_v35  ;;  %v2774_v58 = vsel %vm2742_vm7, %v6684_v10, %v2758_v24 }
 0x9aa   : > { %v2767_v37 = vmul.f32 0.1, %v6699_v4  ;;  %v6709_v7 = vadd.f32 %v6658_v9, %v2610_v19  ;;  %v2782_v8 = vsel %vm2750_vm2, %v6690_v15, %v2766_v55  ;;  %vm2751_vm5 = vcmp.ge.f32.partialorder %v6699_v4, 0.0 }
 0x9ab   : > { %v4763_v50 = vpack.i.bf16 %v2782_v8, %v2781_v49  ;;  %v2778_v9 = vsel %vm2746_vm3, %v6675_v36, %v2762_v27  ;;  %vm2747_vm2 = vcmp.ge.f32.partialorder %v6705_v39, 0.0  ;;  %vm2738_vm3 = vcmp.ge.f32.partialorder %v6665_v3, 0.0 }
 0x9ac   : > { %vm2752_vm6 = vcmp.ge.f32.partialorder %v6709_v7, 0.0  ;;  %v2768_v2 = vmul.f32 0.1, %v6709_v7  ;;  %v2783_v45 = vsel %vm2751_vm5, %v6699_v4, %v2767_v37  ;;  %v4768_v34 = vpack.i.bf16 %v2778_v9, %v2777_v62 }
 0x9ad   : > { %4764 = vrot.lane.b32.xlu1 %v4763_v50, %s5180_s27  ;;  %v2779_v17 = vsel %vm2747_vm2, %v6705_v39, %v2763_v48  ;;  %v2773_v20 = vsel %vm2741_vm15, %v6682_v54, %v2757_v28  ;;  %vm2743_vm5 = vcmp.ge.f32.partialorder %v6723_v42, 0.0  ;;  %v2770_v5 = vsel %vm2738_vm3, %v6665_v3, %v6678_v23 }
 0x9ae   : > { %v2784_v41 = vsel %vm2752_vm6, %v6709_v7, %v2768_v2  ;;  %v4778_v47 = vpack.i.bf16 %v2780_v57, %v2779_v17  ;;  %v4783_v30 = vpack.i.bf16 %v2774_v58, %v2773_v20  ;;  %vm2740_vm6 = vcmp.ge.f32.partialorder %v6735_v21, 0.0 }
 0x9af   : > { %v4773_v13 = vpack.i.bf16 %v2784_v41, %v2783_v45  ;;  %v2775_v14 = vsel %vm2743_vm5, %v6723_v42, %v2759_v43  ;;  %v2769_v59 = vsel %vm2737_vm14, %v6671_v53, %v2753_v52  ;;  %vm2739_vm7 = vcmp.ge.f32.partialorder %v6749_v1, 0.0 }
 0x9b0   : > { %v4788_v63 = vpack.i.bf16 %v2776_v40, %v2775_v14  ;;  %v4793_v6 = vpack.i.bf16 %v2770_v5, %v2769_v59  ;;  %v2772_v56 = vsel %vm2740_vm6, %v6735_v21, %v2756_v22  ;;  %v2771_v23 = vsel %vm2739_vm7, %v6749_v1, %v2755_v0 }
 0x9b1   : > { %4774 = vrot.lane.b32.xlu0 %v4773_v13, %s5180_s27  ;;  %4769 = vrot.lane.b32.xlu1 %v4768_v34, %s5180_s27  ;;  %v4798_v26 = vpack.i.bf16 %v2772_v56, %v2771_v23  ;;  %vm2833_vm11 = vcmask 48128  }
 0x9b5   : > { %4779 = vrot.lane.b32.xlu0 %v4778_v47, %s5180_s27  ;;  %4784 = vrot.lane.b32.xlu1 %v4783_v30, %s5180_s27 }
 0x9b9   : > { %4789 = vrot.lane.b32.xlu0 %v4788_v63, %s5180_s27  ;;  %4794 = vrot.lane.b32.xlu1 %v4793_v6, %s5180_s27 }
 0x9bd   : > { %4799 = vrot.lane.b32.xlu0 %v4798_v26, %s5180_s27  ;;  %s7367_s27 = scalar_lea.sflag [#allocation4], %s7444_s23 }
 0xa1f   : > { %v4765_v31 = vpop.permute.xlu1 %4764 }
 0xa20   : > { %v4767_v29 = vunpack.i.h.bf16 %v4765_v31  ;;  %v4766_v27 = vunpack.i.l.bf16 %v4765_v31 }
 0xa22   : > { %v2840_v33 = vsel %vm2833_vm11, %v4766_v27, %v4767_v29  ;;  %v6777_v55 = vsel %vm5340_vm9, %v4766_v27, 0.0 }
 0xa23   : > { %v6781_v19 = vsel %vm5365_vm10, %v2840_v33, 0.0  ;;  %v4770_v24 = vpop.permute.xlu1 %4769  ;;  %v4775_v51 = vpop.permute.xlu0 %4774 }
 0xa24   : > { %v4772_v37 = vunpack.i.h.bf16 %v4770_v24  ;;  %v4771_v49 = vunpack.i.l.bf16 %v4770_v24  ;;  %v4777_v8 = vunpack.i.h.bf16 %v4775_v51  ;;  %v4776_v50 = vunpack.i.l.bf16 %v4775_v51 }
 0xa25   : > { %v4803_v35 = vpack.i.bf16 %v6781_v19, %v6777_v55 }
 0xa26   : > { %v2838_v2 = vsel %vm2833_vm11, %v4771_v49, %v4772_v37  ;;  %v6788_v9 = vsel %vm5340_vm9, %v4771_v49, 0.0  ;;  %v2841_v28 = vsel %vm2833_vm11, %v4776_v50, %v4777_v8  ;;  %v6793_v12 = vsel %vm5340_vm9, %v4776_v50, 0.0 }
 0xa27   : > { %v6797_v61 = vsel %vm5365_vm10, %v2838_v2, 0.0  ;;  %v6801_v48 = vsel %vm5365_vm10, %v2841_v28, 0.0  ;;  %4804 = vrot.lane.b32.xlu1 %v4803_v35, %s5178_s10  ;;  %v4785_v45 = vpop.permute.xlu1 %4784  ;;  %v4780_v41 = vpop.permute.xlu0 %4779  ;;  %v3010_v62 = vpack.c.bf16 %v6793_v12, %v6777_v55 }
 0xa28   : > { %v4787_v13 = vunpack.i.h.bf16 %v4785_v45  ;;  %v4786_v34 = vunpack.i.l.bf16 %v4785_v45  ;;  %v4782_v60 = vunpack.i.h.bf16 %v4780_v41  ;;  %v4781_v57 = vunpack.i.l.bf16 %v4780_v41 }
 0xa29   : > { %v4808_v58 = vpack.i.bf16 %v6797_v61, %v6788_v9  ;;  %v4813_v32 = vpack.i.bf16 %v6801_v48, %v6793_v12  ;;  %v3011_v5 = vpack.c.bf16 %v6801_v48, %v6781_v19 }
 0xa2a   : > { %v2836_v52 = vsel %vm2833_vm11, %v4786_v34, %v4787_v13  ;;  %v6813_v43 = vsel %vm5340_vm9, %v4786_v34, 0.0  ;;  %v2839_v17 = vsel %vm2833_vm11, %v4781_v57, %v4782_v60  ;;  %v6818_v20 = vsel %vm5340_vm9, %v4781_v57, 0.0 }
 0xa2b   : > { %v6822_v47 = vsel %vm5365_vm10, %v2836_v52, 0.0  ;;  %v6826_v30 = vsel %vm5365_vm10, %v2839_v17, 0.0  ;;  %4809 = vrot.lane.b32.xlu1 %v4808_v58, %s5178_s10  ;;  %4814 = vrot.lane.b32.xlu0 %v4813_v32, %s5178_s10  ;;  %v4795_v22 = vpop.permute.xlu1 %4794  ;;  %v4790_v40 = vpop.permute.xlu0 %4789  ;;  %v3008_v37 = vpack.c.bf16 %v6818_v20, %v6788_v9 }
 0xa2c   : > { %v4797_v0 = vunpack.i.h.bf16 %v4795_v22  ;;  %v4796_v14 = vunpack.i.l.bf16 %v4795_v22  ;;  %v4792_v59 = vunpack.i.h.bf16 %v4790_v40  ;;  %v4791_v63 = vunpack.i.l.bf16 %v4790_v40 }
 0xa2d   : > { %v4823_v6 = vpack.i.bf16 %v6822_v47, %v6813_v43  ;;  %v4818_v56 = vpack.i.bf16 %v6826_v30, %v6818_v20  ;;  %v3009_v51 = vpack.c.bf16 %v6826_v30, %v6797_v61 }
 0xa2e   : > { %v2834_v23 = vsel %vm2833_vm11, %v4796_v14, %v4797_v0  ;;  %v6839_v26 = vsel %vm5340_vm9, %v4796_v14, 0.0  ;;  %v2837_v31 = vsel %vm2833_vm11, %v4791_v63, %v4792_v59  ;;  %v6844_v29 = vsel %vm5340_vm9, %v4791_v63, 0.0 }
 0xa2f   : > { %v6848_v27 = vsel %vm5365_vm10, %v2834_v23, 0.0  ;;  %v6852_v33 = vsel %vm5365_vm10, %v2837_v31, 0.0  ;;  %4824 = vrot.lane.b32.xlu1 %v4823_v6, %s5178_s10  ;;  %4819 = vrot.lane.b32.xlu0 %v4818_v56, %s5178_s10  ;;  %v4800_v24 = vpop.permute.xlu0 %4799  ;;  %v3006_v45 = vpack.c.bf16 %v6844_v29, %v6813_v43 }
 0xa30   : > { %v4802_v49 = vunpack.i.h.bf16 %v4800_v24  ;;  %v4801_v8 = vunpack.i.l.bf16 %v4800_v24  ;;  %v4833_v50 = vpack.i.bf16 %v6848_v27, %v6839_v26  ;;  %v4828_v2 = vpack.i.bf16 %v6852_v33, %v6844_v29 }
 0xa31   : > { %v3007_v28 = vpack.c.bf16 %v6852_v33, %v6822_v47 }
 0xa32   : > { %v2835_v41 = vsel %vm2833_vm11, %v4801_v8, %v4802_v49  ;;  %v6871_v13 = vsel %vm5340_vm9, %v4801_v8, 0.0 }
 0xa33   : > { %v6875_v34 = vsel %vm5365_vm10, %v2835_v41, 0.0  ;;  %4834 = vrot.lane.b32.xlu1 %v4833_v50, %s5178_s10  ;;  %4829 = vrot.lane.b32.xlu0 %v4828_v2, %s5178_s10  ;;  %v3004_v60 = vpack.c.bf16 %v6871_v13, %v6839_v26  ;;  %v5053_v26 = vld [vmem:[%s7420_s2 + $0x104] ss:$8 sps:$4 sm:$0xff]  }
 0xa34   : > { %v4838_v57 = vpack.i.bf16 %v6875_v34, %v6871_v13  ;;  %v3005_v52 = vpack.c.bf16 %v6875_v34, %v6848_v27  ;;  %4209 = vmatprep.mubr.msk.bf16.mxu0 %vm723_vm0, %v5053_v26 }
 0xa37   : > { %4844 = vrot.lane.b32.xlu1 %v4803_v35, %s5181_s6  ;;  %4839 = vrot.lane.b32.xlu0 %v4838_v57, %s5178_s10  ;;  %s7442_s10 = smov 122  }
 0xa3b   : > { %4849 = vrot.lane.b32.xlu1 %v4808_v58, %s5181_s6  ;;  %4854 = vrot.lane.b32.xlu0 %v4813_v32, %s5181_s6 }
 0xa3f   : > { %4864 = vrot.lane.b32.xlu1 %v4823_v6, %s5181_s6  ;;  %4859 = vrot.lane.b32.xlu0 %v4818_v56, %s5181_s6 }
 0xa43   : > { %4874 = vrot.lane.b32.xlu1 %v4833_v50, %s5181_s6  ;;  %4869 = vrot.lane.b32.xlu0 %v4828_v2, %s5181_s6 }
 0xa47   : > { %4879 = vrot.lane.b32.xlu0 %v4838_v57, %s5181_s6  ;;  %s5184_s6 = smov [#allocation3]  }
 0xa48   : > { %s5079_s9 = sshll.u32 %s5184_s6, 4  ;;  %s5080_s9 = int_to_ptr.vmem [resolvable:$false] %s5079_s9 }
 0xa99   : > { %v4805_v17 = vpop.permute.xlu1 %4804 }
 0xa9a   : > { %v4807_v22 = vunpack.i.h.bf16 %v4805_v17  ;;  %v4806_v40 = vunpack.i.l.bf16 %v4805_v17 }
 0xa9c   : > { %v2929_v23 = vsel %vm2490_vm12, %v4806_v40, %v4807_v22 }
 0xa9d   : > { %v4810_v0 = vpop.permute.xlu1 %4809  ;;  %v4815_v14 = vpop.permute.xlu0 %4814 }
 0xa9e   : > { %v4817_v59 = vunpack.i.h.bf16 %v4815_v14  ;;  %v4816_v63 = vunpack.i.l.bf16 %v4815_v14  ;;  %v4812_v31 = vunpack.i.h.bf16 %v4810_v0  ;;  %v4811_v35 = vunpack.i.l.bf16 %v4810_v0 }
 0xaa0   : > { %v3019_v24 = vpack.c.bf16 %v4817_v59, %v4807_v22  ;;  %v2930_v58 = vsel %vm2490_vm12, %v4816_v63, %v4817_v59  ;;  %v2927_v41 = vsel %vm2490_vm12, %v4811_v35, %v4812_v31 }
 0xaa1   : > { %v4825_v32 = vpop.permute.xlu1 %4824  ;;  %v4820_v6 = vpop.permute.xlu0 %4819  ;;  %v3018_v56 = vpack.c.bf16 %v2930_v58, %v2929_v23 }
 0xaa2   : > { %v4822_v49 = vunpack.i.h.bf16 %v4820_v6  ;;  %v4821_v8 = vunpack.i.l.bf16 %v4820_v6  ;;  %3158 = vrot.lane.b32.xlu0 %v3019_v24, %s7442_s10  ;;  %v4827_v50 = vunpack.i.h.bf16 %v4825_v32  ;;  %v4826_v2 = vunpack.i.l.bf16 %v4825_v32 }
 0xaa3   : > { %3156 = vrot.lane.b32.xlu1 %v3018_v56, %s7442_s10 }
 0xaa4   : > { %v3017_v57 = vpack.c.bf16 %v4822_v49, %v4812_v31  ;;  %v2928_v17 = vsel %vm2490_vm12, %v4821_v8, %v4822_v49  ;;  %v2925_v63 = vsel %vm2490_vm12, %v4826_v2, %v4827_v50 }
 0xaa5   : > { %v4835_v40 = vpop.permute.xlu1 %4834  ;;  %v4830_v22 = vpop.permute.xlu0 %4829  ;;  %v3016_v0 = vpack.c.bf16 %v2928_v17, %v2927_v41 }
 0xaa6   : > { %v4832_v14 = vunpack.i.h.bf16 %v4830_v22  ;;  %v4831_v59 = vunpack.i.l.bf16 %v4830_v22  ;;  %3154 = vrot.lane.b32.xlu0 %v3017_v57, %s7442_s10  ;;  %v4837_v23 = vunpack.i.h.bf16 %v4835_v40  ;;  %v4836_v24 = vunpack.i.l.bf16 %v4835_v40 }
 0xaa7   : > { %3152 = vrot.lane.b32.xlu1 %v3016_v0, %s7442_s10 }
 0xaa8   : > { %v3015_v58 = vpack.c.bf16 %v4832_v14, %v4827_v50  ;;  %v2926_v32 = vsel %vm2490_vm12, %v4831_v59, %v4832_v14  ;;  %v2923_v49 = vsel %vm2490_vm12, %v4836_v24, %v4837_v23 }
 0xaa9   : > { %v4840_v35 = vpop.permute.xlu0 %4839  ;;  %v3014_v31 = vpack.c.bf16 %v2926_v32, %v2925_v63  ;;  %v4845_v57 = vpop.permute.xlu1 %4844 }
 0xaaa   : > { %v4842_v6 = vunpack.i.h.bf16 %v4840_v35  ;;  %v4841_v56 = vunpack.i.l.bf16 %v4840_v35  ;;  %3150 = vrot.lane.b32.xlu0 %v3015_v58, %s7442_s10  ;;  %v4847_v55 = vunpack.i.h.bf16 %v4845_v57  ;;  %v4846_v12 = vunpack.i.l.bf16 %v4845_v57  ;;  %v4179_v57 = vld [vmem:[%s7421_s3 + $0x110] sm:$0xff] }
 0xaab   : > { %3148 = vrot.lane.b32.xlu1 %v3014_v31, %s7442_s10 }
 0xaac   : > { %v3013_v8 = vpack.c.bf16 %v4842_v6, %v4837_v23  ;;  %v2924_v2 = vsel %vm2490_vm12, %v4841_v56, %v4842_v6  ;;  %vm2979_vm12 = vcmask 965632  }
 0xaad   : > { %v3012_v41 = vpack.c.bf16 %v2924_v2, %v2923_v49  ;;  %v4855_v50 = vpop.permute.xlu0 %4854  ;;  %v4850_v40 = vpop.permute.xlu1 %4849  ;;  %v2986_v43 = vsel %vm2979_vm12, %v4846_v12, %v4847_v55  ;;  %v4184_v49 = vld [vmem:[%s7421_s3 + $0x138] sm:$0xff]  ;;  %v4182_v2 = vld [vmem:[%s7421_s3 + $0x128] sm:$0xff] }
 0xaae   : > { %3146 = vrot.lane.b32.xlu0 %v3013_v8, %s7442_s10  ;;  %v4857_v19 = vunpack.i.h.bf16 %v4855_v50  ;;  %v4856_v48 = vunpack.i.l.bf16 %v4855_v50  ;;  %v4852_v30 = vunpack.i.h.bf16 %v4850_v40  ;;  %v4183_v8 = vld [vmem:[%s7421_s3 + $0x130] sm:$0xff]  ;;  %v4180_v50 = vld [vmem:[%s7421_s3 + $0x118] sm:$0xff] }
 0xaaf   : > { %3144 = vrot.lane.b32.xlu1 %v3012_v41, %s7442_s10  ;;  %v4181_v41 = vld [vmem:[%s7421_s3 + $0x120] sm:$0xff] }
 0xab0   : > { %v2987_v9 = vsel %vm2979_vm12, %v4856_v48, %v4857_v19  ;;  %v3027_v29 = vpack.c.bf16 %v4857_v19, %v4847_v55 }
 0xab1   : > { %v4860_v17 = vpop.permute.xlu0 %4859  ;;  %v4865_v47 = vpop.permute.xlu1 %4864  ;;  %v3026_v33 = vpack.c.bf16 %v2987_v9, %v2986_v43 }
 0xab2   : > { %3142 = vrot.lane.b32.xlu0 %v3011_v5, %s7442_s10  ;;  %v4861_v20 = vunpack.i.l.bf16 %v4860_v17  ;;  %v4851_v5 = vunpack.i.l.bf16 %v4850_v40  ;;  %v4867_v13 = vunpack.i.h.bf16 %v4865_v47  ;;  %v4866_v34 = vunpack.i.l.bf16 %v4865_v47  ;;  %v4177_v40 = vld [vmem:[%s7421_s3 + $0x100] sm:$0xff] }
 0xab3   : > { %3140 = vrot.lane.b32.xlu1 %v3010_v62, %s7442_s10  ;;  %v4862_v62 = vunpack.i.h.bf16 %v4860_v17  ;;  %v4178_v17 = vld [vmem:[%s7421_s3 + $0x108] sm:$0xff] }
 0xab4   : > { %v2982_v63 = vsel %vm2979_vm12, %v4866_v34, %v4867_v13 }
 0xab5   : > { %v4870_v61 = vpop.permute.xlu0 %4869 }
 0xab6   : > { %3138 = vrot.lane.b32.xlu0 %v3009_v51, %s7442_s10  ;;  %v2985_v51 = vsel %vm2979_vm12, %v4861_v20, %v4862_v62 }
 0xab7   : > { %3136 = vrot.lane.b32.xlu1 %v3008_v37, %s7442_s10  ;;  %v4872_v37 = vunpack.i.h.bf16 %v4870_v61 }
 0xab9   : > { %v4880_v27 = vpop.permute.xlu0 %4879  ;;  %v3023_v58 = vpack.c.bf16 %v4872_v37, %v4867_v13 }
 0xaba   : > { %3134 = vrot.lane.b32.xlu0 %v3007_v28, %s7442_s10  ;;  %v4871_v28 = vunpack.i.l.bf16 %v4870_v61  ;;  %v4882_v14 = vunpack.i.h.bf16 %v4880_v27  ;;  %v4881_v59 = vunpack.i.l.bf16 %v4880_v27 }
 0xabb   : > { %3132 = vrot.lane.b32.xlu1 %v3006_v45, %s7442_s10  ;;  %v2984_v45 = vsel %vm2979_vm12, %v4851_v5, %v4852_v30 }
 0xabc   : > { %v3024_v22 = vpack.c.bf16 %v2985_v51, %v2984_v45  ;;  %v2983_v0 = vsel %vm2979_vm12, %v4871_v28, %v4872_v37  ;;  %v2981_v35 = vsel %vm2979_vm12, %v4881_v59, %v4882_v14 }
 0xabd   : > { %v3022_v32 = vpack.c.bf16 %v2983_v0, %v2982_v63 }
 0xabe   : > { %3130 = vrot.lane.b32.xlu0 %v3005_v52, %s7442_s10  ;;  %v4875_v52 = vpop.permute.xlu1 %4874 }
 0xabf   : > { %3128 = vrot.lane.b32.xlu1 %v3004_v60, %s7442_s10  ;;  %v3025_v60 = vpack.c.bf16 %v4862_v62, %v4852_v30  ;;  %v4877_v23 = vunpack.i.h.bf16 %v4875_v52  ;;  %v4876_v24 = vunpack.i.l.bf16 %v4875_v52 }
 0xac1   : > { %v2980_v31 = vsel %vm2979_vm12, %v4876_v24, %v4877_v23  ;;  %v3021_v6 = vpack.c.bf16 %v4882_v14, %v4877_v23 }
 0xac2   : > { %3174 = vrot.lane.b32.xlu0 %v3027_v29, %s7442_s10  ;;  %v3020_v56 = vpack.c.bf16 %v2981_v35, %v2980_v31 }
 0xac3   : > { %3172 = vrot.lane.b32.xlu1 %v3026_v33, %s7442_s10 }
 0xac6   : > { %3170 = vrot.lane.b32.xlu0 %v3025_v60, %s7442_s10 }
 0xac7   : > { %3168 = vrot.lane.b32.xlu1 %v3024_v22, %s7442_s10 }
 0xaca   : > { %3166 = vrot.lane.b32.xlu0 %v3023_v58, %s7442_s10 }
 0xacb   : > { %3164 = vrot.lane.b32.xlu1 %v3022_v32, %s7442_s10 }
 0xace   : > { %3162 = vrot.lane.b32.xlu0 %v3021_v6, %s7442_s10 }
 0xacf   : > { %3160 = vrot.lane.b32.xlu1 %v3020_v56, %s7442_s10  ;;  %v5051_v56 = vld [vmem:[%s7420_s2 + $0x100] ss:$8 sps:$4 sm:$0xff]  }
 0xad2   : > { %3065 = vperm.xlu0 %4401, %v4184_v49   ;;  %v5054_v49 = vld [vmem:[%s7420_s2 + $0x114] ss:$8 sps:$4 sm:$0xff]  }
 0xad3   : > { %3060 = vperm.xlu1 %4402, %v4183_v8   ;;  %v5056_v8 = vld [vmem:[%s7420_s2 + $0x110] ss:$8 sps:$4 sm:$0xff]  }
 0xad6   : > { %3055 = vperm.xlu0 %4401, %v4182_v2   ;;  %v5057_v2 = vld [vmem:[%s7420_s2 + $0x124] ss:$8 sps:$4 sm:$0xff]  }
 0xad7   : > { %3050 = vperm.xlu1 %4402, %v4181_v41   ;;  %v5059_v41 = vld [vmem:[%s7420_s2 + $0x120] ss:$8 sps:$4 sm:$0xff]  }
 0xada   : > { %3045 = vperm.xlu0 %4401, %v4180_v50   ;;  %v5060_v50 = vld [vmem:[%s7420_s2 + $0x134] ss:$8 sps:$4 sm:$0xff]  }
 0xadb   : > { %3040 = vperm.xlu1 %4402, %v4179_v57   ;;  %v5062_v57 = vld [vmem:[%s7420_s2 + $0x130] ss:$8 sps:$4 sm:$0xff]  }
 0xade   : > { %3035 = vperm.xlu0 %4401, %v4178_v17  }
 0xadf   : > { %3030 = vperm.xlu1 %4402, %v4177_v40  }
 0xb14   : > { %v3159_v19 = vpop.permute.xlu0 %3158 }
 0xb15   : > { %3225 = vmatprep.subr.bf16.mxu0 %v3159_v19  ;;  %v3157_v48 = vpop.permute.xlu1 %3156 }
 0xb16   : > { %v3184_v55 = vsel %vm1734_vm1, %v3157_v48, %v3159_v19 }
 0xb17   : > { %3226 = vmatpush1.bf16.msra.mxu0 %v3184_v55 }
 0xb18   : > { %v3155_v12 = vpop.permute.xlu0 %3154 }
 0xb19   : > { %3227 = vmatprep.subr.bf16.mxu0 %v3155_v12  ;;  %v3153_v61 = vpop.permute.xlu1 %3152 }
 0xb1a   : > { %v3183_v9 = vsel %vm1734_vm1, %v3153_v61, %v3155_v12 }
 0xb1b   : > { %3228 = vmatpush1.bf16.msra.mxu0 %v3183_v9 }
 0xb1c   : > { %v3151_v62 = vpop.permute.xlu0 %3150 }
 0xb1d   : > { %3229 = vmatprep.subr.bf16.mxu0 %v3151_v62  ;;  %v3149_v20 = vpop.permute.xlu1 %3148 }
 0xb1e   : > { %v3182_v47 = vsel %vm1734_vm1, %v3149_v20, %v3151_v62 }
 0xb1f   : > { %3230 = vmatpush1.bf16.msra.mxu0 %v3182_v47 }
 0xb20   : > { %v3147_v43 = vpop.permute.xlu0 %3146 }
 0xb21   : > { %3231 = vmatprep.subr.bf16.mxu0 %v3147_v43  ;;  %v3145_v30 = vpop.permute.xlu1 %3144 }
 0xb22   : > { %v3181_v5 = vsel %vm1734_vm1, %v3145_v30, %v3147_v43 }
 0xb23   : > { %3232 = vmatpush1.bf16.msra.mxu0 %v3181_v5 }
 0xb24   : > { %v3143_v29 = vpop.permute.xlu0 %3142 }
 0xb25   : > { %v3141_v33 = vpop.permute.xlu1 %3140  ;;  %3233 = vmatprep.subr.bf16.mxu0 %v3143_v29 }
 0xb26   : > { %v3180_v51 = vsel %vm1734_vm1, %v3141_v33, %v3143_v29 }
 0xb27   : > { %3234 = vmatpush1.bf16.msra.mxu0 %v3180_v51 }
 0xb28   : > { %v3139_v37 = vpop.permute.xlu0 %3138 }
 0xb29   : > { %v3137_v28 = vpop.permute.xlu1 %3136  ;;  %3235 = vmatprep.subr.bf16.mxu0 %v3139_v37 }
 0xb2a   : > { %v3179_v27 = vsel %vm1734_vm1, %v3137_v28, %v3139_v37 }
 0xb2b   : > { %3236 = vmatpush1.bf16.msra.mxu0 %v3179_v27 }
 0xb2c   : > { %v3135_v26 = vpop.permute.xlu0 %3134 }
 0xb2d   : > { %v3133_v45 = vpop.permute.xlu1 %3132  ;;  %3237 = vmatprep.subr.bf16.mxu0 %v3135_v26 }
 0xb2e   : > { %v3178_v13 = vsel %vm1734_vm1, %v3133_v45, %v3135_v26 }
 0xb2f   : > { %3238 = vmatpush1.bf16.msra.mxu0 %v3178_v13 }
 0xb30   : > { %v3131_v34 = vpop.permute.xlu0 %3130 }
 0xb31   : > { %v3129_v60 = vpop.permute.xlu1 %3128  ;;  %3239 = vmatprep.subr.bf16.mxu0 %v3131_v34 }
 0xb32   : > { %v3177_v52 = vsel %vm1734_vm1, %v3129_v60, %v3131_v34 }
 0xb33   : > { %3240 = vmatpush1.bf16.msra.mxu0 %v3177_v52 }
 0xb34   : > { %v3175_v22 = vpop.permute.xlu0 %3174 }
 0xb35   : > { %v3173_v0 = vpop.permute.xlu1 %3172  ;;  %3249 = vmatprep.subr.bf16.mxu0 %v3175_v22 }
 0xb36   : > { %v3188_v14 = vsel %vm1734_vm1, %v3173_v0, %v3175_v22 }
 0xb37   : > { %3250 = vmatpush2.bf16.msra.mxu0 %v3188_v14 }
 0xb38   : > { %v3171_v59 = vpop.permute.xlu0 %3170 }
 0xb39   : > { %v3169_v63 = vpop.permute.xlu1 %3168  ;;  %3251 = vmatprep.subr.bf16.mxu0 %v3171_v59 }
 0xb3a   : > { %v3187_v23 = vsel %vm1734_vm1, %v3169_v63, %v3171_v59 }
 0xb3b   : > { %3252 = vmatpush2.bf16.msra.mxu0 %v3187_v23 }
 0xb3c   : > { %v3167_v24 = vpop.permute.xlu0 %3166 }
 0xb3d   : > { %v3165_v58 = vpop.permute.xlu1 %3164  ;;  %3253 = vmatprep.subr.bf16.mxu0 %v3167_v24 }
 0xb3e   : > { %v3186_v32 = vsel %vm1734_vm1, %v3165_v58, %v3167_v24 }
 0xb3f   : > { %3254 = vmatpush2.bf16.msra.mxu0 %v3186_v32 }
 0xb40   : > { %v3163_v35 = vpop.permute.xlu0 %3162 }
 0xb41   : > { %v3161_v31 = vpop.permute.xlu1 %3160  ;;  %3255 = vmatprep.subr.bf16.mxu0 %v3163_v35 }
 0xb42   : > { %v3185_v6 = vsel %vm1734_vm1, %v3161_v31, %v3163_v35 }
 0xb43   : > { %3256 = vmatpush2.bf16.msra.mxu0 %v3185_v6 }
 0xb46   : > { %3258 = vmatmul.mubr.bf16.vlgmr.msra.gmra.mxu0 %v5051_v56 }
 0xb47   : > { %4210 = vmatprep.mubr.msk.bf16.mxu0 %vm723_vm0, %v5054_v49 }
 0xb4d   : > { %v3066_v30 = vpop.permute.xlu0 %3065 }
 0xb4e   : > { %3268 = vmatmul.mubr.bf16.gmra.mxu0 %v5056_v8  ;;  %v3061_v48 = vpop.permute.xlu1 %3060 }
 0xb4f   : > { %4211 = vmatprep.mubr.msk.bf16.mxu0 %vm723_vm0, %v5057_v2 }
 0xb51   : > { %v3056_v37 = vpop.permute.xlu0 %3055 }
 0xb52   : > { %v3051_v9 = vpop.permute.xlu1 %3050 }
 0xb55   : > { %v3046_v35 = vpop.permute.xlu0 %3045 }
 0xb56   : > { %3278 = vmatmul.mubr.bf16.gmra.mxu0 %v5059_v41  ;;  %v3041_v43 = vpop.permute.xlu1 %3040 }
 0xb57   : > { %4212 = vmatprep.mubr.msk.bf16.mxu0 %vm723_vm0, %v5060_v50 }
 0xb5a   : > { %v3031_v51 = vpop.permute.xlu1 %3030 }
 0xb5e   : > { %3288 = vmatmul.mubr.bf16.gmra.mxu0 %v5062_v57 }
 0xc06   : > { %v3259_v17 = vpop.f32.mrf.mxu0 }
 0xc07   : > { %v7020_v52 = vadd.f32 %v3259_v17, %v3031_v51 }
 0xc08   : > { %v3261_v40 = vpop.f32.mrf.mxu0 }
 0xc09   : > { %v7018_v28 = vadd.f32 %v3261_v40, %v3031_v51 }
 0xc0a   : > { %v7014_v19 = vpop.f32.mrf.mxu0 }
 0xc0b   : > { %v3315_v14 = vmul.f32 0.1, %v7018_v28 }
 0xc0c   : > { %v7016_v55 = vpop.f32.mrf.mxu0 }
 0xc0e   : > { %v3269_v12 = vpop.f32.mrf.mxu0 }
 0xc0f   : > { %v3270_v59 = vadd.f32 %v3269_v12, %v3041_v43 }
 0xc10   : > { %v3271_v61 = vpop.f32.mrf.mxu0 }
 0xc11   : > { %v3272_v13 = vadd.f32 %v3271_v61, %v3041_v43  ;;  %v3318_v61 = vmul.f32 0.1, %v3270_v59  ;;  %vm3302_vm11 = vcmp.ge.f32.partialorder %v3270_v59, 0.0 }
 0xc12   : > { %v3273_v62 = vpop.f32.mrf.mxu0 }
 0xc13   : > { %v3319_v31 = vmul.f32 0.1, %v3272_v13  ;;  %vm3303_vm6 = vcmp.ge.f32.partialorder %v3272_v13, 0.0 }
 0xc14   : > { %v3275_v20 = vpop.f32.mrf.mxu0 }
 0xc15   : > { %v3276_v57 = vadd.f32 %v3275_v20, %v3046_v35 }
 0xc16   : > { %v3279_v47 = vpop.f32.mrf.mxu0 }
 0xc17   : > { %v3280_v34 = vadd.f32 %v3279_v47, %v3051_v9 }
 0xc18   : > { %v3281_v5 = vpop.f32.mrf.mxu0 }
 0xc19   : > { %v3282_v27 = vadd.f32 %v3281_v5, %v3051_v9  ;;  %v3322_v6 = vmul.f32 0.1, %v3280_v34  ;;  %vm3306_vm4 = vcmp.ge.f32.partialorder %v3280_v34, 0.0  ;;  %v3274_v9 = vadd.f32 %v3273_v62, %v3046_v35 }
 0xc1a   : > { %v3283_v29 = vpop.f32.mrf.mxu0  ;;  %v3314_v62 = vmul.f32 0.1, %v7020_v52 }
 0xc1b   : > { %v3323_v63 = vmul.f32 0.1, %v3282_v27  ;;  %vm3307_vm3 = vcmp.ge.f32.partialorder %v3282_v27, 0.0  ;;  %v3284_v56 = vadd.f32 %v3283_v29, %v3056_v37  ;;  %v3338_v47 = vsel %vm3306_vm4, %v3280_v34, %v3322_v6 }
 0xc1c   : > { %v3285_v33 = vpop.f32.mrf.mxu0  ;;  %v3334_v34 = vsel %vm3302_vm11, %v3270_v59, %v3318_v61  ;;  %vm3304_vm4 = vcmp.ge.f32.partialorder %v3274_v9, 0.0 }
 0xc1d   : > { %v3286_v24 = vadd.f32 %v3285_v33, %v3056_v37  ;;  %v3339_v40 = vsel %vm3307_vm3, %v3282_v27, %v3323_v63  ;;  %v3324_v43 = vmul.f32 0.1, %v3284_v56  ;;  %vm3308_vm12 = vcmp.ge.f32.partialorder %v3284_v56, 0.0 }
 0xc1e   : > { %v3289_v26 = vpop.f32.mrf.mxu0  ;;  %v4888_v20 = vpack.i.bf16 %v3339_v40, %v3338_v47  ;;  %v3335_v37 = vsel %vm3303_vm6, %v3272_v13, %v3319_v31  ;;  %v3321_v27 = vmul.f32 0.1, %v3276_v57  ;;  %vm3298_vm3 = vcmp.ge.f32.partialorder %v7020_v52, 0.0 }
 0xc1f   : > { %v3290_v45 = vadd.f32 %v3289_v26, %v3061_v48  ;;  %vm3309_vm7 = vcmp.ge.f32.partialorder %v3286_v24, 0.0  ;;  %vm3394_vm6 = vcmask 89088  }
 0xc20   : > { %v3291_v60 = vpop.f32.mrf.mxu0 }
 0xc21   : > { %v3326_v22 = vmul.f32 0.1, %v3290_v45  ;;  %v3292_v0 = vadd.f32 %v3291_v60, %v3061_v48  ;;  %vm3310_vm15 = vcmp.ge.f32.partialorder %v3290_v45, 0.0  ;;  %v3325_v48 = vmul.f32 0.1, %v3286_v24 }
 0xc22   : > { %v3293_v23 = vpop.f32.mrf.mxu0  ;;  %v3320_v60 = vmul.f32 0.1, %v3274_v9 }
 0xc23   : > { %vm3311_vm2 = vcmp.ge.f32.partialorder %v3292_v0, 0.0  ;;  %v3327_v58 = vmul.f32 0.1, %v3292_v0  ;;  %v3294_v32 = vadd.f32 %v3293_v23, %v3066_v30  ;;  %v3342_v8 = vsel %vm3310_vm15, %v3290_v45, %v3326_v22 }
 0xc24   : > { %v3295_v49 = vpop.f32.mrf.mxu0  ;;  %v3341_v26 = vsel %vm3309_vm7, %v3286_v24, %v3325_v48  ;;  %vm3299_vm15 = vcmp.ge.f32.partialorder %v7018_v28, 0.0  ;;  %v3340_v22 = vsel %vm3308_vm12, %v3284_v56, %v3324_v43  ;;  %v3330_v24 = vsel %vm3298_vm3, %v7020_v52, %v3314_v62 }
 0xc25   : > { %v3343_v2 = vsel %vm3311_vm2, %v3292_v0, %v3327_v58  ;;  %v3328_v41 = vmul.f32 0.1, %v3294_v32  ;;  %v3296_v50 = vadd.f32 %v3295_v49, %v3066_v30  ;;  %vm3312_vm14 = vcmp.ge.f32.partialorder %v3294_v32, 0.0  ;;  %v3036_v30 = vpop.permute.xlu0 %3035 }
 0xc26   : > { %v4883_v17 = vpack.i.bf16 %v3343_v2, %v3342_v8  ;;  %v3266_v51 = vadd.f32 %v7016_v55, %v3036_v30  ;;  %vm3305_vm2 = vcmp.ge.f32.partialorder %v3276_v57, 0.0  ;;  %v3264_v45 = vadd.f32 %v7014_v19, %v3036_v30 }
 0xc27   : > { %vm3313_vm5 = vcmp.ge.f32.partialorder %v3296_v50, 0.0  ;;  %v3329_v12 = vmul.f32 0.1, %v3296_v50  ;;  %v3344_v5 = vsel %vm3312_vm14, %v3294_v32, %v3328_v41  ;;  %v4903_v55 = vpack.i.bf16 %v3335_v37, %v3334_v34 }
 0xc28   : > { %4884 = vrot.lane.b32.xlu1 %v4883_v17, %s5182_s12  ;;  %v4898_v13 = vpack.i.bf16 %v3341_v26, %v3340_v22  ;;  %v3331_v0 = vsel %vm3299_vm15, %v7018_v28, %v3315_v14  ;;  %v3317_v63 = vmul.f32 0.1, %v3266_v51  ;;  %v3337_v23 = vsel %vm3305_vm2, %v3276_v57, %v3321_v27 }
 0xc29   : > { %v3345_v29 = vsel %vm3313_vm5, %v3296_v50, %v3329_v12  ;;  %vm3301_vm14 = vcmp.ge.f32.partialorder %v3266_v51, 0.0  ;;  %v3316_v19 = vmul.f32 0.1, %v3264_v45  ;;  %v3336_v59 = vsel %vm3304_vm4, %v3274_v9, %v3320_v60 }
 0xc2a   : > { %v4893_v33 = vpack.i.bf16 %v3345_v29, %v3344_v5  ;;  %v4913_v58 = vpack.i.bf16 %v3331_v0, %v3330_v24  ;;  %vm3300_vm5 = vcmp.ge.f32.partialorder %v3264_v45, 0.0  ;;  %v4908_v32 = vpack.i.bf16 %v3337_v23, %v3336_v59 }
 0xc2b   : > { %v3333_v35 = vsel %vm3301_vm14, %v3266_v51, %v3317_v63  ;;  %v3332_v28 = vsel %vm3300_vm5, %v3264_v45, %v3316_v19 }
 0xc2c   : > { %4889 = vrot.lane.b32.xlu1 %v4888_v20, %s5182_s12  ;;  %4894 = vrot.lane.b32.xlu0 %v4893_v33, %s5182_s12  ;;  %v4918_v14 = vpack.i.bf16 %v3333_v35, %v3332_v28 }
 0xc30   : > { %4904 = vrot.lane.b32.xlu1 %v4903_v55, %s5182_s12  ;;  %4899 = vrot.lane.b32.xlu0 %v4898_v13, %s5182_s12 }
 0xc34   : > { %4914 = vrot.lane.b32.xlu1 %v4913_v58, %s5182_s12  ;;  %4909 = vrot.lane.b32.xlu0 %v4908_v32, %s5182_s12 }
 0xc38   : > { %4919 = vrot.lane.b32.xlu0 %v4918_v14, %s5182_s12  ;;  %s7337_s12 = scalar_lea.vmem [#allocation3], %s5301_s5  ;;  %s4231_s5 = smul.u32 24, %s5155_s19 }
 0xc9a   : > { %v4885_v31 = vpop.permute.xlu1 %4884 }
 0xc9b   : > { %v4887_v6 = vunpack.i.h.bf16 %v4885_v31  ;;  %v4886_v56 = vunpack.i.l.bf16 %v4885_v31 }
 0xc9d   : > { %v3401_v52 = vsel %vm3394_vm6, %v4886_v56, %v4887_v6  ;;  %v7041_v49 = vsel %vm5340_vm9, %v4886_v56, 0.0 }
 0xc9e   : > { %v7045_v8 = vsel %vm5365_vm10, %v3401_v52, 0.0  ;;  %v4890_v2 = vpop.permute.xlu1 %4889  ;;  %v4895_v41 = vpop.permute.xlu0 %4894 }
 0xc9f   : > { %v7049_v50 = vpack.i.bf16 %v7045_v8, %v7041_v49  ;;  %v4892_v57 = vunpack.i.h.bf16 %v4890_v2  ;;  %v4891_v17 = vunpack.i.l.bf16 %v4890_v2  ;;  %v4897_v40 = vunpack.i.h.bf16 %v4895_v41 }
 0xca0   : > { %v4896_v48 = vunpack.i.l.bf16 %v4895_v41 }
 0xca1   : > { %v3399_v12 = vsel %vm3394_vm6, %v4891_v17, %v4892_v57  ;;  %v7054_v61 = vsel %vm5340_vm9, %v4891_v17, 0.0  ;;  %4924 = vrot.lane.b32.xlu1 %v7049_v50, %s5170_s28 }
 0xca2   : > { %v7060_v9 = vsel %vm5365_vm10, %v3399_v12, 0.0  ;;  %v3402_v47 = vsel %vm3394_vm6, %v4896_v48, %v4897_v40  ;;  %v7065_v43 = vsel %vm5340_vm9, %v4896_v48, 0.0  ;;  %v4905_v5 = vpop.permute.xlu1 %4904  ;;  %v4900_v29 = vpop.permute.xlu0 %4899 }
 0xca3   : > { %v4928_v30 = vpack.i.bf16 %v7060_v9, %v7054_v61  ;;  %v7071_v20 = vsel %vm5365_vm10, %v3402_v47, 0.0  ;;  %v3569_v33 = vpack.c.bf16 %v7065_v43, %v7041_v49  ;;  %v4907_v37 = vunpack.i.h.bf16 %v4905_v5 }
 0xca4   : > { %v4933_v51 = vpack.i.bf16 %v7071_v20, %v7065_v43  ;;  %v4906_v27 = vunpack.i.l.bf16 %v4905_v5  ;;  %v4902_v26 = vunpack.i.h.bf16 %v4900_v29  ;;  %v4901_v62 = vunpack.i.l.bf16 %v4900_v29 }
 0xca5   : > { %4929 = vrot.lane.b32.xlu1 %v4928_v30, %s5170_s28  ;;  %v3570_v45 = vpack.c.bf16 %v7071_v20, %v7045_v8 }
 0xca6   : > { %v3397_v34 = vsel %vm3394_vm6, %v4906_v27, %v4907_v37  ;;  %v7083_v60 = vsel %vm5340_vm9, %v4906_v27, 0.0  ;;  %4934 = vrot.lane.b32.xlu0 %v4933_v51, %s5170_s28  ;;  %v4915_v22 = vpop.permute.xlu1 %4914  ;;  %v4910_v55 = vpop.permute.xlu0 %4909  ;;  %v3400_v0 = vsel %vm3394_vm6, %v4901_v62, %v4902_v26  ;;  %v7093_v63 = vsel %vm5340_vm9, %v4901_v62, 0.0 }
 0xca7   : > { %v7088_v13 = vsel %vm5365_vm10, %v3397_v34, 0.0  ;;  %v4917_v23 = vunpack.i.h.bf16 %v4915_v22  ;;  %v7099_v19 = vsel %vm5365_vm10, %v3400_v0, 0.0  ;;  %v3567_v59 = vpack.c.bf16 %v7093_v63, %v7054_v61 }
 0xca8   : > { %v4943_v24 = vpack.i.bf16 %v7088_v13, %v7083_v60  ;;  %v4938_v58 = vpack.i.bf16 %v7099_v19, %v7093_v63  ;;  %v4916_v32 = vunpack.i.l.bf16 %v4915_v22  ;;  %v4912_v35 = vunpack.i.h.bf16 %v4910_v55 }
 0xca9   : > { %v4911_v28 = vunpack.i.l.bf16 %v4910_v55  ;;  %v3568_v31 = vpack.c.bf16 %v7099_v19, %v7060_v9 }
 0xcaa   : > { %4944 = vrot.lane.b32.xlu1 %v4943_v24, %s5170_s28  ;;  %v4920_v14 = vpop.permute.xlu0 %4919  ;;  %v3395_v6 = vsel %vm3394_vm6, %v4916_v32, %v4917_v23  ;;  %v7111_v56 = vsel %vm5340_vm9, %v4916_v32, 0.0  ;;  %4939 = vrot.lane.b32.xlu0 %v4938_v58, %s5170_s28 }
 0xcab   : > { %v4922_v52 = vunpack.i.h.bf16 %v4920_v14  ;;  %v4921_v2 = vunpack.i.l.bf16 %v4920_v14  ;;  %v7116_v41 = vsel %vm5365_vm10, %v3395_v6, 0.0  ;;  %v3398_v57 = vsel %vm3394_vm6, %v4911_v28, %v4912_v35 }
 0xcac   : > { %v7121_v17 = vsel %vm5340_vm9, %v4911_v28, 0.0  ;;  %v4953_v40 = vpack.i.bf16 %v7116_v41, %v7111_v56  ;;  %v7127_v48 = vsel %vm5365_vm10, %v3398_v57, 0.0 }
 0xcad   : > { %v3565_v12 = vpack.c.bf16 %v7121_v17, %v7083_v60  ;;  %v4948_v47 = vpack.i.bf16 %v7127_v48, %v7121_v17  ;;  %v3396_v5 = vsel %vm3394_vm6, %v4921_v2, %v4922_v52  ;;  %v7136_v29 = vsel %vm5340_vm9, %v4921_v2, 0.0 }
 0xcae   : > { %v7140_v37 = vsel %vm5365_vm10, %v3396_v5, 0.0  ;;  %v3563_v27 = vpack.c.bf16 %v7136_v29, %v7111_v56  ;;  %4954 = vrot.lane.b32.xlu1 %v4953_v40, %s5170_s28  ;;  %v3566_v26 = vpack.c.bf16 %v7127_v48, %v7088_v13  ;;  %v5065_v56 = vld [vmem:[%s7420_s2 + $0x144] ss:$8 sps:$4 sm:$0xff]   ;;  %vm3735_vm9 = vcmask 957440  }
 0xcaf   : > { %v4958_v62 = vpack.i.bf16 %v7140_v37, %v7136_v29  ;;  %4949 = vrot.lane.b32.xlu0 %v4948_v47, %s5170_s28  ;;  %v3564_v38 = vpack.c.bf16 %v7140_v37, %v7116_v41  ;;  %4221 = vmatprep.mubr.msk.bf16.mxu1 %vm723_vm0, %v5065_v56  ;;  %v5063_v56 = vld [vmem:[%s7420_s2 + $0x140] ss:$8 sps:$4 sm:$0xff]  }
 0xcb2   : > { %4964 = vrot.lane.b32.xlu1 %v7049_v50, %s7443_s13 }
 0xcb3   : > { %4959 = vrot.lane.b32.xlu0 %v4958_v62, %s5170_s28  ;;  %s5183_s28 = smov 117  }
 0xcb6   : > { %4969 = vrot.lane.b32.xlu1 %v4928_v30, %s7443_s13 }
 0xcb7   : > { %4974 = vrot.lane.b32.xlu0 %v4933_v51, %s7443_s13 }
 0xcba   : > { %4984 = vrot.lane.b32.xlu1 %v4943_v24, %s7443_s13 }
 0xcbb   : > { %4979 = vrot.lane.b32.xlu0 %v4938_v58, %s7443_s13 }
 0xcbe   : > { %4994 = vrot.lane.b32.xlu1 %v4953_v40, %s7443_s13 }
 0xcbf   : > { %4989 = vrot.lane.b32.xlu0 %v4948_v47, %s7443_s13 }
 0xcc3   : > { %4999 = vrot.lane.b32.xlu0 %v4958_v62, %s7443_s13  ;;  %s3929_s13 = sadd.s32 %s5151_s18, %s4231_s5 }
 0xcc4   : > { %s4226_s19 = sshll.u32 %s3929_s13, 7 }
 0xcc5   : > { %s7362_s24 = scalar_lea.hbm %s7422_s4, %s4226_s19 }
 0xd13   : > { %v4925_v46 = vpop.permute.xlu1 %4924 }
 0xd14   : > { %v4927_v34 = vunpack.i.h.bf16 %v4925_v46  ;;  %v4926_v22 = vunpack.i.l.bf16 %v4925_v46 }
 0xd16   : > { %v3489_v30 = vsel %vm541_vm8, %v4926_v22, %v4927_v34 }
 0xd17   : > { %v4930_v50 = vpop.permute.xlu1 %4929 }
 0xd18   : > { %v4935_v55 = vpop.permute.xlu0 %4934  ;;  %v4932_v51 = vunpack.i.h.bf16 %v4930_v50  ;;  %v4931_v32 = vunpack.i.l.bf16 %v4930_v50 }
 0xd19   : > { %v4937_v0 = vunpack.i.h.bf16 %v4935_v55  ;;  %v4936_v23 = vunpack.i.l.bf16 %v4935_v55 }
 0xd1a   : > { %v3487_v2 = vsel %vm541_vm8, %v4931_v32, %v4932_v51 }
 0xd1b   : > { %v3578_v24 = vpack.c.bf16 %v4937_v0, %v4927_v34  ;;  %v3490_v58 = vsel %vm541_vm8, %v4936_v23, %v4937_v0 }
 0xd1c   : > { %v3577_v35 = vpack.c.bf16 %v3490_v58, %v3489_v30  ;;  %v4945_v28 = vpop.permute.xlu1 %4944  ;;  %v4940_v14 = vpop.permute.xlu0 %4939 }
 0xd1d   : > { %3717 = vrot.lane.b32.xlu0 %v3578_v24, %s5183_s28  ;;  %v4942_v6 = vunpack.i.h.bf16 %v4940_v14  ;;  %v4941_v52 = vunpack.i.l.bf16 %v4940_v14  ;;  %v4947_v57 = vunpack.i.h.bf16 %v4945_v28  ;;  %v4946_v40 = vunpack.i.l.bf16 %v4945_v28 }
 0xd1e   : > { %3715 = vrot.lane.b32.xlu1 %v3577_v35, %s5183_s28 }
 0xd1f   : > { %v3576_v47 = vpack.c.bf16 %v4942_v6, %v4932_v51  ;;  %v3488_v5 = vsel %vm541_vm8, %v4941_v52, %v4942_v6  ;;  %v3485_v55 = vsel %vm541_vm8, %v4946_v40, %v4947_v57 }
 0xd20   : > { %v3575_v62 = vpack.c.bf16 %v3488_v5, %v3487_v2  ;;  %v4955_v46 = vpop.permute.xlu1 %4954 }
 0xd21   : > { %v4950_v34 = vpop.permute.xlu0 %4949  ;;  %3713 = vrot.lane.b32.xlu0 %v3576_v47, %s5183_s28  ;;  %v4957_v0 = vunpack.i.h.bf16 %v4955_v46  ;;  %v4956_v23 = vunpack.i.l.bf16 %v4955_v46 }
 0xd22   : > { %v4952_v22 = vunpack.i.h.bf16 %v4950_v34  ;;  %v4951_v50 = vunpack.i.l.bf16 %v4950_v34  ;;  %3711 = vrot.lane.b32.xlu1 %v3575_v62, %s5183_s28 }
 0xd23   : > { %v3483_v28 = vsel %vm541_vm8, %v4956_v23, %v4957_v0 }
 0xd24   : > { %v3574_v30 = vpack.c.bf16 %v4952_v22, %v4947_v57  ;;  %v3486_v32 = vsel %vm541_vm8, %v4951_v50, %v4952_v22  ;;  %v4965_v57 = vpop.permute.xlu1 %4964 }
 0xd25   : > { %v3573_v24 = vpack.c.bf16 %v3486_v32, %v3485_v55  ;;  %v4960_v51 = vpop.permute.xlu0 %4959  ;;  %v4967_v49 = vunpack.i.h.bf16 %v4965_v57  ;;  %v4966_v9 = vunpack.i.l.bf16 %v4965_v57  ;;  %v4199_v57 = vld [vmem:[%s7421_s3 + $0x170] sm:$0xff] }
 0xd26   : > { %v4962_v58 = vunpack.i.h.bf16 %v4960_v51  ;;  %v4961_v35 = vunpack.i.l.bf16 %v4960_v51  ;;  %3709 = vrot.lane.b32.xlu0 %v3574_v30, %s5183_s28 }
 0xd27   : > { %3707 = vrot.lane.b32.xlu1 %v3573_v24, %s5183_s28  ;;  %v3545_v60 = vsel %vm598_vm13, %v4966_v9, %v4967_v49 }
 0xd28   : > { %v3572_v14 = vpack.c.bf16 %v4962_v58, %v4957_v0  ;;  %v3484_v6 = vsel %vm541_vm8, %v4961_v35, %v4962_v58  ;;  %v4970_v47 = vpop.permute.xlu1 %4969  ;;  %v4194_v58 = vld [vmem:[%s7421_s3 + $0x148] sm:$0xff]  ;;  %v4193_v35 = vld [vmem:[%s7421_s3 + $0x140] sm:$0xff] }
 0xd29   : > { %v3571_v52 = vpack.c.bf16 %v3484_v6, %v3483_v28  ;;  %v4975_v2 = vpop.permute.xlu0 %4974  ;;  %v4972_v13 = vunpack.i.h.bf16 %v4970_v47  ;;  %v4971_v19 = vunpack.i.l.bf16 %v4970_v47  ;;  %v4196_v28 = vld [vmem:[%s7421_s3 + $0x158] sm:$0xff]  ;;  %v4198_v6 = vld [vmem:[%s7421_s3 + $0x168] sm:$0xff] }
 0xd2a   : > { %3705 = vrot.lane.b32.xlu0 %v3572_v14, %s5183_s28  ;;  %v4977_v8 = vunpack.i.h.bf16 %v4975_v2  ;;  %v4976_v20 = vunpack.i.l.bf16 %v4975_v2  ;;  %v4195_v14 = vld [vmem:[%s7421_s3 + $0x150] sm:$0xff]  ;;  %v4200_v2 = vld [vmem:[%s7421_s3 + $0x178] sm:$0xff] }
 0xd2b   : > { %3703 = vrot.lane.b32.xlu1 %v3571_v52, %s5183_s28  ;;  %v3543_v29 = vsel %vm598_vm13, %v4971_v19, %v4972_v13  ;;  %v4197_v52 = vld [vmem:[%s7421_s3 + $0x160] sm:$0xff] }
 0xd2c   : > { %v4985_v63 = vpop.permute.xlu1 %4984 }
 0xd2d   : > { %v4980_v40 = vpop.permute.xlu0 %4979  ;;  %v4987_v37 = vunpack.i.h.bf16 %v4985_v63 }
 0xd2e   : > { %3701 = vrot.lane.b32.xlu0 %v3570_v45, %s5183_s28  ;;  %v4982_v61 = vunpack.i.h.bf16 %v4980_v40  ;;  %v4981_v45 = vunpack.i.l.bf16 %v4980_v40 }
 0xd2f   : > { %3699 = vrot.lane.b32.xlu1 %v3569_v33, %s5183_s28  ;;  %v3546_v33 = vsel %vm598_vm13, %v4976_v20, %v4977_v8 }
 0xd30   : > { %v3544_v17 = vsel %vm598_vm13, %v4981_v45, %v4982_v61  ;;  %v4995_v5 = vpop.permute.xlu1 %4994 }
 0xd31   : > { %v4990_v43 = vpop.permute.xlu0 %4989  ;;  %v4997_v50 = vunpack.i.h.bf16 %v4995_v5  ;;  %v4996_v55 = vunpack.i.l.bf16 %v4995_v5 }
 0xd32   : > { %3697 = vrot.lane.b32.xlu0 %v3568_v31, %s5183_s28  ;;  %v3585_v31 = vpack.c.bf16 %v3546_v33, %v3545_v60  ;;  %v4992_v48 = vunpack.i.h.bf16 %v4990_v43 }
 0xd33   : > { %3695 = vrot.lane.b32.xlu1 %v3567_v59, %s5183_s28  ;;  %v3586_v59 = vpack.c.bf16 %v4977_v8, %v4967_v49  ;;  %v3539_v32 = vsel %vm598_vm13, %v4996_v55, %v4997_v50 }
 0xd34   : > { %v3582_v0 = vpack.c.bf16 %v4992_v48, %v4987_v37 }
 0xd35   : > { %v5000_v41 = vpop.permute.xlu0 %4999 }
 0xd36   : > { %3693 = vrot.lane.b32.xlu0 %v3566_v26, %s5183_s28  ;;  %v3584_v26 = vpack.c.bf16 %v4982_v61, %v4972_v13  ;;  %v5002_v46 = vunpack.i.h.bf16 %v5000_v41  ;;  %v5001_v34 = vunpack.i.l.bf16 %v5000_v41 }
 0xd37   : > { %3691 = vrot.lane.b32.xlu1 %v3565_v12, %s5183_s28  ;;  %v4991_v12 = vunpack.i.l.bf16 %v4990_v43 }
 0xd38   : > { %v3540_v30 = vsel %vm598_vm13, %v5001_v34, %v5002_v46  ;;  %v3580_v24 = vpack.c.bf16 %v5002_v46, %v4997_v50 }
 0xd39   : > { %v3542_v62 = vsel %vm598_vm13, %v4991_v12, %v4992_v48  ;;  %v3579_v51 = vpack.c.bf16 %v3540_v30, %v3539_v32 }
 0xd3a   : > { %3689 = vrot.lane.b32.xlu0 %v3564_v38, %s5183_s28  ;;  %v3583_v38 = vpack.c.bf16 %v3544_v17, %v3543_v29  ;;  %v5066_v29 = vld [vmem:[%s7420_s2 + $0x154] ss:$8 sps:$4 sm:$0xff]  }
 0xd3b   : > { %3687 = vrot.lane.b32.xlu1 %v3563_v27, %s5183_s28  ;;  %v4986_v27 = vunpack.i.l.bf16 %v4985_v63 }
 0xd3d   : > { %v3541_v22 = vsel %vm598_vm13, %v4986_v27, %v4987_v37  ;;  %v5068_v37 = vld [vmem:[%s7420_s2 + $0x150] ss:$8 sps:$4 sm:$0xff]   ;;  %v5071_v27 = vld [vmem:[%s7420_s2 + $0x160] ss:$8 sps:$4 sm:$0xff]  }
 0xd3e   : > { %3733 = vrot.lane.b32.xlu0 %v3586_v59, %s5183_s28  ;;  %v3581_v23 = vpack.c.bf16 %v3542_v62, %v3541_v22 }
 0xd3f   : > { %3731 = vrot.lane.b32.xlu1 %v3585_v31, %s5183_s28 }
 0xd42   : > { %3729 = vrot.lane.b32.xlu0 %v3584_v26, %s5183_s28  ;;  %v5072_v26 = vld [vmem:[%s7420_s2 + $0x174] ss:$8 sps:$4 sm:$0xff]  }
 0xd43   : > { %3727 = vrot.lane.b32.xlu1 %v3583_v38, %s5183_s28  ;;  %v5074_v38 = vld [vmem:[%s7420_s2 + $0x170] ss:$8 sps:$4 sm:$0xff]  }
 0xd46   : > { %3725 = vrot.lane.b32.xlu0 %v3582_v0, %s5183_s28 }
 0xd47   : > { %3723 = vrot.lane.b32.xlu1 %v3581_v23, %s5183_s28 }
 0xd4a   : > { %3721 = vrot.lane.b32.xlu0 %v3580_v24, %s5183_s28 }
 0xd4b   : > { %3719 = vrot.lane.b32.xlu1 %v3579_v51, %s5183_s28  ;;  %s3932_s28 = sshll.u32 %s7337_s12, 4  ;;  %s7354_s28 = int_to_ptr.vmem [resolvable:$true] %s3932_s28 }
 0xd4c   : > { %s5075_s7 = scalar_lea.vmem %s7354_s28, 1024  ;;  %p5082_p6 = scmp.lt.s32.totalorder %s7354_s28, %s5080_s9 }
 0xd4d   : > { %p5076_p3 = scmp.ne.s32.totalorder %s7354_s28, %s5075_s7 }
 0xd4e   : > { %3594 = vperm.xlu0 %4401, %v4194_v58  }
 0xd4f   : > { %3589 = vperm.xlu1 %4402, %v4193_v35   ;;  %p5077_p4 = pnand %p5076_p3, %p5273_p8 }
 0xd51   : > { %p5078_p5 = pneg %p5077_p4 }
 0xd52   : > { %3604 = vperm.xlu0 %4401, %v4196_v28  }
 0xd53   : > { %3599 = vperm.xlu1 %4402, %v4195_v14  }
 0xd56   : > { %3614 = vperm.xlu0 %4401, %v4198_v6  }
 0xd57   : > { %3609 = vperm.xlu1 %4402, %v4197_v52  }
 0xd5a   : > { %3624 = vperm.xlu0 %4401, %v4200_v2  }
 0xd5b   : > { %3619 = vperm.xlu1 %4402, %v4199_v57  }
 0xd5e   : > { %3855 = vrot.lane.b32.xlu0 %v6665_v3, %s7442_s10 }
 0xd5f   : > { %3853 = vrot.lane.b32.xlu1 %v6671_v53, %s7442_s10 }
 0xd62   : > { %3859 = vrot.lane.b32.xlu0 %v6735_v21, %s7442_s10 }
 0xd63   : > { %3857 = vrot.lane.b32.xlu1 %v6749_v1, %s7442_s10 }
 0xd66   : > { %3863 = vrot.lane.b32.xlu0 %v6684_v10, %s7442_s10 }
 0xd67   : > { %3861 = vrot.lane.b32.xlu1 %v6682_v54, %s7442_s10 }
 0xd6a   : > { %3867 = vrot.lane.b32.xlu0 %v6713_v18, %s7442_s10 }
 0xd6b   : > { %3865 = vrot.lane.b32.xlu1 %v6723_v42, %s7442_s10 }
 0xd6e   : > { %3871 = vrot.lane.b32.xlu0 %v6675_v36, %s7442_s10 }
 0xd6f   : > { %3869 = vrot.lane.b32.xlu1 %v6686_v16, %s7442_s10 }
 0xd72   : > { %3875 = vrot.lane.b32.xlu0 %v6694_v25, %s7442_s10 }
 0xd73   : > { %3873 = vrot.lane.b32.xlu1 %v6705_v39, %s7442_s10 }
 0xd76   : > { %3879 = vrot.lane.b32.xlu0 %v6690_v15, %s7442_s10 }
 0xd77   : > { %3877 = vrot.lane.b32.xlu1 %v6680_v11, %s7442_s10 }
 0xd7a   : > { %3883 = vrot.lane.b32.xlu0 %v6709_v7, %s7442_s10 }
 0xd7b   : > { %3881 = vrot.lane.b32.xlu1 %v6699_v4, %s7442_s10  ;;  %s5081_s10 = scalar_lea.vmem %s5080_s9, 2048 }
 0xd7c   : > { %p5083_p7 = scmp.lt.s32.totalorder %s5081_s10, %s5075_s7 }
 0xd7e   : > { %p5084_p10 = por %p5083_p7, %p5082_p6 }
 0xd80   : > { %p5085_p11 = pnand %p5084_p10, %p5078_p5 }
 0xd8f   : > { %v3718_v3 = vpop.permute.xlu0 %3717 }
 0xd90   : > { %v3716_v53 = vpop.permute.xlu1 %3715 }
 0xd91   : > { %v3743_v36 = vsel %vm3735_vm9, %v3716_v53, %v3718_v3 }
 0xd92   : > { %3773 = vmatpush1.bf16.msra.mxu1 %v3743_v36 }
 0xd93   : > { %3774 = vmatprep.subr.bf16.mxu1 %v7441_v44  ;;  %v3714_v54 = vpop.permute.xlu0 %3713 }
 0xd94   : > { %v3712_v10 = vpop.permute.xlu1 %3711 }
 0xd95   : > { %v3742_v16 = vsel %vm3735_vm9, %v3712_v10, %v3714_v54 }
 0xd96   : > { %3775 = vmatpush1.bf16.msra.mxu1 %v3742_v16 }
 0xd97   : > { %3776 = vmatprep.subr.bf16.mxu1 %v7441_v44 }
 0xd98   : > { %v3710_v11 = vpop.permute.xlu0 %3709 }
 0xd99   : > { %v3708_v15 = vpop.permute.xlu1 %3707 }
 0xd9a   : > { %v3741_v25 = vsel %vm3735_vm9, %v3708_v15, %v3710_v11 }
 0xd9b   : > { %3777 = vmatpush1.bf16.msra.mxu1 %v3741_v25 }
 0xd9c   : > { %v3706_v4 = vpop.permute.xlu0 %3705  ;;  %3778 = vmatprep.subr.bf16.mxu1 %v7441_v44 }
 0xd9d   : > { %v3704_v39 = vpop.permute.xlu1 %3703 }
 0xd9e   : > { %v3740_v7 = vsel %vm3735_vm9, %v3704_v39, %v3706_v4 }
 0xd9f   : > { %3779 = vmatpush1.bf16.msra.mxu1 %v3740_v7 }
 0xda0   : > { %v3702_v18 = vpop.permute.xlu0 %3701  ;;  %3780 = vmatprep.subr.bf16.mxu1 %v7441_v44 }
 0xda1   : > { %v3700_v42 = vpop.permute.xlu1 %3699 }
 0xda2   : > { %v3739_v21 = vsel %vm3735_vm9, %v3700_v42, %v3702_v18 }
 0xda3   : > { %3781 = vmatpush1.bf16.msra.mxu1 %v3739_v21 }
 0xda4   : > { %v3698_v1 = vpop.permute.xlu0 %3697  ;;  %3782 = vmatprep.subr.bf16.mxu1 %v7441_v44 }
 0xda5   : > { %v3696_v40 = vpop.permute.xlu1 %3695 }
 0xda6   : > { %v3738_v47 = vsel %vm3735_vm9, %v3696_v40, %v3698_v1 }
 0xda7   : > { %3783 = vmatpush1.bf16.msra.mxu1 %v3738_v47 }
 0xda8   : > { %v3694_v8 = vpop.permute.xlu0 %3693  ;;  %3784 = vmatprep.subr.bf16.mxu1 %v7441_v44 }
 0xda9   : > { %v3692_v20 = vpop.permute.xlu1 %3691 }
 0xdaa   : > { %v3737_v49 = vsel %vm3735_vm9, %v3692_v20, %v3694_v8 }
 0xdab   : > { %3785 = vmatpush1.bf16.msra.mxu1 %v3737_v49 }
 0xdac   : > { %v3690_v9 = vpop.permute.xlu0 %3689  ;;  %3786 = vmatprep.subr.bf16.mxu1 %v7441_v44 }
 0xdad   : > { %v3688_v43 = vpop.permute.xlu1 %3687 }
 0xdae   : > { %v3736_v33 = vsel %vm3735_vm9, %v3688_v43, %v3690_v9 }
 0xdaf   : > { %3787 = vmatpush1.bf16.msra.mxu1 %v3736_v33 }
 0xdb0   : > { %v3734_v61 = vpop.permute.xlu0 %3733  ;;  %3796 = vmatprep.subr.bf16.mxu1 %v7441_v44 }
 0xdb1   : > { %v3732_v45 = vpop.permute.xlu1 %3731 }
 0xdb2   : > { %v3747_v63 = vsel %vm3735_vm9, %v3732_v45, %v3734_v61 }
 0xdb3   : > { %3797 = vmatpush2.bf16.msra.mxu1 %v3747_v63 }
 0xdb4   : > { %v3730_v60 = vpop.permute.xlu0 %3729  ;;  %3798 = vmatprep.subr.bf16.mxu1 %v7441_v44 }
 0xdb5   : > { %v3728_v13 = vpop.permute.xlu1 %3727 }
 0xdb6   : > { %v3746_v19 = vsel %vm3735_vm9, %v3728_v13, %v3730_v60 }
 0xdb7   : > { %3799 = vmatpush2.bf16.msra.mxu1 %v3746_v19 }
 0xdb8   : > { %v3726_v59 = vpop.permute.xlu0 %3725  ;;  %3800 = vmatprep.subr.bf16.mxu1 %v7441_v44 }
 0xdb9   : > { %v3724_v31 = vpop.permute.xlu1 %3723 }
 0xdba   : > { %v3745_v17 = vsel %vm3735_vm9, %v3724_v31, %v3726_v59 }
 0xdbb   : > { %3801 = vmatpush2.bf16.msra.mxu1 %v3745_v17 }
 0xdbc   : > { %v3722_v48 = vpop.permute.xlu0 %3721  ;;  %3802 = vmatprep.subr.bf16.mxu1 %v7441_v44  ;;  %v5069_v44 = vld [vmem:[%s7420_s2 + $0x164] ss:$8 sps:$4 sm:$0xff]  }
 0xdbd   : > { %v3720_v12 = vpop.permute.xlu1 %3719 }
 0xdbe   : > { %v3744_v41 = vsel %vm3735_vm9, %v3720_v12, %v3722_v48 }
 0xdbf   : > { %3803 = vmatpush2.bf16.msra.mxu1 %v3744_v41 }
 0xdc2   : > { %3805 = vmatmul.mubr.bf16.vlgmr.msra.gmra.mxu1 %v5063_v56 }
 0xdc3   : > { %4222 = vmatprep.mubr.msk.bf16.mxu1 %vm723_vm0, %v5066_v29 }
 0xdc9   : > { %v3595_v5 = vpop.permute.xlu0 %3594 }
 0xdca   : > { %3813 = vmatmul.mubr.bf16.gmra.mxu1 %v5068_v37  ;;  %v3590_v62 = vpop.permute.xlu1 %3589 }
 0xdcb   : > { %4223 = vmatprep.mubr.msk.bf16.mxu1 %vm723_vm0, %v5069_v44 }
 0xdcd   : > { %v3605_v46 = vpop.permute.xlu0 %3604 }
 0xdce   : > { %v3600_v34 = vpop.permute.xlu1 %3599 }
 0xdd1   : > { %v3615_v22 = vpop.permute.xlu0 %3614 }
 0xdd2   : > { %3821 = vmatmul.mubr.bf16.gmra.mxu1 %v5071_v27  ;;  %v3610_v50 = vpop.permute.xlu1 %3609 }
 0xdd3   : > { %4224 = vmatprep.mubr.msk.bf16.mxu1 %vm723_vm0, %v5072_v26 }
 0xdd5   : > { %v7333_v55 = vpop.permute.xlu0 %3624 }
 0xdd6   : > { %v3620_v0 = vpop.permute.xlu1 %3619 }
 0xdd9   : > { %v3856_v23 = vpop.permute.xlu0 %3855 }
 0xdda   : > { %3829 = vmatmul.mubr.bf16.gmra.mxu1 %v5074_v38  ;;  %v3854_v30 = vpop.permute.xlu1 %3853 }
 0xddb   : > { %v3885_v14 = vsel %vm1734_vm1, %v3854_v30, %v3856_v23 }
 0xddd   : > { %v3860_v32 = vpop.permute.xlu0 %3859 }
 0xdde   : > { %v3858_v24 = vpop.permute.xlu1 %3857 }
 0xddf   : > { %v3886_v36 = vsel %vm1734_vm1, %v3858_v24, %v3860_v32 }
 0xde1   : > { %v3864_v51 = vpop.permute.xlu0 %3863 }
 0xde2   : > { %v3862_v58 = vpop.permute.xlu1 %3861 }
 0xde3   : > { %v3887_v4 = vsel %vm1734_vm1, %v3862_v58, %v3864_v51 }
 0xde5   : > { %v3868_v52 = vpop.permute.xlu0 %3867 }
 0xde6   : > { %v3866_v2 = vpop.permute.xlu1 %3865 }
 0xde7   : > { %v3888_v21 = vsel %vm1734_vm1, %v3866_v2, %v3868_v52 }
 0xde9   : > { %v3872_v11 = vpop.permute.xlu0 %3871 }
 0xdea   : > { %v3870_v15 = vpop.permute.xlu1 %3869 }
 0xdeb   : > { %v3889_v9 = vsel %vm1734_vm1, %v3870_v15, %v3872_v11 }
 0xded   : > { %v3876_v40 = vpop.permute.xlu0 %3875 }
 0xdee   : > { %v3874_v47 = vpop.permute.xlu1 %3873 }
 0xdef   : > { %v3890_v13 = vsel %vm1734_vm1, %v3874_v47, %v3876_v40 }
 0xdf1   : > { %v3880_v45 = vpop.permute.xlu0 %3879 }
 0xdf2   : > { %v3878_v63 = vpop.permute.xlu1 %3877 }
 0xdf3   : > { %v3891_v48 = vsel %vm1734_vm1, %v3878_v63, %v3880_v45 }
 0xdf5   : > { %v3884_v41 = vpop.permute.xlu0 %3883 }
 0xdf6   : > { %v3882_v56 = vpop.permute.xlu1 %3881 }
 0xdf7   : > { %v3892_v27 = vsel %vm1734_vm1, %v3882_v56, %v3884_v41 }
 0xe82   : > { %v3806_v35 = vpop.f32.mrf.mxu1 }
 0xe83   : > { %v3807_v28 = vadd.f32 %v3806_v35, %v3590_v62 }
 0xe84   : > { %v3808_v6 = vpop.f32.mrf.mxu1 }
 0xe85   : > { %v3901_v57 = vadd.f32 %v3885_v14, %v3807_v28 }
 0xe86   : > { %v3809_v3 = vpop.f32.mrf.mxu1 }
 0xe87   : > { %3909 = vst [vmem:[%s7337_s12] sm:$0xff] %v3901_v57  ;;  %v3810_v53 = vadd.f32 %v3809_v3, %v3595_v5 }
 0xe88   : > { %v3811_v54 = vpop.f32.mrf.mxu1 }
 0xe89   : > { %v3902_v10 = vadd.f32 %v3886_v36, %v3810_v53 }
 0xe8a   : > { %v3814_v16 = vpop.f32.mrf.mxu1 }
 0xe8b   : > { %3910 = vst [vmem:[%s7337_s12 + $0x8] sm:$0xff] %v3902_v10  ;;  %v3815_v25 = vadd.f32 %v3814_v16, %v3600_v34 }
 0xe8c   : > { %v3816_v39 = vpop.f32.mrf.mxu1 }
 0xe8d   : > { %v3903_v7 = vadd.f32 %v3887_v4, %v3815_v25 }
 0xe8e   : > { %v3817_v18 = vpop.f32.mrf.mxu1 }
 0xe8f   : > { %3911 = vst [vmem:[%s7337_s12 + $0x10] sm:$0xff] %v3903_v7  ;;  %v3818_v42 = vadd.f32 %v3817_v18, %v3605_v46 }
 0xe90   : > { %v3819_v1 = vpop.f32.mrf.mxu1 }
 0xe91   : > { %v3904_v8 = vadd.f32 %v3888_v21, %v3818_v42 }
 0xe92   : > { %v3822_v20 = vpop.f32.mrf.mxu1 }
 0xe93   : > { %3912 = vst [vmem:[%s7337_s12 + $0x18] sm:$0xff] %v3904_v8  ;;  %v3823_v49 = vadd.f32 %v3822_v20, %v3610_v50 }
 0xe94   : > { %v3824_v43 = vpop.f32.mrf.mxu1 }
 0xe95   : > { %v3905_v33 = vadd.f32 %v3889_v9, %v3823_v49 }
 0xe96   : > { %v3825_v61 = vpop.f32.mrf.mxu1 }
 0xe97   : > { %3913 = vst [vmem:[%s7337_s12 + $0x20] sm:$0xff] %v3905_v33  ;;  %v3826_v60 = vadd.f32 %v3825_v61, %v3615_v22 }
 0xe98   : > { %v3827_v19 = vpop.f32.mrf.mxu1 }
 0xe99   : > { %v3906_v59 = vadd.f32 %v3890_v13, %v3826_v60 }
 0xe9a   : > { %v3830_v31 = vpop.f32.mrf.mxu1 }
 0xe9b   : > { %3914 = vst [vmem:[%s7337_s12 + $0x28] sm:$0xff] %v3906_v59  ;;  %v3831_v17 = vadd.f32 %v3830_v31, %v3620_v0 }
 0xe9c   : > { %v3832_v12 = vpop.f32.mrf.mxu1 }
 0xe9d   : > { %v3907_v29 = vadd.f32 %v3891_v48, %v3831_v17 }
 0xe9e   : > { %v3833_v37 = vpop.f32.mrf.mxu1 }
 0xe9f   : > { %3915 = vst [vmem:[%s7337_s12 + $0x30] sm:$0xff] %v3907_v29  ;;  %v3834_v44 = vadd.f32 %v3833_v37, %v7333_v55 }
 0xea0   : > { %v3835_v26 = vpop.f32.mrf.mxu1 }
 0xea1   : > { %v3908_v38 = vadd.f32 %v3892_v27, %v3834_v44 }
 0xea3   : > { %3916 = vst [vmem:[%s7337_s12 + $0x38] sm:$0xff] %v3908_v38 }
 0xea4   : > { %5088 = shalt.err (!%p5085_p11)
}
 0xea5   : > { %s5089_s11 = scalar_lea.hbm %s7362_s24, 1024  ;;  %s5093_s13 = scalar_lea.hbm %s7422_s4, 6144 }
 0xea6   : > { %p5090_p12 = scmp.ne.s32.totalorder %s7362_s24, %s5089_s11  ;;  %p5094_p1 = scmp.lt.s32.totalorder %s7362_s24, %s7422_s4 }
 0xea7   : > { %p5095_p2 = scmp.lt.s32.totalorder %s5093_s13, %s5089_s11 }
 0xea8   : > { %p5091_p13 = pnand %p5090_p12, %p5273_p8 }
 0xea9   : > { %p5096_p3 = por %p5095_p2, %p5094_p1 }
 0xeaa   : > { %p5092_p0 = pneg %p5091_p13 }
 0xeac   : > { %p5097_p4 = pnand %p5096_p3, %p5092_p0 }
 0xeae   : > { %5100 = shalt.err (!%p5097_p4)
}
 0xeaf   : > { %s5185_s14 = smov 128   ;;  %s5186_s23 = smov 384  }
 0xeb0   : > { %s5187_s7 = smov 8  }
 0xeb1   : > { %4232 = dma.vmem_to_hbm [thread:$0]  (%p5273_p8), %s7354_s28, 1024, %s7362_s24, %s7367_s27, %s5185_s14, %s5186_s23, %s5187_s7  }
 0xeb2 PF: > { %p4238_p5 = scmp.ge.s32.totalorder %s5167_s22, 2  ;;  %s3947_s6 = sand.u32 1, %s5139_s15  }
 0xeb3   : > { %s3948_s9 = scalar_lea.sflag [#allocation4], %s3947_s6 }
 0xeb4   : > { %p4235_p6 = pnand %p4238_p5, %p5277_p9 }
 0xeb6   : > { %p4236_p7 = pneg %p4235_p6 }
 0xeb8   : > { %5134 = dma.done.wait (%p4236_p7), %s3948_s9, 1024  }
 0xeb9   : > { %5136 = vsyncadd (%p4236_p7), %s3948_s9, 4294966272  ;;  %s17_s22 = sadd.s32 1, %s5167_s22   ;;  %s7445_s15 = smov %s5143_s16 }
 0xeba   : > { %p14_p10 = scmp.ge.s32.totalorder %s17_s22, 8   ;;  %s7446_s16 = smov %s5147_s17 }
 0xebb   : > { %s7447_s17 = smov %s5285_s8  ;;  %s7448_s18 = smov %s5159_s20 }
 0xebc   : > { %s7449_s19 = smov %s5163_s21  ;;  %s7450_s20 = smov %s7453_s25 }
 0xebd   : > { %s7451_s21 = smov %s7457_s26  ;;  %16 = sbr.rel (!%p14_p10) target bundleno = 5 (0x5), region = 127 }
 0xec2   :  { %3953 = vsyncpa [#allocation4], 1 }
 0xec3   :  { %3955 = vsyncpa [#allocation4 + $0x1], 1 }

</bundles_post_ra>
